<compile_context>
chip_gen: v5e
topology: v5e:2x2
jax: 0.10.0
libtpu: 0.0.40
codegen_flags: <defaults>
</compile_context>

<pallas_src>
import functools

import jax
import jax.numpy as jnp
import numpy as np
from jax.experimental import pallas as pl
from jax.experimental.pallas import tpu as pltpu

BN_EPS = 1e-5
LANE = 128  # lane width; channels are zero-padded to a multiple of this


def _round_up(x, m):
    return (x + m - 1) // m * m


# ----------------------------- Pallas kernels ------------------------------

def _conv3x3_stats_kernel(H, W, xp_ref, w_ref, t_ref, stats_ref):
    """conv1 as 9 accumulated MXU matmuls + per-image BN partial statistics.

    xp_ref    : (1, H+2, W+2, Cp) f32  spatially zero-padded, channel-padded image
    w_ref     : (9, Cp, Cp)       bf16 per-tap weight matrices (VMEM-resident)
    t_ref     : (H*W, Cp)         f32  pre-BN conv output (lane-dense)
    stats_ref : (1, 2, Cp)        f32  per-image [sum, sum_of_squares]
    """
    Cp = w_ref.shape[-1]
    acc = jnp.zeros((H * W, Cp), jnp.float32)
    for kh in range(3):
        for kw in range(3):
            win = xp_ref[0, kh:kh + H, kw:kw + W, :]              # (H, W, Cp) f32
            win = win.reshape(H * W, Cp).astype(jnp.bfloat16)     # bf16 MXU operand
            acc = acc + jnp.dot(win, w_ref[kh * 3 + kw],
                                preferred_element_type=jnp.float32)
    t_ref[...] = acc
    s = jnp.sum(acc, axis=0, keepdims=True)
    ss = jnp.sum(acc * acc, axis=0, keepdims=True)
    stats_ref[...] = jnp.concatenate([s, ss], axis=0).reshape(1, 2, Cp)


def _bnrelu_conv3x3_stats_kernel(H, W, t1_ref, scale_ref, shift_ref, w_ref,
                                 t2_ref, stats_ref, ybuf_ref):
    """Fused bn1 (precomputed affine) + relu + conv2 + per-image BN2 stats.

    t1_ref    : (H*W, Cp) f32  pre-BN conv1 output for one image
    scale_ref : (1, Cp)   f32  gamma1 / sqrt(var1 + eps)
    shift_ref : (1, Cp)   f32  beta1 - mean1 * scale1
    w_ref     : (9, Cp, Cp) bf16
    t2_ref    : (H*W, Cp) f32  pre-BN conv2 output
    stats_ref : (1, 2, Cp) f32 per-image [sum, sum_of_squares]
    ybuf_ref  : (H+2, W+16, Cp) f32 scratch: zero halo canvas for y1
    """
    Cp = w_ref.shape[-1]
    # BN1 + ReLU (f32 elementwise)
    y = jnp.maximum(t1_ref[...] * scale_ref[...] + shift_ref[...], 0.0)
    # Build the zero-padded halo canvas in VMEM; image lives at rows [1:H+1],
    # cols [8:8+W] (column offset 8 keeps the interior store sublane-aligned).
    # Zeroed every step -> no cross-iteration residency assumption (megacore-safe).
    ybuf_ref[...] = jnp.zeros_like(ybuf_ref)
    ybuf_ref[1:H + 1, 8:8 + W, :] = y.reshape(H, W, Cp)
    acc = jnp.zeros((H * W, Cp), jnp.float32)
    for kh in range(3):
        for kw in range(3):
            win = ybuf_ref[kh:kh + H, 7 + kw:7 + kw + W, :]       # (H, W, Cp) f32
            win = win.reshape(H * W, Cp).astype(jnp.bfloat16)
            acc = acc + jnp.dot(win, w_ref[kh * 3 + kw],
                                preferred_element_type=jnp.float32)
    t2_ref[...] = acc
    s = jnp.sum(acc, axis=0, keepdims=True)
    ss = jnp.sum(acc * acc, axis=0, keepdims=True)
    stats_ref[...] = jnp.concatenate([s, ss], axis=0).reshape(1, 2, Cp)


def _bn_add_relu_kernel(t2_ref, scale_ref, shift_ref, id_ref, o_ref):
    """out = relu(bn2(t2) + identity), elementwise over an M row-tile."""
    o_ref[...] = jnp.maximum(
        t2_ref[...] * scale_ref[...] + shift_ref[...] + id_ref[...], 0.0)


# ------------------------------- JAX glue -----------------------------------

def _pack_weight(w_hwio, cp):
    """(3,3,Cin,Cout) HWIO -> (9, Cp, Cp) bf16, zero-padded to lane-dense Cp."""
    kh, kw, ci, co = w_hwio.shape
    wp = jnp.zeros((kh * kw, cp, cp), jnp.float32)
    wp = wp.at[:, :ci, :co].set(w_hwio.reshape(kh * kw, ci, co))
    return wp.astype(jnp.bfloat16)


def _pad_channels(v, cp):
    return jnp.pad(v.astype(jnp.float32), (0, cp - v.shape[0]))


def _bn_scale_shift(partial_stats, gamma, beta, count):
    """Finish two-pass BN: per-image (sum, sumsq) -> per-channel affine."""
    s = jnp.sum(partial_stats[:, 0, :], axis=0)
    ss = jnp.sum(partial_stats[:, 1, :], axis=0)
    mean = s / count
    var = jnp.maximum(ss / count - mean * mean, 0.0)   # biased (training-mode) var
    scale = gamma * jax.lax.rsqrt(var + BN_EPS)
    shift = beta - mean * scale
    return scale.reshape(1, -1), shift.reshape(1, -1)


def residual_block_forward(x_nchw, params):
    """Pallas ResidualBlock.forward (stride=1, downsample=None, Cin==Cout)."""
    x = jnp.transpose(x_nchw, (0, 2, 3, 1)).astype(jnp.float32)   # NCHW -> NHWC
    N, H, W, C = x.shape
    Cout = params["w1"].shape[-1]
    assert C == Cout, "identity path requires in_channels == out_channels"
    assert H % 8 == 0 and W % 8 == 0
    Cp = _round_up(max(C, Cout), LANE)                            # lane-dense channels
    M = N * H * W

    compiler_params = pltpu.CompilerParams(
        dimension_semantics=("parallel",),       # images / row-tiles are independent
        vmem_limit_bytes=32 * 1024 * 1024,       # headroom for larger tiles / shapes
    )

    # Channel-pad once (lane-dense) + 1-pixel spatial halo pad (NOT 9x im2col).
    x_cp = jnp.pad(x, ((0, 0), (0, 0), (0, 0), (0, Cp - C)))
    xp = jnp.pad(x_cp, ((0, 0), (1, 1), (1, 1), (0, 0)))          # (N, H+2, W+2, Cp) f32
    identity = x_cp.reshape(M, Cp)                                # residual path, f32

    w1 = _pack_weight(params["w1"], Cp)                           # (9, Cp, Cp) bf16
    w2 = _pack_weight(params["w2"], Cp)
    g1, be1 = _pad_channels(params["g1"], Cp), _pad_channels(params["be1"], Cp)
    g2, be2 = _pad_channels(params["g2"], Cp), _pad_channels(params["be2"], Cp)
    # conv biases b1/b2 deliberately not used: they cancel under batch-stat BN.

    # ---- stage 1: conv1 + per-image BN1 partial stats (grid over images) ----
    t1, stats1 = pl.pallas_call(
        functools.partial(_conv3x3_stats_kernel, H, W),
        grid=(N,),
        in_specs=[
            pl.BlockSpec((1, H + 2, W + 2, Cp), lambda n: (n, 0, 0, 0)),
            pl.BlockSpec((9, Cp, Cp), lambda n: (0, 0, 0)),       # resident weights
        ],
        out_specs=[
            pl.BlockSpec((H * W, Cp), lambda n: (n, 0)),
            pl.BlockSpec((1, 2, Cp), lambda n: (n, 0, 0)),
        ],
        out_shape=[
            jax.ShapeDtypeStruct((M, Cp), jnp.float32),
            jax.ShapeDtypeStruct((N, 2, Cp), jnp.float32),
        ],
        compiler_params=compiler_params,
    )(xp, w1)
    scale1, shift1 = _bn_scale_shift(stats1, g1, be1, M)

    # ---- stage 2: bn1 + relu + conv2 + BN2 partial stats (fused) ------------
    t2, stats2 = pl.pallas_call(
        functools.partial(_bnrelu_conv3x3_stats_kernel, H, W),
        grid=(N,),
        in_specs=[
            pl.BlockSpec((H * W, Cp), lambda n: (n, 0)),
            pl.BlockSpec((1, Cp), lambda n: (0, 0)),
            pl.BlockSpec((1, Cp), lambda n: (0, 0)),
            pl.BlockSpec((9, Cp, Cp), lambda n: (0, 0, 0)),       # resident weights
        ],
        out_specs=[
            pl.BlockSpec((H * W, Cp), lambda n: (n, 0)),
            pl.BlockSpec((1, 2, Cp), lambda n: (n, 0, 0)),
        ],
        out_shape=[
            jax.ShapeDtypeStruct((M, Cp), jnp.float32),
            jax.ShapeDtypeStruct((N, 2, Cp), jnp.float32),
        ],
        scratch_shapes=[pltpu.VMEM((H + 2, W + 16, Cp), jnp.float32)],
        compiler_params=compiler_params,
    )(t1, scale1, shift1, w2)
    scale2, shift2 = _bn_scale_shift(stats2, g2, be2, M)

    # ---- stage 3: bn2 + residual add + relu, tiled over M -------------------
    TM = next((t for t in (1024, 512, 256, 128, 64, 32, 16, 8)
               if M % t == 0 and M // t >= 2), M)
    out_flat = pl.pallas_call(
        _bn_add_relu_kernel,
        grid=(M // TM,),
        in_specs=[
            pl.BlockSpec((TM, Cp), lambda i: (i, 0)),
            pl.BlockSpec((1, Cp), lambda i: (0, 0)),
            pl.BlockSpec((1, Cp), lambda i: (0, 0)),
            pl.BlockSpec((TM, Cp), lambda i: (i, 0)),
        ],
        out_specs=pl.BlockSpec((TM, Cp), lambda i: (i, 0)),
        out_shape=jax.ShapeDtypeStruct((M, Cp), jnp.float32),
        compiler_params=compiler_params,
    )(t2, scale2, shift2, identity)

    out = out_flat.reshape(N, H, W, Cp)[..., :Cout]
    return jnp.transpose(out, (0, 3, 1, 2))                       # NHWC -> NCHW


# ------------------------- pure-JAX reference (check) -----------------------

def reference_forward(x_nchw, params):
    x = jnp.transpose(x_nchw, (0, 2, 3, 1)).astype(jnp.float32)

    def conv(z, w, b):
        y = jax.lax.conv_general_dilated(
            z, w, window_strides=(1, 1), padding="SAME",
            dimension_numbers=("NHWC", "HWIO", "NHWC"),
            precision=jax.lax.Precision.HIGHEST)
        return y + b.reshape(1, 1, 1, -1)

    def bn(y, g, be):
        m = jnp.mean(y, axis=(0, 1, 2), keepdims=True)
        v = jnp.mean((y - m) ** 2, axis=(0, 1, 2), keepdims=True)
        return (y - m) * jax.lax.rsqrt(v + BN_EPS) * g.reshape(1, 1, 1, -1) \
               + be.reshape(1, 1, 1, -1)

    out = jnp.maximum(bn(conv(x, params["w1"], params["b1"]),
                         params["g1"], params["be1"]), 0.0)
    out = bn(conv(out, params["w2"], params["b2"]),
             params["g2"], params["be2"]) + x
    out = jnp.maximum(out, 0.0)
    return jnp.transpose(out, (0, 3, 1, 2))


# --------------------------------- main --------------------------------------

if __name__ == "__main__":
    N, C, Hdim, Wdim = 2, 8, 16, 16

    key = jax.random.PRNGKey(0)
    ks = jax.random.split(key, 8)
    params = {
        # conv weights stored as HWIO = (3, 3, Cin, Cout)
        "w1":  jax.random.normal(ks[0], (3, 3, C, C), jnp.float32) * 0.1,
        "b1":  jax.random.normal(ks[1], (C,), jnp.float32) * 0.05,  # cancelled by BN
        "g1":  1.0 + 0.1 * jax.random.normal(ks[2], (C,), jnp.float32),
        "be1": 0.05 * jax.random.normal(ks[3], (C,), jnp.float32),
        "w2":  jax.random.normal(ks[4], (3, 3, C, C), jnp.float32) * 0.1,
        "b2":  jax.random.normal(ks[5], (C,), jnp.float32) * 0.05,  # cancelled by BN
        "g2":  1.0 + 0.1 * jax.random.normal(ks[6], (C,), jnp.float32),
        "be2": 0.05 * jax.random.normal(ks[7], (C,), jnp.float32),
    }

    x = jax.random.normal(jax.random.PRNGKey(1), (N, C, Hdim, Wdim), jnp.float32)

    fwd = jax.jit(residual_block_forward)
    out = jax.block_until_ready(fwd(x, params))
    assert out.shape == (N, C, Hdim, Wdim)

    ref = jax.block_until_ready(reference_forward(x, params))
    # bf16 MXU operands with f32 accumulation -> ~1e-2-level tolerance.
    np.testing.assert_allclose(np.asarray(out), np.asarray(ref),
                               rtol=2e-2, atol=2e-2)

    print("KERNEL_OK")
</pallas_src>

<mosaic_0001>
module attributes {stable_mosaic.version = 11 : i64} {
  func.func @_conv3x3_stats_kernel(%arg0: i32, %arg1: memref<1x18x18x128xf32, #tpu.memory_space<vmem>>, %arg2: memref<9x128x128xbf16, #tpu.memory_space<vmem>>, %arg3: memref<256x128xf32, #tpu.memory_space<vmem>>, %arg4: memref<1x2x128xf32, #tpu.memory_space<vmem>>) attributes {dimension_semantics = [#tpu.dimension_semantics<parallel>], iteration_bounds = array<i64: 2>, scalar_prefetch = 0 : i64, scratch_operands = 0 : i64, tpu.core_type = #tpu.core_type<tc>, window_params = [{transform_indices = @transform_0, window_bounds = array<i64: 1, 18, 18, 128>}, {pipeline_mode = #tpu.pipeline_mode<synchronous>, transform_indices = @transform_1, window_bounds = array<i64: 9, 128, 128>}, {transform_indices = @transform_2, window_bounds = array<i64: 256, 128>}, {transform_indices = @transform_3, window_bounds = array<i64: 1, 2, 128>}]} {
    %cst = arith.constant 0.000000e+00 : f32
    %0 = vector.broadcast %cst : f32 to vector<256x128xf32>
    %c0 = arith.constant 0 : index
    %c0_0 = arith.constant 0 : index
    %c0_1 = arith.constant 0 : index
    %c0_2 = arith.constant 0 : index
    %1 = vector.load %arg1[%c0, %c0_0, %c0_1, %c0_2] : memref<1x18x18x128xf32, #tpu.memory_space<vmem>>, vector<1x16x16x128xf32>
    %2 = vector.shape_cast %1 : vector<1x16x16x128xf32> to vector<16x16x128xf32>
    %3 = vector.shape_cast %2 : vector<16x16x128xf32> to vector<256x128xf32>
    %4 = arith.truncf %3 : vector<256x128xf32> to vector<256x128xbf16>
    %c0_3 = arith.constant 0 : index
    %c0_4 = arith.constant 0 : index
    %c0_5 = arith.constant 0 : index
    %5 = vector.load %arg2[%c0_3, %c0_4, %c0_5] : memref<9x128x128xbf16, #tpu.memory_space<vmem>>, vector<1x128x128xbf16>
    %6 = vector.shape_cast %5 : vector<1x128x128xbf16> to vector<128x128xbf16>
    %cst_6 = arith.constant dense<0.000000e+00> : vector<256x128xf32>
    %7 = tpu.matmul %4, %6, %cst_6 {dimension_numbers = #tpu.dot_dimension_numbers<[1], [0], [0], [1], [0, 0, 1, 1], [], []>} : vector<256x128xbf16>, vector<128x128xbf16>, vector<256x128xf32> -> vector<256x128xf32>
    %8 = arith.addf %0, %7 : vector<256x128xf32>
    %c0_7 = arith.constant 0 : index
    %c0_8 = arith.constant 0 : index
    %c1 = arith.constant 1 : index
    %c0_9 = arith.constant 0 : index
    %9 = vector.load %arg1[%c0_7, %c0_8, %c1, %c0_9] : memref<1x18x18x128xf32, #tpu.memory_space<vmem>>, vector<1x16x16x128xf32>
    %10 = vector.shape_cast %9 : vector<1x16x16x128xf32> to vector<16x16x128xf32>
    %11 = vector.shape_cast %10 : vector<16x16x128xf32> to vector<256x128xf32>
    %12 = arith.truncf %11 : vector<256x128xf32> to vector<256x128xbf16>
    %c1_10 = arith.constant 1 : index
    %c0_11 = arith.constant 0 : index
    %c0_12 = arith.constant 0 : index
    %13 = vector.load %arg2[%c1_10, %c0_11, %c0_12] : memref<9x128x128xbf16, #tpu.memory_space<vmem>>, vector<1x128x128xbf16>
    %14 = vector.shape_cast %13 : vector<1x128x128xbf16> to vector<128x128xbf16>
    %cst_13 = arith.constant dense<0.000000e+00> : vector<256x128xf32>
    %15 = tpu.matmul %12, %14, %cst_13 {dimension_numbers = #tpu.dot_dimension_numbers<[1], [0], [0], [1], [0, 0, 1, 1], [], []>} : vector<256x128xbf16>, vector<128x128xbf16>, vector<256x128xf32> -> vector<256x128xf32>
    %16 = arith.addf %8, %15 : vector<256x128xf32>
    %c0_14 = arith.constant 0 : index
    %c0_15 = arith.constant 0 : index
    %c2 = arith.constant 2 : index
    %c0_16 = arith.constant 0 : index
    %17 = vector.load %arg1[%c0_14, %c0_15, %c2, %c0_16] : memref<1x18x18x128xf32, #tpu.memory_space<vmem>>, vector<1x16x16x128xf32>
    %18 = vector.shape_cast %17 : vector<1x16x16x128xf32> to vector<16x16x128xf32>
    %19 = vector.shape_cast %18 : vector<16x16x128xf32> to vector<256x128xf32>
    %20 = arith.truncf %19 : vector<256x128xf32> to vector<256x128xbf16>
    %c2_17 = arith.constant 2 : index
    %c0_18 = arith.constant 0 : index
    %c0_19 = arith.constant 0 : index
    %21 = vector.load %arg2[%c2_17, %c0_18, %c0_19] : memref<9x128x128xbf16, #tpu.memory_space<vmem>>, vector<1x128x128xbf16>
    %22 = vector.shape_cast %21 : vector<1x128x128xbf16> to vector<128x128xbf16>
    %cst_20 = arith.constant dense<0.000000e+00> : vector<256x128xf32>
    %23 = tpu.matmul %20, %22, %cst_20 {dimension_numbers = #tpu.dot_dimension_numbers<[1], [0], [0], [1], [0, 0, 1, 1], [], []>} : vector<256x128xbf16>, vector<128x128xbf16>, vector<256x128xf32> -> vector<256x128xf32>
    %24 = arith.addf %16, %23 : vector<256x128xf32>
    %c0_21 = arith.constant 0 : index
    %c1_22 = arith.constant 1 : index
    %c0_23 = arith.constant 0 : index
    %c0_24 = arith.constant 0 : index
    %25 = vector.load %arg1[%c0_21, %c1_22, %c0_23, %c0_24] : memref<1x18x18x128xf32, #tpu.memory_space<vmem>>, vector<1x16x16x128xf32>
    %26 = vector.shape_cast %25 : vector<1x16x16x128xf32> to vector<16x16x128xf32>
    %27 = vector.shape_cast %26 : vector<16x16x128xf32> to vector<256x128xf32>
    %28 = arith.truncf %27 : vector<256x128xf32> to vector<256x128xbf16>
    %c3 = arith.constant 3 : index
    %c0_25 = arith.constant 0 : index
    %c0_26 = arith.constant 0 : index
    %29 = vector.load %arg2[%c3, %c0_25, %c0_26] : memref<9x128x128xbf16, #tpu.memory_space<vmem>>, vector<1x128x128xbf16>
    %30 = vector.shape_cast %29 : vector<1x128x128xbf16> to vector<128x128xbf16>
    %cst_27 = arith.constant dense<0.000000e+00> : vector<256x128xf32>
    %31 = tpu.matmul %28, %30, %cst_27 {dimension_numbers = #tpu.dot_dimension_numbers<[1], [0], [0], [1], [0, 0, 1, 1], [], []>} : vector<256x128xbf16>, vector<128x128xbf16>, vector<256x128xf32> -> vector<256x128xf32>
    %32 = arith.addf %24, %31 : vector<256x128xf32>
    %c0_28 = arith.constant 0 : index
    %c1_29 = arith.constant 1 : index
    %c1_30 = arith.constant 1 : index
    %c0_31 = arith.constant 0 : index
    %33 = vector.load %arg1[%c0_28, %c1_29, %c1_30, %c0_31] : memref<1x18x18x128xf32, #tpu.memory_space<vmem>>, vector<1x16x16x128xf32>
    %34 = vector.shape_cast %33 : vector<1x16x16x128xf32> to vector<16x16x128xf32>
    %35 = vector.shape_cast %34 : vector<16x16x128xf32> to vector<256x128xf32>
    %36 = arith.truncf %35 : vector<256x128xf32> to vector<256x128xbf16>
    %c4 = arith.constant 4 : index
    %c0_32 = arith.constant 0 : index
    %c0_33 = arith.constant 0 : index
    %37 = vector.load %arg2[%c4, %c0_32, %c0_33] : memref<9x128x128xbf16, #tpu.memory_space<vmem>>, vector<1x128x128xbf16>
    %38 = vector.shape_cast %37 : vector<1x128x128xbf16> to vector<128x128xbf16>
    %cst_34 = arith.constant dense<0.000000e+00> : vector<256x128xf32>
    %39 = tpu.matmul %36, %38, %cst_34 {dimension_numbers = #tpu.dot_dimension_numbers<[1], [0], [0], [1], [0, 0, 1, 1], [], []>} : vector<256x128xbf16>, vector<128x128xbf16>, vector<256x128xf32> -> vector<256x128xf32>
    %40 = arith.addf %32, %39 : vector<256x128xf32>
    %c0_35 = arith.constant 0 : index
    %c1_36 = arith.constant 1 : index
    %c2_37 = arith.constant 2 : index
    %c0_38 = arith.constant 0 : index
    %41 = vector.load %arg1[%c0_35, %c1_36, %c2_37, %c0_38] : memref<1x18x18x128xf32, #tpu.memory_space<vmem>>, vector<1x16x16x128xf32>
    %42 = vector.shape_cast %41 : vector<1x16x16x128xf32> to vector<16x16x128xf32>
    %43 = vector.shape_cast %42 : vector<16x16x128xf32> to vector<256x128xf32>
    %44 = arith.truncf %43 : vector<256x128xf32> to vector<256x128xbf16>
    %c5 = arith.constant 5 : index
    %c0_39 = arith.constant 0 : index
    %c0_40 = arith.constant 0 : index
    %45 = vector.load %arg2[%c5, %c0_39, %c0_40] : memref<9x128x128xbf16, #tpu.memory_space<vmem>>, vector<1x128x128xbf16>
    %46 = vector.shape_cast %45 : vector<1x128x128xbf16> to vector<128x128xbf16>
    %cst_41 = arith.constant dense<0.000000e+00> : vector<256x128xf32>
    %47 = tpu.matmul %44, %46, %cst_41 {dimension_numbers = #tpu.dot_dimension_numbers<[1], [0], [0], [1], [0, 0, 1, 1], [], []>} : vector<256x128xbf16>, vector<128x128xbf16>, vector<256x128xf32> -> vector<256x128xf32>
    %48 = arith.addf %40, %47 : vector<256x128xf32>
    %c0_42 = arith.constant 0 : index
    %c2_43 = arith.constant 2 : index
    %c0_44 = arith.constant 0 : index
    %c0_45 = arith.constant 0 : index
    %49 = vector.load %arg1[%c0_42, %c2_43, %c0_44, %c0_45] : memref<1x18x18x128xf32, #tpu.memory_space<vmem>>, vector<1x16x16x128xf32>
    %50 = vector.shape_cast %49 : vector<1x16x16x128xf32> to vector<16x16x128xf32>
    %51 = vector.shape_cast %50 : vector<16x16x128xf32> to vector<256x128xf32>
    %52 = arith.truncf %51 : vector<256x128xf32> to vector<256x128xbf16>
    %c6 = arith.constant 6 : index
    %c0_46 = arith.constant 0 : index
    %c0_47 = arith.constant 0 : index
    %53 = vector.load %arg2[%c6, %c0_46, %c0_47] : memref<9x128x128xbf16, #tpu.memory_space<vmem>>, vector<1x128x128xbf16>
    %54 = vector.shape_cast %53 : vector<1x128x128xbf16> to vector<128x128xbf16>
    %cst_48 = arith.constant dense<0.000000e+00> : vector<256x128xf32>
    %55 = tpu.matmul %52, %54, %cst_48 {dimension_numbers = #tpu.dot_dimension_numbers<[1], [0], [0], [1], [0, 0, 1, 1], [], []>} : vector<256x128xbf16>, vector<128x128xbf16>, vector<256x128xf32> -> vector<256x128xf32>
    %56 = arith.addf %48, %55 : vector<256x128xf32>
    %c0_49 = arith.constant 0 : index
    %c2_50 = arith.constant 2 : index
    %c1_51 = arith.constant 1 : index
    %c0_52 = arith.constant 0 : index
    %57 = vector.load %arg1[%c0_49, %c2_50, %c1_51, %c0_52] : memref<1x18x18x128xf32, #tpu.memory_space<vmem>>, vector<1x16x16x128xf32>
    %58 = vector.shape_cast %57 : vector<1x16x16x128xf32> to vector<16x16x128xf32>
    %59 = vector.shape_cast %58 : vector<16x16x128xf32> to vector<256x128xf32>
    %60 = arith.truncf %59 : vector<256x128xf32> to vector<256x128xbf16>
    %c7 = arith.constant 7 : index
    %c0_53 = arith.constant 0 : index
    %c0_54 = arith.constant 0 : index
    %61 = vector.load %arg2[%c7, %c0_53, %c0_54] : memref<9x128x128xbf16, #tpu.memory_space<vmem>>, vector<1x128x128xbf16>
    %62 = vector.shape_cast %61 : vector<1x128x128xbf16> to vector<128x128xbf16>
    %cst_55 = arith.constant dense<0.000000e+00> : vector<256x128xf32>
    %63 = tpu.matmul %60, %62, %cst_55 {dimension_numbers = #tpu.dot_dimension_numbers<[1], [0], [0], [1], [0, 0, 1, 1], [], []>} : vector<256x128xbf16>, vector<128x128xbf16>, vector<256x128xf32> -> vector<256x128xf32>
    %64 = arith.addf %56, %63 : vector<256x128xf32>
    %c0_56 = arith.constant 0 : index
    %c2_57 = arith.constant 2 : index
    %c2_58 = arith.constant 2 : index
    %c0_59 = arith.constant 0 : index
    %65 = vector.load %arg1[%c0_56, %c2_57, %c2_58, %c0_59] : memref<1x18x18x128xf32, #tpu.memory_space<vmem>>, vector<1x16x16x128xf32>
    %66 = vector.shape_cast %65 : vector<1x16x16x128xf32> to vector<16x16x128xf32>
    %67 = vector.shape_cast %66 : vector<16x16x128xf32> to vector<256x128xf32>
    %68 = arith.truncf %67 : vector<256x128xf32> to vector<256x128xbf16>
    %c8 = arith.constant 8 : index
    %c0_60 = arith.constant 0 : index
    %c0_61 = arith.constant 0 : index
    %69 = vector.load %arg2[%c8, %c0_60, %c0_61] : memref<9x128x128xbf16, #tpu.memory_space<vmem>>, vector<1x128x128xbf16>
    %70 = vector.shape_cast %69 : vector<1x128x128xbf16> to vector<128x128xbf16>
    %cst_62 = arith.constant dense<0.000000e+00> : vector<256x128xf32>
    %71 = tpu.matmul %68, %70, %cst_62 {dimension_numbers = #tpu.dot_dimension_numbers<[1], [0], [0], [1], [0, 0, 1, 1], [], []>} : vector<256x128xbf16>, vector<128x128xbf16>, vector<256x128xf32> -> vector<256x128xf32>
    %72 = arith.addf %64, %71 : vector<256x128xf32>
    %c0_63 = arith.constant 0 : index
    %c0_64 = arith.constant 0 : index
    %73 = vector.load %arg3[%c0_63, %c0_64] : memref<256x128xf32, #tpu.memory_space<vmem>>, vector<256x128xf32>
    tpu.vector_store %arg3[%c0_63, %c0_64], %72 {strides = array<i32>} : memref<256x128xf32, #tpu.memory_space<vmem>>, vector<256x128xf32>,
    %cst_65 = arith.constant dense<0.000000e+00> : vector<128xf32>
    %74 = vector.multi_reduction <add>, %72, %cst_65 [0] : vector<256x128xf32> to vector<128xf32>
    %75 = vector.shape_cast %74 : vector<128xf32> to vector<1x128xf32>
    %76 = arith.mulf %72, %72 : vector<256x128xf32>
    %cst_66 = arith.constant dense<0.000000e+00> : vector<128xf32>
    %77 = vector.multi_reduction <add>, %76, %cst_66 [0] : vector<256x128xf32> to vector<128xf32>
    %78 = vector.shape_cast %77 : vector<128xf32> to vector<1x128xf32>
    %79 = tpu.concatenate %75, %78 in 0 : vector<1x128xf32>, vector<1x128xf32> -> vector<2x128xf32>
    %80 = vector.shape_cast %79 : vector<2x128xf32> to vector<1x2x128xf32>
    %c0_67 = arith.constant 0 : index
    %c0_68 = arith.constant 0 : index
    %c0_69 = arith.constant 0 : index
    %81 = vector.load %arg4[%c0_67, %c0_68, %c0_69] : memref<1x2x128xf32, #tpu.memory_space<vmem>>, vector<1x2x128xf32>
    tpu.vector_store %arg4[%c0_67, %c0_68, %c0_69], %80 {strides = array<i32>} : memref<1x2x128xf32, #tpu.memory_space<vmem>>, vector<1x2x128xf32>,
    return
  }
  func.func @transform_0(%arg0: i32) -> (i32, i32, i32, i32) {
    %c0_i32 = arith.constant 0 : i32
    %c0_i32_0 = arith.constant 0 : i32
    %c0_i32_1 = arith.constant 0 : i32
    %c0_i32_2 = arith.constant 0 : i32
    return %arg0, %c0_i32, %c0_i32_0, %c0_i32_1 : i32, i32, i32, i32
  }
  func.func @transform_1(%arg0: i32) -> (i32, i32, i32) {
    %c0_i32 = arith.constant 0 : i32
    %c0_i32_0 = arith.constant 0 : i32
    %c0_i32_1 = arith.constant 0 : i32
    %c0_i32_2 = arith.constant 0 : i32
    return %c0_i32, %c0_i32_0, %c0_i32_1 : i32, i32, i32
  }
  func.func @transform_2(%arg0: i32) -> (i32, i32) {
    %c0_i32 = arith.constant 0 : i32
    %c0_i32_0 = arith.constant 0 : i32
    return %arg0, %c0_i32 : i32, i32
  }
  func.func @transform_3(%arg0: i32) -> (i32, i32, i32) {
    %c0_i32 = arith.constant 0 : i32
    %c0_i32_0 = arith.constant 0 : i32
    %c0_i32_1 = arith.constant 0 : i32
    return %arg0, %c0_i32, %c0_i32_0 : i32, i32, i32
  }
}

module attributes {stable_mosaic.version = 11 : i64} {
  func.func @_bn_add_relu_kernel(%arg0: i32, %arg1: memref<256x128xf32, #tpu.memory_space<vmem>>, %arg2: memref<1x128xf32, #tpu.memory_space<vmem>>, %arg3: memref<1x128xf32, #tpu.memory_space<vmem>>, %arg4: memref<256x128xf32, #tpu.memory_space<vmem>>, %arg5: memref<256x128xf32, #tpu.memory_space<vmem>>) attributes {dimension_semantics = [#tpu.dimension_semantics<parallel>], iteration_bounds = array<i64: 2>, scalar_prefetch = 0 : i64, scratch_operands = 0 : i64, tpu.core_type = #tpu.core_type<tc>, window_params = [{transform_indices = @transform_0, window_bounds = array<i64: 256, 128>}, {pipeline_mode = #tpu.pipeline_mode<synchronous>, transform_indices = @transform_1, window_bounds = array<i64: 1, 128>}, {pipeline_mode = #tpu.pipeline_mode<synchronous>, transform_indices = @transform_2, window_bounds = array<i64: 1, 128>}, {transform_indices = @transform_3, window_bounds = array<i64: 256, 128>}, {transform_indices = @transform_4, window_bounds = array<i64: 256, 128>}]} {
    %c0 = arith.constant 0 : index
    %c0_0 = arith.constant 0 : index
    %0 = vector.load %arg1[%c0, %c0_0] : memref<256x128xf32, #tpu.memory_space<vmem>>, vector<256x128xf32>
    %c0_1 = arith.constant 0 : index
    %c0_2 = arith.constant 0 : index
    %1 = vector.load %arg2[%c0_1, %c0_2] : memref<1x128xf32, #tpu.memory_space<vmem>>, vector<1x128xf32>
    %2 = vector.broadcast %1 : vector<1x128xf32> to vector<256x128xf32>
    %3 = arith.mulf %0, %2 : vector<256x128xf32>
    %c0_3 = arith.constant 0 : index
    %c0_4 = arith.constant 0 : index
    %4 = vector.load %arg3[%c0_3, %c0_4] : memref<1x128xf32, #tpu.memory_space<vmem>>, vector<1x128xf32>
    %5 = vector.broadcast %4 : vector<1x128xf32> to vector<256x128xf32>
    %6 = arith.addf %3, %5 : vector<256x128xf32>
    %c0_5 = arith.constant 0 : index
    %c0_6 = arith.constant 0 : index
    %7 = vector.load %arg4[%c0_5, %c0_6] : memref<256x128xf32, #tpu.memory_space<vmem>>, vector<256x128xf32>
    %8 = arith.addf %6, %7 : vector<256x128xf32>
    %cst = arith.constant 0.000000e+00 : f32
    %9 = vector.broadcast %cst : f32 to vector<256x128xf32>
    %10 = arith.maximumf %8, %9 : vector<256x128xf32>
    %c0_7 = arith.constant 0 : index
    %c0_8 = arith.constant 0 : index
    %11 = vector.load %arg5[%c0_7, %c0_8] : memref<256x128xf32, #tpu.memory_space<vmem>>, vector<256x128xf32>
    tpu.vector_store %arg5[%c0_7, %c0_8], %10 {strides = array<i32>} : memref<256x128xf32, #tpu.memory_space<vmem>>, vector<256x128xf32>,
    return
  }
  func.func @transform_0(%arg0: i32) -> (i32, i32) {
    %c0_i32 = arith.constant 0 : i32
    %c0_i32_0 = arith.constant 0 : i32
    return %arg0, %c0_i32 : i32, i32
  }
  func.func @transform_1(%arg0: i32) -> (i32, i32) {
    %c0_i32 = arith.constant 0 : i32
    %c0_i32_0 = arith.constant 0 : i32
    %c0_i32_1 = arith.constant 0 : i32
    return %c0_i32, %c0_i32_0 : i32, i32
  }
  func.func @transform_2(%arg0: i32) -> (i32, i32) {
    %c0_i32 = arith.constant 0 : i32
    %c0_i32_0 = arith.constant 0 : i32
    %c0_i32_1 = arith.constant 0 : i32
    return %c0_i32, %c0_i32_0 : i32, i32
  }
  func.func @transform_3(%arg0: i32) -> (i32, i32) {
    %c0_i32 = arith.constant 0 : i32
    %c0_i32_0 = arith.constant 0 : i32
    return %arg0, %c0_i32 : i32, i32
  }
  func.func @transform_4(%arg0: i32) -> (i32, i32) {
    %c0_i32 = arith.constant 0 : i32
    %c0_i32_0 = arith.constant 0 : i32
    return %arg0, %c0_i32 : i32, i32
  }
}

module attributes {stable_mosaic.version = 11 : i64} {
  func.func @_bnrelu_conv3x3_stats_kernel(%arg0: i32, %arg1: memref<256x128xf32, #tpu.memory_space<vmem>>, %arg2: memref<1x128xf32, #tpu.memory_space<vmem>>, %arg3: memref<1x128xf32, #tpu.memory_space<vmem>>, %arg4: memref<9x128x128xbf16, #tpu.memory_space<vmem>>, %arg5: memref<256x128xf32, #tpu.memory_space<vmem>>, %arg6: memref<1x2x128xf32, #tpu.memory_space<vmem>>, %arg7: memref<18x32x128xf32, #tpu.memory_space<vmem>>) attributes {dimension_semantics = [#tpu.dimension_semantics<parallel>], iteration_bounds = array<i64: 2>, scalar_prefetch = 0 : i64, scratch_operands = 1 : i64, tpu.core_type = #tpu.core_type<tc>, window_params = [{transform_indices = @transform_0, window_bounds = array<i64: 256, 128>}, {pipeline_mode = #tpu.pipeline_mode<synchronous>, transform_indices = @transform_1, window_bounds = array<i64: 1, 128>}, {pipeline_mode = #tpu.pipeline_mode<synchronous>, transform_indices = @transform_2, window_bounds = array<i64: 1, 128>}, {pipeline_mode = #tpu.pipeline_mode<synchronous>, transform_indices = @transform_3, window_bounds = array<i64: 9, 128, 128>}, {transform_indices = @transform_4, window_bounds = array<i64: 256, 128>}, {transform_indices = @transform_5, window_bounds = array<i64: 1, 2, 128>}]} {
    %c0 = arith.constant 0 : index
    %c0_0 = arith.constant 0 : index
    %0 = vector.load %arg1[%c0, %c0_0] : memref<256x128xf32, #tpu.memory_space<vmem>>, vector<256x128xf32>
    %c0_1 = arith.constant 0 : index
    %c0_2 = arith.constant 0 : index
    %1 = vector.load %arg2[%c0_1, %c0_2] : memref<1x128xf32, #tpu.memory_space<vmem>>, vector<1x128xf32>
    %2 = vector.broadcast %1 : vector<1x128xf32> to vector<256x128xf32>
    %3 = arith.mulf %0, %2 : vector<256x128xf32>
    %c0_3 = arith.constant 0 : index
    %c0_4 = arith.constant 0 : index
    %4 = vector.load %arg3[%c0_3, %c0_4] : memref<1x128xf32, #tpu.memory_space<vmem>>, vector<1x128xf32>
    %5 = vector.broadcast %4 : vector<1x128xf32> to vector<256x128xf32>
    %6 = arith.addf %3, %5 : vector<256x128xf32>
    %cst = arith.constant 0.000000e+00 : f32
    %7 = vector.broadcast %cst : f32 to vector<256x128xf32>
    %8 = arith.maximumf %6, %7 : vector<256x128xf32>
    %cst_5 = arith.constant 0.000000e+00 : f32
    %9 = vector.broadcast %cst_5 : f32 to vector<18x32x128xf32>
    %c0_6 = arith.constant 0 : index
    %c0_7 = arith.constant 0 : index
    %c0_8 = arith.constant 0 : index
    %10 = vector.load %arg7[%c0_6, %c0_7, %c0_8] : memref<18x32x128xf32, #tpu.memory_space<vmem>>, vector<18x32x128xf32>
    tpu.vector_store %arg7[%c0_6, %c0_7, %c0_8], %9 {strides = array<i32>} : memref<18x32x128xf32, #tpu.memory_space<vmem>>, vector<18x32x128xf32>,
    %11 = vector.shape_cast %8 : vector<256x128xf32> to vector<16x16x128xf32>
    %c1 = arith.constant 1 : index
    %c8 = arith.constant 8 : index
    %c0_9 = arith.constant 0 : index
    %12 = vector.load %arg7[%c1, %c8, %c0_9] : memref<18x32x128xf32, #tpu.memory_space<vmem>>, vector<16x16x128xf32>
    tpu.vector_store %arg7[%c1, %c8, %c0_9], %11 {strides = array<i32>} : memref<18x32x128xf32, #tpu.memory_space<vmem>>, vector<16x16x128xf32>,
    %cst_10 = arith.constant 0.000000e+00 : f32
    %13 = vector.broadcast %cst_10 : f32 to vector<256x128xf32>
    %c0_11 = arith.constant 0 : index
    %c7 = arith.constant 7 : index
    %c0_12 = arith.constant 0 : index
    %14 = vector.load %arg7[%c0_11, %c7, %c0_12] : memref<18x32x128xf32, #tpu.memory_space<vmem>>, vector<16x16x128xf32>
    %15 = vector.shape_cast %14 : vector<16x16x128xf32> to vector<256x128xf32>
    %16 = arith.truncf %15 : vector<256x128xf32> to vector<256x128xbf16>
    %c0_13 = arith.constant 0 : index
    %c0_14 = arith.constant 0 : index
    %c0_15 = arith.constant 0 : index
    %17 = vector.load %arg4[%c0_13, %c0_14, %c0_15] : memref<9x128x128xbf16, #tpu.memory_space<vmem>>, vector<1x128x128xbf16>
    %18 = vector.shape_cast %17 : vector<1x128x128xbf16> to vector<128x128xbf16>
    %cst_16 = arith.constant dense<0.000000e+00> : vector<256x128xf32>
    %19 = tpu.matmul %16, %18, %cst_16 {dimension_numbers = #tpu.dot_dimension_numbers<[1], [0], [0], [1], [0, 0, 1, 1], [], []>} : vector<256x128xbf16>, vector<128x128xbf16>, vector<256x128xf32> -> vector<256x128xf32>
    %20 = arith.addf %13, %19 : vector<256x128xf32>
    %c0_17 = arith.constant 0 : index
    %c8_18 = arith.constant 8 : index
    %c0_19 = arith.constant 0 : index
    %21 = vector.load %arg7[%c0_17, %c8_18, %c0_19] : memref<18x32x128xf32, #tpu.memory_space<vmem>>, vector<16x16x128xf32>
    %22 = vector.shape_cast %21 : vector<16x16x128xf32> to vector<256x128xf32>
    %23 = arith.truncf %22 : vector<256x128xf32> to vector<256x128xbf16>
    %c1_20 = arith.constant 1 : index
    %c0_21 = arith.constant 0 : index
    %c0_22 = arith.constant 0 : index
    %24 = vector.load %arg4[%c1_20, %c0_21, %c0_22] : memref<9x128x128xbf16, #tpu.memory_space<vmem>>, vector<1x128x128xbf16>
    %25 = vector.shape_cast %24 : vector<1x128x128xbf16> to vector<128x128xbf16>
    %cst_23 = arith.constant dense<0.000000e+00> : vector<256x128xf32>
    %26 = tpu.matmul %23, %25, %cst_23 {dimension_numbers = #tpu.dot_dimension_numbers<[1], [0], [0], [1], [0, 0, 1, 1], [], []>} : vector<256x128xbf16>, vector<128x128xbf16>, vector<256x128xf32> -> vector<256x128xf32>
    %27 = arith.addf %20, %26 : vector<256x128xf32>
    %c0_24 = arith.constant 0 : index
    %c9 = arith.constant 9 : index
    %c0_25 = arith.constant 0 : index
    %28 = vector.load %arg7[%c0_24, %c9, %c0_25] : memref<18x32x128xf32, #tpu.memory_space<vmem>>, vector<16x16x128xf32>
    %29 = vector.shape_cast %28 : vector<16x16x128xf32> to vector<256x128xf32>
    %30 = arith.truncf %29 : vector<256x128xf32> to vector<256x128xbf16>
    %c2 = arith.constant 2 : index
    %c0_26 = arith.constant 0 : index
    %c0_27 = arith.constant 0 : index
    %31 = vector.load %arg4[%c2, %c0_26, %c0_27] : memref<9x128x128xbf16, #tpu.memory_space<vmem>>, vector<1x128x128xbf16>
    %32 = vector.shape_cast %31 : vector<1x128x128xbf16> to vector<128x128xbf16>
    %cst_28 = arith.constant dense<0.000000e+00> : vector<256x128xf32>
    %33 = tpu.matmul %30, %32, %cst_28 {dimension_numbers = #tpu.dot_dimension_numbers<[1], [0], [0], [1], [0, 0, 1, 1], [], []>} : vector<256x128xbf16>, vector<128x128xbf16>, vector<256x128xf32> -> vector<256x128xf32>
    %34 = arith.addf %27, %33 : vector<256x128xf32>
    %c1_29 = arith.constant 1 : index
    %c7_30 = arith.constant 7 : index
    %c0_31 = arith.constant 0 : index
    %35 = vector.load %arg7[%c1_29, %c7_30, %c0_31] : memref<18x32x128xf32, #tpu.memory_space<vmem>>, vector<16x16x128xf32>
    %36 = vector.shape_cast %35 : vector<16x16x128xf32> to vector<256x128xf32>
    %37 = arith.truncf %36 : vector<256x128xf32> to vector<256x128xbf16>
    %c3 = arith.constant 3 : index
    %c0_32 = arith.constant 0 : index
    %c0_33 = arith.constant 0 : index
    %38 = vector.load %arg4[%c3, %c0_32, %c0_33] : memref<9x128x128xbf16, #tpu.memory_space<vmem>>, vector<1x128x128xbf16>
    %39 = vector.shape_cast %38 : vector<1x128x128xbf16> to vector<128x128xbf16>
    %cst_34 = arith.constant dense<0.000000e+00> : vector<256x128xf32>
    %40 = tpu.matmul %37, %39, %cst_34 {dimension_numbers = #tpu.dot_dimension_numbers<[1], [0], [0], [1], [0, 0, 1, 1], [], []>} : vector<256x128xbf16>, vector<128x128xbf16>, vector<256x128xf32> -> vector<256x128xf32>
    %41 = arith.addf %34, %40 : vector<256x128xf32>
    %c1_35 = arith.constant 1 : index
    %c8_36 = arith.constant 8 : index
    %c0_37 = arith.constant 0 : index
    %42 = vector.load %arg7[%c1_35, %c8_36, %c0_37] : memref<18x32x128xf32, #tpu.memory_space<vmem>>, vector<16x16x128xf32>
    %43 = vector.shape_cast %42 : vector<16x16x128xf32> to vector<256x128xf32>
    %44 = arith.truncf %43 : vector<256x128xf32> to vector<256x128xbf16>
    %c4 = arith.constant 4 : index
    %c0_38 = arith.constant 0 : index
    %c0_39 = arith.constant 0 : index
    %45 = vector.load %arg4[%c4, %c0_38, %c0_39] : memref<9x128x128xbf16, #tpu.memory_space<vmem>>, vector<1x128x128xbf16>
    %46 = vector.shape_cast %45 : vector<1x128x128xbf16> to vector<128x128xbf16>
    %cst_40 = arith.constant dense<0.000000e+00> : vector<256x128xf32>
    %47 = tpu.matmul %44, %46, %cst_40 {dimension_numbers = #tpu.dot_dimension_numbers<[1], [0], [0], [1], [0, 0, 1, 1], [], []>} : vector<256x128xbf16>, vector<128x128xbf16>, vector<256x128xf32> -> vector<256x128xf32>
    %48 = arith.addf %41, %47 : vector<256x128xf32>
    %c1_41 = arith.constant 1 : index
    %c9_42 = arith.constant 9 : index
    %c0_43 = arith.constant 0 : index
    %49 = vector.load %arg7[%c1_41, %c9_42, %c0_43] : memref<18x32x128xf32, #tpu.memory_space<vmem>>, vector<16x16x128xf32>
    %50 = vector.shape_cast %49 : vector<16x16x128xf32> to vector<256x128xf32>
    %51 = arith.truncf %50 : vector<256x128xf32> to vector<256x128xbf16>
    %c5 = arith.constant 5 : index
    %c0_44 = arith.constant 0 : index
    %c0_45 = arith.constant 0 : index
    %52 = vector.load %arg4[%c5, %c0_44, %c0_45] : memref<9x128x128xbf16, #tpu.memory_space<vmem>>, vector<1x128x128xbf16>
    %53 = vector.shape_cast %52 : vector<1x128x128xbf16> to vector<128x128xbf16>
    %cst_46 = arith.constant dense<0.000000e+00> : vector<256x128xf32>
    %54 = tpu.matmul %51, %53, %cst_46 {dimension_numbers = #tpu.dot_dimension_numbers<[1], [0], [0], [1], [0, 0, 1, 1], [], []>} : vector<256x128xbf16>, vector<128x128xbf16>, vector<256x128xf32> -> vector<256x128xf32>
    %55 = arith.addf %48, %54 : vector<256x128xf32>
    %c2_47 = arith.constant 2 : index
    %c7_48 = arith.constant 7 : index
    %c0_49 = arith.constant 0 : index
    %56 = vector.load %arg7[%c2_47, %c7_48, %c0_49] : memref<18x32x128xf32, #tpu.memory_space<vmem>>, vector<16x16x128xf32>
    %57 = vector.shape_cast %56 : vector<16x16x128xf32> to vector<256x128xf32>
    %58 = arith.truncf %57 : vector<256x128xf32> to vector<256x128xbf16>
    %c6 = arith.constant 6 : index
    %c0_50 = arith.constant 0 : index
    %c0_51 = arith.constant 0 : index
    %59 = vector.load %arg4[%c6, %c0_50, %c0_51] : memref<9x128x128xbf16, #tpu.memory_space<vmem>>, vector<1x128x128xbf16>
    %60 = vector.shape_cast %59 : vector<1x128x128xbf16> to vector<128x128xbf16>
    %cst_52 = arith.constant dense<0.000000e+00> : vector<256x128xf32>
    %61 = tpu.matmul %58, %60, %cst_52 {dimension_numbers = #tpu.dot_dimension_numbers<[1], [0], [0], [1], [0, 0, 1, 1], [], []>} : vector<256x128xbf16>, vector<128x128xbf16>, vector<256x128xf32> -> vector<256x128xf32>
    %62 = arith.addf %55, %61 : vector<256x128xf32>
    %c2_53 = arith.constant 2 : index
    %c8_54 = arith.constant 8 : index
    %c0_55 = arith.constant 0 : index
    %63 = vector.load %arg7[%c2_53, %c8_54, %c0_55] : memref<18x32x128xf32, #tpu.memory_space<vmem>>, vector<16x16x128xf32>
    %64 = vector.shape_cast %63 : vector<16x16x128xf32> to vector<256x128xf32>
    %65 = arith.truncf %64 : vector<256x128xf32> to vector<256x128xbf16>
    %c7_56 = arith.constant 7 : index
    %c0_57 = arith.constant 0 : index
    %c0_58 = arith.constant 0 : index
    %66 = vector.load %arg4[%c7_56, %c0_57, %c0_58] : memref<9x128x128xbf16, #tpu.memory_space<vmem>>, vector<1x128x128xbf16>
    %67 = vector.shape_cast %66 : vector<1x128x128xbf16> to vector<128x128xbf16>
    %cst_59 = arith.constant dense<0.000000e+00> : vector<256x128xf32>
    %68 = tpu.matmul %65, %67, %cst_59 {dimension_numbers = #tpu.dot_dimension_numbers<[1], [0], [0], [1], [0, 0, 1, 1], [], []>} : vector<256x128xbf16>, vector<128x128xbf16>, vector<256x128xf32> -> vector<256x128xf32>
    %69 = arith.addf %62, %68 : vector<256x128xf32>
    %c2_60 = arith.constant 2 : index
    %c9_61 = arith.constant 9 : index
    %c0_62 = arith.constant 0 : index
    %70 = vector.load %arg7[%c2_60, %c9_61, %c0_62] : memref<18x32x128xf32, #tpu.memory_space<vmem>>, vector<16x16x128xf32>
    %71 = vector.shape_cast %70 : vector<16x16x128xf32> to vector<256x128xf32>
    %72 = arith.truncf %71 : vector<256x128xf32> to vector<256x128xbf16>
    %c8_63 = arith.constant 8 : index
    %c0_64 = arith.constant 0 : index
    %c0_65 = arith.constant 0 : index
    %73 = vector.load %arg4[%c8_63, %c0_64, %c0_65] : memref<9x128x128xbf16, #tpu.memory_space<vmem>>, vector<1x128x128xbf16>
    %74 = vector.shape_cast %73 : vector<1x128x128xbf16> to vector<128x128xbf16>
    %cst_66 = arith.constant dense<0.000000e+00> : vector<256x128xf32>
    %75 = tpu.matmul %72, %74, %cst_66 {dimension_numbers = #tpu.dot_dimension_numbers<[1], [0], [0], [1], [0, 0, 1, 1], [], []>} : vector<256x128xbf16>, vector<128x128xbf16>, vector<256x128xf32> -> vector<256x128xf32>
    %76 = arith.addf %69, %75 : vector<256x128xf32>
    %c0_67 = arith.constant 0 : index
    %c0_68 = arith.constant 0 : index
    %77 = vector.load %arg5[%c0_67, %c0_68] : memref<256x128xf32, #tpu.memory_space<vmem>>, vector<256x128xf32>
    tpu.vector_store %arg5[%c0_67, %c0_68], %76 {strides = array<i32>} : memref<256x128xf32, #tpu.memory_space<vmem>>, vector<256x128xf32>,
    %cst_69 = arith.constant dense<0.000000e+00> : vector<128xf32>
    %78 = vector.multi_reduction <add>, %76, %cst_69 [0] : vector<256x128xf32> to vector<128xf32>
    %79 = vector.shape_cast %78 : vector<128xf32> to vector<1x128xf32>
    %80 = arith.mulf %76, %76 : vector<256x128xf32>
    %cst_70 = arith.constant dense<0.000000e+00> : vector<128xf32>
    %81 = vector.multi_reduction <add>, %80, %cst_70 [0] : vector<256x128xf32> to vector<128xf32>
    %82 = vector.shape_cast %81 : vector<128xf32> to vector<1x128xf32>
    %83 = tpu.concatenate %79, %82 in 0 : vector<1x128xf32>, vector<1x128xf32> -> vector<2x128xf32>
    %84 = vector.shape_cast %83 : vector<2x128xf32> to vector<1x2x128xf32>
    %c0_71 = arith.constant 0 : index
    %c0_72 = arith.constant 0 : index
    %c0_73 = arith.constant 0 : index
    %85 = vector.load %arg6[%c0_71, %c0_72, %c0_73] : memref<1x2x128xf32, #tpu.memory_space<vmem>>, vector<1x2x128xf32>
    tpu.vector_store %arg6[%c0_71, %c0_72, %c0_73], %84 {strides = array<i32>} : memref<1x2x128xf32, #tpu.memory_space<vmem>>, vector<1x2x128xf32>,
    return
  }
  func.func @transform_0(%arg0: i32) -> (i32, i32) {
    %c0_i32 = arith.constant 0 : i32
    %c0_i32_0 = arith.constant 0 : i32
    return %arg0, %c0_i32 : i32, i32
  }
  func.func @transform_1(%arg0: i32) -> (i32, i32) {
    %c0_i32 = arith.constant 0 : i32
    %c0_i32_0 = arith.constant 0 : i32
    %c0_i32_1 = arith.constant 0 : i32
    return %c0_i32, %c0_i32_0 : i32, i32
  }
  func.func @transform_2(%arg0: i32) -> (i32, i32) {
    %c0_i32 = arith.constant 0 : i32
    %c0_i32_0 = arith.constant 0 : i32
    %c0_i32_1 = arith.constant 0 : i32
    return %c0_i32, %c0_i32_0 : i32, i32
  }
  func.func @transform_3(%arg0: i32) -> (i32, i32, i32) {
    %c0_i32 = arith.constant 0 : i32
    %c0_i32_0 = arith.constant 0 : i32
    %c0_i32_1 = arith.constant 0 : i32
    %c0_i32_2 = arith.constant 0 : i32
    return %c0_i32, %c0_i32_0, %c0_i32_1 : i32, i32, i32
  }
  func.func @transform_4(%arg0: i32) -> (i32, i32) {
    %c0_i32 = arith.constant 0 : i32
    %c0_i32_0 = arith.constant 0 : i32
    return %arg0, %c0_i32 : i32, i32
  }
  func.func @transform_5(%arg0: i32) -> (i32, i32, i32) {
    %c0_i32 = arith.constant 0 : i32
    %c0_i32_0 = arith.constant 0 : i32
    %c0_i32_1 = arith.constant 0 : i32
    return %arg0, %c0_i32, %c0_i32_0 : i32, i32, i32
  }
}

</mosaic_0001>

<bundles_post_ra>
// kernel: residual_block_forward.5
= control target key start
LH: loop header
LB: loop body
LE: loop exit
PB: predicated region body
PF: predicated region fallthrough
CT: control target
= control target key end

     0   :  { %s579_s15 = smov 0   ;;  %s780_s0 = inlined_call_operand.vmem [shape: f32[512,128], index: 0, kind: input, shape index: {}]   ;;  %s781_s1 = inlined_call_operand.vmem [shape: f32[1,128], index: 1, kind: input, shape index: {}]   ;;  %s782_s2 = inlined_call_operand.vmem [shape: f32[1,128], index: 2, kind: input, shape index: {}]   ;;  %s783_s3 = inlined_call_operand.vmem [shape: f32[512,128], index: 3, kind: input, shape index: {}]   ;;  %s784_s4 = inlined_call_operand.vmem [shape: f32[512,128], index: 4, kind: output, shape index: {}]  }
   0x1 LB: > { %s523_s16 = sadd.s32 4294967295, %s552_s15   ;;  %p527_p0 = scmp.ge.s32.totalorder %s552_s15, 1  ;;  %s552_s15 = sphi %s579_s15, %s14_s15  }
   0x2   : > { %p174_p1 = scmp.lt.s32.totalorder %s552_s15, 3 }
   0x4   : > { %p175_p2 = pnand %p527_p0, %p174_p1 }
   0x5   : > { %s528_s17 = sshll.u32 (!%p175_p2), %s523_s16, 5 }
   0x6   : > { %178 = sbr.rel (%p175_p2) target bundleno = 55 (0x37), region = 36  ;;  %p206_p3 = scmp.lt.s32.totalorder (!%p175_p2), %s528_s17, 63 }
   0xb   : > { %s786_s17 = smov (!%p206_p3, %s528_s17), 63  ;;  %v590_v0 = vld [vmem:[%s781_s1] ss:$0 sm:$0xff] }
   0xc   : > { %s592_s20 = sshll.u32 %s786_s17, 3  ;;  %v609_v1 = vld [vmem:[%s782_s2] ss:$0 sm:$0xff] }
   0xd   : > { %s598_s23 = scalar_lea.vmem %s780_s0, %s592_s20  ;;  %s604_s26 = scalar_lea.vmem %s783_s3, %s592_s20 }
   0xe   : > { %v223_v2 = vld [vmem:[%s598_s23] sm:$0xff]  ;;  %v224_v3 = vld [vmem:[%s598_s23 + $0x8] sm:$0xff]  ;;  %v225_v7 = vld [vmem:[%s598_s23 + $0x10] sm:$0xff]  ;;  %s640_s5 = scalar_lea.vmem %s784_s4, %s592_s20 }
   0xf   : > { %v259_v4 = vmul.f32 %v590_v0, %v223_v2  ;;  %v327_v5 = vld [vmem:[%s604_s26] sm:$0xff]  ;;  %v260_v6 = vmul.f32 %v590_v0, %v224_v3  ;;  %v328_v8 = vld [vmem:[%s604_s26 + $0x8] sm:$0xff]  ;;  %v261_v9 = vmul.f32 %v590_v0, %v225_v7  ;;  %v226_v10 = vld [vmem:[%s598_s23 + $0x18] sm:$0xff] }
  0x10   : > { %v227_v11 = vld [vmem:[%s598_s23 + $0x20] sm:$0xff]  ;;  %v329_v14 = vld [vmem:[%s604_s26 + $0x10] sm:$0xff]  ;;  %v262_v15 = vmul.f32 %v590_v0, %v226_v10  ;;  %v330_v16 = vld [vmem:[%s604_s26 + $0x18] sm:$0xff] }
  0x11   : > { %v295_v12 = vadd.f32 %v609_v1, %v259_v4  ;;  %v296_v13 = vadd.f32 %v609_v1, %v260_v6  ;;  %v263_v17 = vmul.f32 %v590_v0, %v227_v11  ;;  %v228_v18 = vld [vmem:[%s598_s23 + $0x28] sm:$0xff]  ;;  %v297_v19 = vadd.f32 %v609_v1, %v261_v9  ;;  %v331_v20 = vld [vmem:[%s604_s26 + $0x20] sm:$0xff]  ;;  %v229_v22 = vld [vmem:[%s598_s23 + $0x30] sm:$0xff] }
  0x12   : > { %v264_v21 = vmul.f32 %v590_v0, %v228_v18  ;;  %v230_v23 = vld [vmem:[%s598_s23 + $0x38] sm:$0xff]  ;;  %v298_v26 = vadd.f32 %v609_v1, %v262_v15  ;;  %v332_v28 = vld [vmem:[%s604_s26 + $0x28] sm:$0xff]  ;;  %v265_v31 = vmul.f32 %v590_v0, %v229_v22  ;;  %v231_v33 = vld [vmem:[%s598_s23 + $0x40] sm:$0xff] }
  0x13   : > { %v359_v24 = vadd.f32 %v327_v5, %v295_v12  ;;  %v360_v25 = vadd.f32 %v328_v8, %v296_v13  ;;  %v299_v27 = vadd.f32 %v609_v1, %v263_v17  ;;  %v361_v29 = vadd.f32 %v329_v14, %v297_v19  ;;  %v232_v34 = vld [vmem:[%s598_s23 + $0x48] sm:$0xff]  ;;  %v333_v39 = vld [vmem:[%s604_s26 + $0x30] sm:$0xff]  ;;  %v334_v40 = vld [vmem:[%s604_s26 + $0x38] sm:$0xff] }
  0x14   : > { %v300_v30 = vadd.f32 %v609_v1, %v264_v21  ;;  %v266_v32 = vmul.f32 %v590_v0, %v230_v23  ;;  %v362_v37 = vadd.f32 %v330_v16, %v298_v26  ;;  %v233_v41 = vld [vmem:[%s598_s23 + $0x50] sm:$0xff]  ;;  %v301_v44 = vadd.f32 %v609_v1, %v265_v31  ;;  %v234_v46 = vld [vmem:[%s598_s23 + $0x58] sm:$0xff]  ;;  %v235_v47 = vld [vmem:[%s598_s23 + $0x60] sm:$0xff] }
  0x15   : > { %v391_v35 = vmax.f32 %v359_v24, 0.0  ;;  %v392_v36 = vmax.f32 %v360_v25, 0.0  ;;  %v363_v38 = vadd.f32 %v331_v20, %v299_v27  ;;  %v393_v42 = vmax.f32 %v361_v29, 0.0  ;;  %v236_v52 = vld [vmem:[%s598_s23 + $0x68] sm:$0xff]  ;;  %v335_v56 = vld [vmem:[%s604_s26 + $0x40] sm:$0xff]  ;;  %v337_v61 = vld [vmem:[%s604_s26 + $0x50] sm:$0xff] }
  0x16   : > { %v364_v43 = vadd.f32 %v332_v28, %v300_v30  ;;  %v302_v45 = vadd.f32 %v609_v1, %v266_v32  ;;  %v394_v48 = vmax.f32 %v362_v37, 0.0  ;;  %v267_v50 = vmul.f32 %v590_v0, %v231_v33  ;;  %v336_v57 = vld [vmem:[%s604_s26 + $0x48] sm:$0xff]  ;;  %v237_v2 = vld [vmem:[%s598_s23 + $0x70] sm:$0xff]  ;;  %v238_v3 = vld [vmem:[%s598_s23 + $0x78] sm:$0xff] }
  0x17   : > { %423 = vst [vmem:[%s640_s5] sm:$0xff] %v391_v35  ;;  %v395_v49 = vmax.f32 %v363_v38, 0.0  ;;  %v268_v51 = vmul.f32 %v590_v0, %v232_v34  ;;  %v365_v54 = vadd.f32 %v333_v39, %v301_v44  ;;  %v269_v58 = vmul.f32 %v590_v0, %v233_v41  ;;  %v338_v7 = vld [vmem:[%s604_s26 + $0x58] sm:$0xff]  ;;  %v339_v8 = vld [vmem:[%s604_s26 + $0x60] sm:$0xff]  ;;  %v340_v14 = vld [vmem:[%s604_s26 + $0x68] sm:$0xff] }
  0x18   : > { %424 = vst [vmem:[%s640_s5 + $0x8] sm:$0xff] %v392_v36  ;;  %v396_v53 = vmax.f32 %v364_v43, 0.0  ;;  %v366_v55 = vadd.f32 %v334_v40, %v302_v45  ;;  %v303_v59 = vadd.f32 %v609_v1, %v267_v50  ;;  %v270_v62 = vmul.f32 %v590_v0, %v234_v46  ;;  %v239_v19 = vld [vmem:[%s598_s23 + $0x80] sm:$0xff]  ;;  %v240_v20 = vld [vmem:[%s598_s23 + $0x88] sm:$0xff]  ;;  %v341_v25 = vld [vmem:[%s604_s26 + $0x70] sm:$0xff] }
  0x19   : > { %425 = vst [vmem:[%s640_s5 + $0x10] sm:$0xff] %v393_v42  ;;  %v304_v60 = vadd.f32 %v609_v1, %v268_v51  ;;  %v271_v63 = vmul.f32 %v590_v0, %v235_v47  ;;  %v397_v4 = vmax.f32 %v365_v54, 0.0  ;;  %v305_v6 = vadd.f32 %v609_v1, %v269_v58  ;;  %v342_v26 = vld [vmem:[%s604_s26 + $0x78] sm:$0xff]  ;;  %v241_v27 = vld [vmem:[%s598_s23 + $0x90] sm:$0xff]  ;;  %v243_v33 = vld [vmem:[%s598_s23 + $0xa0] sm:$0xff] }
  0x1a   : > { %426 = vst [vmem:[%s640_s5 + $0x18] sm:$0xff] %v394_v48  ;;  %v398_v5 = vmax.f32 %v366_v55, 0.0  ;;  %v272_v9 = vmul.f32 %v590_v0, %v236_v52  ;;  %v367_v10 = vadd.f32 %v335_v56, %v303_v59  ;;  %v306_v12 = vadd.f32 %v609_v1, %v270_v62  ;;  %v242_v32 = vld [vmem:[%s598_s23 + $0x98] sm:$0xff]  ;;  %v244_v38 = vld [vmem:[%s598_s23 + $0xa8] sm:$0xff]  ;;  %v343_v42 = vld [vmem:[%s604_s26 + $0x80] sm:$0xff] }
  0x1b   : > { %427 = vst [vmem:[%s640_s5 + $0x20] sm:$0xff] %v395_v49  ;;  %v368_v11 = vadd.f32 %v336_v57, %v304_v60  ;;  %v307_v13 = vadd.f32 %v609_v1, %v271_v63  ;;  %v369_v15 = vadd.f32 %v337_v61, %v305_v6  ;;  %v273_v17 = vmul.f32 %v590_v0, %v237_v2  ;;  %v344_v43 = vld [vmem:[%s604_s26 + $0x88] sm:$0xff]  ;;  %v345_v47 = vld [vmem:[%s604_s26 + $0x90] sm:$0xff]  ;;  %v246_v51 = vld [vmem:[%s598_s23 + $0xb8] sm:$0xff] }
  0x1c   : > { %428 = vst [vmem:[%s640_s5 + $0x28] sm:$0xff] %v396_v53  ;;  %v308_v16 = vadd.f32 %v609_v1, %v272_v9  ;;  %v274_v18 = vmul.f32 %v590_v0, %v238_v3  ;;  %v399_v21 = vmax.f32 %v367_v10, 0.0  ;;  %v370_v23 = vadd.f32 %v338_v7, %v306_v12  ;;  %v245_v50 = vld [vmem:[%s598_s23 + $0xb0] sm:$0xff]  ;;  %v346_v55 = vld [vmem:[%s604_s26 + $0x98] sm:$0xff]  ;;  %v347_v56 = vld [vmem:[%s604_s26 + $0xa0] sm:$0xff] }
  0x1d   : > { %429 = vst [vmem:[%s640_s5 + $0x30] sm:$0xff] %v397_v4  ;;  %v400_v22 = vmax.f32 %v368_v11, 0.0  ;;  %v371_v24 = vadd.f32 %v339_v8, %v307_v13  ;;  %v401_v28 = vmax.f32 %v369_v15, 0.0  ;;  %v309_v30 = vadd.f32 %v609_v1, %v273_v17  ;;  %v348_v62 = vld [vmem:[%s604_s26 + $0xa8] sm:$0xff]  ;;  %v349_v11 = vld [vmem:[%s604_s26 + $0xb0] sm:$0xff]  ;;  %v350_v12 = vld [vmem:[%s604_s26 + $0xb8] sm:$0xff] }
  0x1e   : > { %430 = vst [vmem:[%s640_s5 + $0x38] sm:$0xff] %v398_v5  ;;  %v372_v29 = vadd.f32 %v340_v14, %v308_v16  ;;  %v310_v31 = vadd.f32 %v609_v1, %v274_v18  ;;  %v402_v34 = vmax.f32 %v370_v23, 0.0  ;;  %v275_v36 = vmul.f32 %v590_v0, %v239_v19  ;;  %v247_v5 = vld [vmem:[%s598_s23 + $0xc0] sm:$0xff]  ;;  %v248_v6 = vld [vmem:[%s598_s23 + $0xc8] sm:$0xff]  ;;  %v249_v13 = vld [vmem:[%s598_s23 + $0xd0] sm:$0xff] }
  0x1f   : > { %431 = vst [vmem:[%s640_s5 + $0x40] sm:$0xff] %v399_v21  ;;  %v403_v35 = vmax.f32 %v371_v24, 0.0  ;;  %v276_v37 = vmul.f32 %v590_v0, %v240_v20  ;;  %v373_v40 = vadd.f32 %v341_v25, %v309_v30  ;;  %v277_v44 = vmul.f32 %v590_v0, %v241_v27  ;;  %v250_v18 = vld [vmem:[%s598_s23 + $0xd8] sm:$0xff]  ;;  %v251_v19 = vld [vmem:[%s598_s23 + $0xe0] sm:$0xff]  ;;  %v252_v24 = vld [vmem:[%s598_s23 + $0xe8] sm:$0xff] }
  0x20   : > { %432 = vst [vmem:[%s640_s5 + $0x48] sm:$0xff] %v400_v22  ;;  %v404_v39 = vmax.f32 %v372_v29, 0.0  ;;  %v374_v41 = vadd.f32 %v342_v26, %v310_v31  ;;  %v311_v45 = vadd.f32 %v609_v1, %v275_v36  ;;  %v278_v48 = vmul.f32 %v590_v0, %v242_v32  ;;  %v352_v29 = vld [vmem:[%s604_s26 + $0xc8] sm:$0xff]  ;;  %v253_v36 = vld [vmem:[%s598_s23 + $0xf0] sm:$0xff] }
  0x21   : > { %433 = vst [vmem:[%s640_s5 + $0x50] sm:$0xff] %v401_v28  ;;  %v312_v46 = vadd.f32 %v609_v1, %v276_v37  ;;  %v279_v49 = vmul.f32 %v590_v0, %v243_v33  ;;  %v405_v52 = vmax.f32 %v373_v40, 0.0  ;;  %v313_v54 = vadd.f32 %v609_v1, %v277_v44  ;;  %v351_v28 = vld [vmem:[%s604_s26 + $0xc0] sm:$0xff]  ;;  %v353_v33 = vld [vmem:[%s604_s26 + $0xd0] sm:$0xff]  ;;  %v254_v37 = vld [vmem:[%s598_s23 + $0xf8] sm:$0xff] }
  0x22   : > { %434 = vst [vmem:[%s640_s5 + $0x58] sm:$0xff] %v402_v34  ;;  %v406_v53 = vmax.f32 %v374_v41, 0.0  ;;  %v280_v57 = vmul.f32 %v590_v0, %v244_v38  ;;  %v375_v58 = vadd.f32 %v343_v42, %v311_v45  ;;  %v314_v60 = vadd.f32 %v609_v1, %v278_v48  ;;  %v354_v41 = vld [vmem:[%s604_s26 + $0xd8] sm:$0xff]  ;;  %v355_v42 = vld [vmem:[%s604_s26 + $0xe0] sm:$0xff]  ;;  %v356_v48 = vld [vmem:[%s604_s26 + $0xe8] sm:$0xff] }
  0x23   : > { %435 = vst [vmem:[%s640_s5 + $0x60] sm:$0xff] %v403_v35  ;;  %v376_v59 = vadd.f32 %v344_v43, %v312_v46  ;;  %v315_v61 = vadd.f32 %v609_v1, %v279_v49  ;;  %v377_v63 = vadd.f32 %v345_v47, %v313_v54  ;;  %v281_v3 = vmul.f32 %v590_v0, %v245_v50 }
  0x24   : > { %436 = vst [vmem:[%s640_s5 + $0x68] sm:$0xff] %v404_v39  ;;  %v316_v2 = vadd.f32 %v609_v1, %v280_v57  ;;  %v282_v4 = vmul.f32 %v590_v0, %v246_v51  ;;  %v407_v7 = vmax.f32 %v375_v58, 0.0  ;;  %v378_v9 = vadd.f32 %v346_v55, %v314_v60  ;;  %v357_v57 = vld [vmem:[%s604_s26 + $0xf0] sm:$0xff]  ;;  %v358_v58 = vld [vmem:[%s604_s26 + $0xf8] sm:$0xff] }
  0x25   : > { %437 = vst [vmem:[%s640_s5 + $0x70] sm:$0xff] %v405_v52  ;;  %v408_v8 = vmax.f32 %v376_v59, 0.0  ;;  %v379_v10 = vadd.f32 %v347_v56, %v315_v61  ;;  %v409_v14 = vmax.f32 %v377_v63, 0.0  ;;  %v317_v16 = vadd.f32 %v609_v1, %v281_v3 }
  0x26   : > { %438 = vst [vmem:[%s640_s5 + $0x78] sm:$0xff] %v406_v53  ;;  %v380_v15 = vadd.f32 %v348_v62, %v316_v2  ;;  %v318_v17 = vadd.f32 %v609_v1, %v282_v4  ;;  %v410_v20 = vmax.f32 %v378_v9, 0.0  ;;  %v283_v22 = vmul.f32 %v590_v0, %v247_v5 }
  0x27   : > { %439 = vst [vmem:[%s640_s5 + $0x80] sm:$0xff] %v407_v7  ;;  %v411_v21 = vmax.f32 %v379_v10, 0.0  ;;  %v284_v23 = vmul.f32 %v590_v0, %v248_v6  ;;  %v381_v26 = vadd.f32 %v349_v11, %v317_v16  ;;  %v285_v30 = vmul.f32 %v590_v0, %v249_v13 }
  0x28   : > { %440 = vst [vmem:[%s640_s5 + $0x88] sm:$0xff] %v408_v8  ;;  %v412_v25 = vmax.f32 %v380_v15, 0.0  ;;  %v382_v27 = vadd.f32 %v350_v12, %v318_v17  ;;  %v319_v31 = vadd.f32 %v609_v1, %v283_v22  ;;  %v286_v34 = vmul.f32 %v590_v0, %v250_v18 }
  0x29   : > { %441 = vst [vmem:[%s640_s5 + $0x90] sm:$0xff] %v409_v14  ;;  %v320_v32 = vadd.f32 %v609_v1, %v284_v23  ;;  %v287_v35 = vmul.f32 %v590_v0, %v251_v19  ;;  %v413_v38 = vmax.f32 %v381_v26, 0.0  ;;  %v321_v40 = vadd.f32 %v609_v1, %v285_v30 }
  0x2a   : > { %442 = vst [vmem:[%s640_s5 + $0x98] sm:$0xff] %v410_v20  ;;  %v414_v39 = vmax.f32 %v382_v27, 0.0  ;;  %v288_v43 = vmul.f32 %v590_v0, %v252_v24  ;;  %v383_v44 = vadd.f32 %v351_v28, %v319_v31  ;;  %v322_v46 = vadd.f32 %v609_v1, %v286_v34 }
  0x2b   : > { %443 = vst [vmem:[%s640_s5 + $0xa0] sm:$0xff] %v411_v21  ;;  %v384_v45 = vadd.f32 %v352_v29, %v320_v32  ;;  %v323_v47 = vadd.f32 %v609_v1, %v287_v35  ;;  %v385_v49 = vadd.f32 %v353_v33, %v321_v40  ;;  %v289_v51 = vmul.f32 %v590_v0, %v253_v36 }
  0x2c   : > { %444 = vst [vmem:[%s640_s5 + $0xa8] sm:$0xff] %v412_v25  ;;  %v324_v50 = vadd.f32 %v609_v1, %v288_v43  ;;  %v290_v52 = vmul.f32 %v590_v0, %v254_v37  ;;  %v415_v53 = vmax.f32 %v383_v44, 0.0  ;;  %v386_v55 = vadd.f32 %v354_v41, %v322_v46 }
  0x2d   : > { %445 = vst [vmem:[%s640_s5 + $0xb0] sm:$0xff] %v413_v38  ;;  %v416_v54 = vmax.f32 %v384_v45, 0.0  ;;  %v387_v56 = vadd.f32 %v355_v42, %v323_v47  ;;  %v417_v59 = vmax.f32 %v385_v49, 0.0  ;;  %v325_v61 = vadd.f32 %v609_v1, %v289_v51 }
  0x2e   : > { %446 = vst [vmem:[%s640_s5 + $0xb8] sm:$0xff] %v414_v39  ;;  %v388_v60 = vadd.f32 %v356_v48, %v324_v50  ;;  %v326_v0 = vadd.f32 %v609_v1, %v290_v52  ;;  %v418_v62 = vmax.f32 %v386_v55, 0.0 }
  0x2f   : > { %447 = vst [vmem:[%s640_s5 + $0xc0] sm:$0xff] %v415_v53  ;;  %v419_v63 = vmax.f32 %v387_v56, 0.0  ;;  %v389_v3 = vadd.f32 %v357_v57, %v325_v61 }
  0x30   : > { %448 = vst [vmem:[%s640_s5 + $0xc8] sm:$0xff] %v416_v54  ;;  %v420_v2 = vmax.f32 %v388_v60, 0.0  ;;  %v390_v4 = vadd.f32 %v358_v58, %v326_v0 }
  0x31   : > { %449 = vst [vmem:[%s640_s5 + $0xd0] sm:$0xff] %v417_v59  ;;  %v421_v5 = vmax.f32 %v389_v3, 0.0 }
  0x32   : > { %450 = vst [vmem:[%s640_s5 + $0xd8] sm:$0xff] %v418_v62  ;;  %v422_v6 = vmax.f32 %v390_v4, 0.0 }
  0x33   : > { %451 = vst [vmem:[%s640_s5 + $0xe0] sm:$0xff] %v419_v63 }
  0x34   : > { %452 = vst [vmem:[%s640_s5 + $0xe8] sm:$0xff] %v420_v2 }
  0x35   : > { %453 = vst [vmem:[%s640_s5 + $0xf0] sm:$0xff] %v421_v5 }
  0x36   : > { %454 = vst [vmem:[%s640_s5 + $0xf8] sm:$0xff] %v422_v6 }
  0x37 PF: > { %s14_s15 = sadd.s32 1, %s552_s15  }
  0x38   : > { %p11_p4 = scmp.ge.s32.totalorder %s14_s15, 4  }
  0x3a   :  { %13 = sbr.rel (!%p11_p4) target bundleno = 1 (0x1), region = 69 }

// kernel: residual_block_forward.3
= control target key start
LH: loop header
LB: loop body
LE: loop exit
PB: predicated region body
PF: predicated region fallthrough
CT: control target
= control target key end

     0   :  { %s3206_s12 = smov 0   ;;  %s4000_s0 = inlined_call_operand.vmem [shape: f32[2,18,18,128], index: 0, kind: input, shape index: {}]   ;;  %s4001_s1 = inlined_call_operand.vmem [shape: bf16[9,128,128], index: 1, kind: input, shape index: {}]   ;;  %s4002_s2 = inlined_call_operand.vmem [shape: f32[512,128], index: 2, kind: output, shape index: {0}]   ;;  %s4003_s3 = inlined_call_operand.vmem [shape: f32[2,2,128], index: 3, kind: output, shape index: {1}]  }
   0x1 LB: > { %s3212_s13 = sadd.s32 4294967295, %s3184_s12   ;;  %p2458_p0 = scmp.ge.s32.totalorder %s3184_s12, 1  ;;  %s3184_s12 = sphi %s3206_s12, %s14_s12  }
   0x2   : > { %p140_p1 = scmp.lt.s32.totalorder %s3184_s12, 3 }
   0x4   : > { %p141_p2 = pnand %p2458_p0, %p140_p1 }
   0x6   : > { %144 = sbr.rel (%p141_p2) target bundleno = 767 (0x2ff), region = 28 }
   0xb   : > { %v3088_v0 = vld [vmem:[%s4001_s1 + $0x78] sm:$0xff]  ;;  %v3087_v1 = vld [vmem:[%s4001_s1 + $0x70] sm:$0xff]  ;;  %v3086_v2 = vld [vmem:[%s4001_s1 + $0x68] sm:$0xff]  ;;  %p168_p3 = scmp.lt.s32.totalorder %s3212_s13, 1  ;;  %s2460_s23 = sshll.u32 %s3212_s13, 5  ;;  %vm2364_vm0 = vcmask 1040384  }
   0xc   : > { %3145 = vmatpush.bf16.msra.mxu1 %v3088_v0  ;;  %3146 = vmatpush.bf16.msra.mxu2 %v3088_v0  ;;  %v3085_v3 = vld [vmem:[%s4001_s1 + $0x60] sm:$0xff]  ;;  %v3084_v4 = vld [vmem:[%s4001_s1 + $0x58] sm:$0xff]  ;;  %v3083_v5 = vld [vmem:[%s4001_s1 + $0x50] sm:$0xff]  ;;  %p174_p4 = scmp.lt.s32.totalorder %s2460_s23, 63 }
   0xd   : > { %3147 = vmatpush.bf16.msra.mxu3 %v3088_v0  ;;  %360 = vmatpush.bf16.msra.mxu0 %v3088_v0  ;;  %s3233_s24 = scalar_select %p168_p3, %s3212_s13, 1  ;;  %v3082_v6 = vld [vmem:[%s4001_s1 + $0x48] sm:$0xff]  ;;  %v3081_v7 = vld [vmem:[%s4001_s1 + $0x40] sm:$0xff]  ;;  %v3096_v16 = vld [vmem:[%s4001_s1 + $0xb8] sm:$0xff] }
   0xe   : > { %v3104_v17 = vld [vmem:[%s4001_s1 + $0xf8] sm:$0xff]  ;;  %v3095_v24 = vld [vmem:[%s4001_s1 + $0xb0] sm:$0xff]  ;;  %v3094_v28 = vld [vmem:[%s4001_s1 + $0xa8] sm:$0xff]  ;;  %s4032_s23 = smov (!%p174_p4, %s2460_s23), 63 }
   0xf   : > { %s3169_s27 = smul.u32 432, %s3233_s24  ;;  %v3080_v22 = vld [vmem:[%s4001_s1 + $0x38] sm:$0xff]  ;;  %v3103_v25 = vld [vmem:[%s4001_s1 + $0xf0] sm:$0xff]  ;;  %v3102_v29 = vld [vmem:[%s4001_s1 + $0xe8] sm:$0xff]  ;;  %s2461_s13 = sshll.u32 %s4032_s23, 3 }
  0x10   : > { %3148 = vmatpush.bf16.msra.mxu1 %v3087_v1  ;;  %3149 = vmatpush.bf16.msra.mxu2 %v3087_v1  ;;  %v3112_v23 = vld [vmem:[%s4001_s1 + $0x138] sm:$0xff]  ;;  %v3079_v26 = vld [vmem:[%s4001_s1 + $0x30] sm:$0xff]  ;;  %v3078_v30 = vld [vmem:[%s4001_s1 + $0x28] sm:$0xff] }
  0x11   : > { %3150 = vmatpush.bf16.msra.mxu3 %v3087_v1  ;;  %361 = vmatpush.bf16.msra.mxu0 %v3087_v1  ;;  %s3245_s5 = scalar_lea.vmem %s4000_s0, %s3169_s27  ;;  %v3111_v27 = vld [vmem:[%s4001_s1 + $0x130] sm:$0xff]  ;;  %v3110_v31 = vld [vmem:[%s4001_s1 + $0x128] sm:$0xff]  ;;  %v3093_v33 = vld [vmem:[%s4001_s1 + $0xa0] sm:$0xff]  ;;  %s3884_s27 = scalar_lea.vmem %s4002_s2, %s2461_s13 }
  0x12   : > { %v255_v8 = vld [vmem:[%s3245_s5 + $0x61] sm:$0xff]  ;;  %v256_v9 = vld [vmem:[%s3245_s5 + $0x69] sm:$0xff]  ;;  %v257_v32 = vld [vmem:[%s3245_s5 + $0x79] sm:$0xff] }
  0x13   : > { %v263_v10 = vld [vmem:[%s3245_s5 + $0xc1] sm:$0xff]  ;;  %v264_v11 = vld [vmem:[%s3245_s5 + $0xc9] sm:$0xff]  ;;  %v3264_v18 = vpack.c.bf16 %v256_v9, %v255_v8  ;;  %v265_v36 = vld [vmem:[%s3245_s5 + $0xd9] sm:$0xff] }
  0x14   : > { %3151 = vmatpush.bf16.msra.mxu1 %v3086_v2  ;;  %3152 = vmatpush.bf16.msra.mxu2 %v3086_v2  ;;  %v271_v12 = vld [vmem:[%s3245_s5 + $0x121] sm:$0xff]  ;;  %v272_v13 = vld [vmem:[%s3245_s5 + $0x129] sm:$0xff]  ;;  %v3266_v19 = vpack.c.bf16 %v264_v11, %v263_v10  ;;  %v273_v38 = vld [vmem:[%s3245_s5 + $0x139] sm:$0xff] }
  0x15   : > { %3153 = vmatpush.bf16.msra.mxu3 %v3086_v2  ;;  %362 = vmatpush.bf16.msra.mxu0 %v3086_v2  ;;  %v247_v14 = vld [vmem:[%s3245_s5 + $0x1] sm:$0xff]  ;;  %v248_v15 = vld [vmem:[%s3245_s5 + $0x9] sm:$0xff]  ;;  %v291_v20 = vpack.c.bf16 %v272_v13, %v271_v12  ;;  %v249_v40 = vld [vmem:[%s3245_s5 + $0x19] sm:$0xff] }
  0x16   : > { %v279_v21 = vpack.c.bf16 %v248_v15, %v247_v14  ;;  %v3101_v34 = vld [vmem:[%s4001_s1 + $0xe0] sm:$0xff]  ;;  %v3092_v44 = vld [vmem:[%s4001_s1 + $0x98] sm:$0xff]  ;;  %v3091_v52 = vld [vmem:[%s4001_s1 + $0x90] sm:$0xff] }
  0x17   : > { %v258_v35 = vld [vmem:[%s3245_s5 + $0x81] sm:$0xff]  ;;  %v3100_v45 = vld [vmem:[%s4001_s1 + $0xd8] sm:$0xff]  ;;  %v3099_v53 = vld [vmem:[%s4001_s1 + $0xd0] sm:$0xff] }
  0x18   : > { %3154 = vmatpush.bf16.msra.mxu1 %v3085_v3  ;;  %3155 = vmatpush.bf16.msra.mxu2 %v3085_v3  ;;  %v266_v37 = vld [vmem:[%s3245_s5 + $0xe1] sm:$0xff]  ;;  %v3326_v46 = vpack.c.bf16 %v258_v35, %v257_v32  ;;  %v3076_v50 = vld [vmem:[%s4001_s1 + $0x18] sm:$0xff]  ;;  %v3075_v54 = vld [vmem:[%s4001_s1 + $0x10] sm:$0xff] }
  0x19   : > { %3156 = vmatpush.bf16.msra.mxu3 %v3085_v3  ;;  %363 = vmatpush.bf16.msra.mxu0 %v3085_v3  ;;  %v274_v39 = vld [vmem:[%s3245_s5 + $0x141] sm:$0xff]  ;;  %v3328_v47 = vpack.c.bf16 %v266_v37, %v265_v36  ;;  %v3108_v51 = vld [vmem:[%s4001_s1 + $0x118] sm:$0xff]  ;;  %v3107_v55 = vld [vmem:[%s4001_s1 + $0x110] sm:$0xff] }
  0x1a   : > { %v250_v41 = vld [vmem:[%s3245_s5 + $0x21] sm:$0xff]  ;;  %v292_v48 = vpack.c.bf16 %v274_v39, %v273_v38  ;;  %v259_v60 = vld [vmem:[%s3245_s5 + $0x91] sm:$0xff]  ;;  %v260_v63 = vld [vmem:[%s3245_s5 + $0x99] sm:$0xff] }
  0x1b   : > { %v3077_v42 = vld [vmem:[%s4001_s1 + $0x20] sm:$0xff]  ;;  %v3330_v49 = vpack.c.bf16 %v250_v41, %v249_v40  ;;  %v3090_v56 = vld [vmem:[%s4001_s1 + $0x88] sm:$0xff]  ;;  %v267_v0 = vld [vmem:[%s3245_s5 + $0xf1] sm:$0xff]  ;;  %v3385_v8 = vpack.c.bf16 %v260_v63, %v259_v60 }
  0x1c   : > { %3157 = vmatpush.bf16.msra.mxu1 %v3084_v4  ;;  %3158 = vmatpush.bf16.msra.mxu2 %v3084_v4  ;;  %v3109_v43 = vld [vmem:[%s4001_s1 + $0x120] sm:$0xff]  ;;  %v3098_v57 = vld [vmem:[%s4001_s1 + $0xc8] sm:$0xff]  ;;  %v275_v2 = vld [vmem:[%s3245_s5 + $0x151] sm:$0xff] }
  0x1d   : > { %3159 = vmatpush.bf16.msra.mxu3 %v3084_v4  ;;  %364 = vmatpush.bf16.msra.mxu0 %v3084_v4  ;;  %v3074_v58 = vld [vmem:[%s4001_s1 + $0x8] sm:$0xff]  ;;  %v3089_v61 = vld [vmem:[%s4001_s1 + $0x80] sm:$0xff]  ;;  %v251_v4 = vld [vmem:[%s3245_s5 + $0x31] sm:$0xff] }
  0x1e   : > { %v3106_v59 = vld [vmem:[%s4001_s1 + $0x108] sm:$0xff]  ;;  %v3097_v62 = vld [vmem:[%s4001_s1 + $0xc0] sm:$0xff]  ;;  %v3128_v12 = vld [vmem:[%s4001_s1 + $0x1b8] sm:$0xff] }
  0x1f   : > { %v268_v1 = vld [vmem:[%s3245_s5 + $0xf9] sm:$0xff]  ;;  %v586_v32 = vld [vmem:[%s3245_s5 + $0x2] sm:$0xff]  ;;  %v3127_v39 = vld [vmem:[%s4001_s1 + $0x1b0] sm:$0xff] }
  0x20   : > { %3160 = vmatpush.bf16.msra.mxu1 %v3083_v5  ;;  %3161 = vmatpush.bf16.msra.mxu2 %v3083_v5  ;;  %v276_v3 = vld [vmem:[%s3245_s5 + $0x159] sm:$0xff]  ;;  %v3387_v9 = vpack.c.bf16 %v268_v1, %v267_v0  ;;  %v3135_v40 = vld [vmem:[%s4001_s1 + $0x1f0] sm:$0xff]  ;;  %v3142_v60 = vld [vmem:[%s4001_s1 + $0x228] sm:$0xff] }
  0x21   : > { %3162 = vmatpush.bf16.msra.mxu3 %v3083_v5  ;;  %365 = vmatpush.bf16.msra.mxu0 %v3083_v5  ;;  %v252_v5 = vld [vmem:[%s3245_s5 + $0x39] sm:$0xff]  ;;  %v293_v10 = vpack.c.bf16 %v276_v3, %v275_v2  ;;  %v3119_v41 = vld [vmem:[%s4001_s1 + $0x170] sm:$0xff]  ;;  %v2598_v0 = vld [vmem:[%s3245_s5 + $0x68] sm:$0xff] }
  0x22   : > { %v281_v11 = vpack.c.bf16 %v252_v5, %v251_v4  ;;  %v3136_v13 = vld [vmem:[%s4001_s1 + $0x1f8] sm:$0xff]  ;;  %v2592_v35 = vld [vmem:[%s3245_s5 + $0x20] sm:$0xff]  ;;  %v595_v4 = vld [vmem:[%s3245_s5 + $0x6a] sm:$0xff] }
  0x23   : > { %v3120_v14 = vld [vmem:[%s4001_s1 + $0x178] sm:$0xff]  ;;  %v2597_v63 = vld [vmem:[%s3245_s5 + $0x60] sm:$0xff] }
  0x24   : > { %3163 = vmatpush.bf16.msra.mxu1 %v3082_v6  ;;  %3164 = vmatpush.bf16.msra.mxu2 %v3082_v6  ;;  %v3144_v15 = vld [vmem:[%s4001_s1 + $0x238] sm:$0xff]  ;;  %v3475_v2 = vpack.c.bf16 %v2598_v0, %v2597_v63  ;;  %v594_v3 = vld [vmem:[%s3245_s5 + $0x62] sm:$0xff] }
  0x25   : > { %3165 = vmatpush.bf16.msra.mxu3 %v3082_v6  ;;  %366 = vmatpush.bf16.msra.mxu0 %v3082_v6  ;;  %v3073_v6 = vld [vmem:[%s4001_s1] sm:$0xff]  ;;  %v2599_v5 = vld [vmem:[%s3245_s5 + $0x78] sm:$0xff] }
  0x28   : > { %3166 = vmatpush.bf16.msra.mxu1 %v3081_v7  ;;  %3167 = vmatpush.bf16.msra.mxu2 %v3081_v7 }
  0x29   : > { %3168 = vmatpush.bf16.msra.mxu3 %v3081_v7  ;;  %367 = vmatpush.bf16.msra.mxu0 %v3081_v7  ;;  %v3105_v7 = vld [vmem:[%s4001_s1 + $0x100] sm:$0xff] }
  0x2b   : > { %388 = vmatmul.bf16.vlgmr.msra.gmra.mxu1 %v3264_v18  ;;  %408 = vmatmul.bf16.vlgmr.msra.gmra.mxu2 %v3266_v19 }
  0x2c   : > { %699 = vmatpush.bf16.msrb.mxu2 %v3096_v16  ;;  %428 = vmatmul.bf16.vlgmr.msra.gmra.mxu3 %v291_v20  ;;  %v261_v16 = vld [vmem:[%s3245_s5 + $0xa9] sm:$0xff] }
  0x2d   : > { %934 = vmatpush.bf16.msrb.mxu3 %v3104_v17  ;;  %368 = vmatmul.bf16.vlgmr.msra.gmra.mxu0 %v279_v21  ;;  %v262_v17 = vld [vmem:[%s3245_s5 + $0xb1] sm:$0xff]  ;;  %v269_v20 = vld [vmem:[%s3245_s5 + $0x109] sm:$0xff] }
  0x2e   : > { %497 = vmatpush.bf16.msrb.mxu1 %v3080_v22  ;;  %1168 = vmatpush.bf16.msrb.mxu0 %v3112_v23  ;;  %v270_v21 = vld [vmem:[%s3245_s5 + $0x111] sm:$0xff]  ;;  %v277_v22 = vld [vmem:[%s3245_s5 + $0x169] sm:$0xff] }
  0x2f   : > { %v278_v23 = vld [vmem:[%s3245_s5 + $0x171] sm:$0xff] }
  0x30   : > { %700 = vmatpush.bf16.msrb.mxu2 %v3095_v24  ;;  %v253_v24 = vld [vmem:[%s3245_s5 + $0x49] sm:$0xff] }
  0x31   : > { %935 = vmatpush.bf16.msrb.mxu3 %v3103_v25  ;;  %v254_v25 = vld [vmem:[%s3245_s5 + $0x51] sm:$0xff] }
  0x32   : > { %498 = vmatpush.bf16.msrb.mxu1 %v3079_v26  ;;  %1169 = vmatpush.bf16.msrb.mxu0 %v3111_v27  ;;  %v3411_v26 = vpack.c.bf16 %v262_v17, %v261_v16  ;;  %v3413_v27 = vpack.c.bf16 %v270_v21, %v269_v20  ;;  %v3117_v16 = vld [vmem:[%s4001_s1 + $0x160] sm:$0xff] }
  0x33   : > { %v3141_v20 = vld [vmem:[%s4001_s1 + $0x220] sm:$0xff] }
  0x34   : > { %701 = vmatpush.bf16.msrb.mxu2 %v3094_v28  ;;  %v294_v28 = vpack.c.bf16 %v278_v23, %v277_v22  ;;  %v596_v21 = vld [vmem:[%s3245_s5 + $0x7a] sm:$0xff]  ;;  %v597_v22 = vld [vmem:[%s3245_s5 + $0x82] sm:$0xff]  ;;  %v2601_v23 = vld [vmem:[%s3245_s5 + $0x90] sm:$0xff] }
  0x35   : > { %936 = vmatpush.bf16.msrb.mxu3 %v3102_v29  ;;  %v282_v29 = vpack.c.bf16 %v254_v25, %v253_v24  ;;  %v2602_v24 = vld [vmem:[%s3245_s5 + $0x98] sm:$0xff] }
  0x36   : > { %499 = vmatpush.bf16.msrb.mxu1 %v3078_v30  ;;  %1170 = vmatpush.bf16.msrb.mxu0 %v3110_v31  ;;  %v183_v30 = vld [vmem:[%s3245_s5] sm:$0xff]  ;;  %v184_v31 = vld [vmem:[%s3245_s5 + $0x8] sm:$0xff] }
  0x37   : > { %v215_v36 = vpack.c.bf16 %v184_v31, %v183_v30  ;;  %v3526_v31 = vpack.c.bf16 %v2602_v24, %v2601_v23  ;;  %v2608_v23 = vld [vmem:[%s3245_s5 + $0xe0] sm:$0xff] }
  0x38   : > { %702 = vmatpush.bf16.msrb.mxu2 %v3093_v33  ;;  %v587_v33 = vld [vmem:[%s3245_s5 + $0xa] sm:$0xff] }
  0x39   : > { %937 = vmatpush.bf16.msrb.mxu3 %v3101_v34  ;;  %v2591_v34 = vld [vmem:[%s3245_s5 + $0x18] sm:$0xff]  ;;  %v618_v37 = vpack.c.bf16 %v587_v33, %v586_v32 }
  0x3a   : > { %500 = vmatpush.bf16.msrb.mxu1 %v3077_v42  ;;  %1171 = vmatpush.bf16.msrb.mxu0 %v3109_v43  ;;  %v853_v38 = vpack.c.bf16 %v2592_v35, %v2591_v34  ;;  %v3143_v42 = vld [vmem:[%s4001_s1 + $0x230] sm:$0xff]  ;;  %v588_v43 = vld [vmem:[%s3245_s5 + $0x1a] sm:$0xff] }
  0x3b   : > { %393 = vmatmul.bf16.gmra.mxu1 %v3326_v46  ;;  %413 = vmatmul.bf16.gmra.mxu2 %v3328_v47 }
  0x3c   : > { %703 = vmatpush.bf16.msrb.mxu2 %v3092_v44  ;;  %433 = vmatmul.bf16.gmra.mxu3 %v292_v48  ;;  %v589_v44 = vld [vmem:[%s3245_s5 + $0x22] sm:$0xff]  ;;  %v2594_v48 = vld [vmem:[%s3245_s5 + $0x38] sm:$0xff] }
  0x3d   : > { %938 = vmatpush.bf16.msrb.mxu3 %v3100_v45  ;;  %373 = vmatmul.bf16.gmra.mxu0 %v3330_v49  ;;  %v2593_v45 = vld [vmem:[%s3245_s5 + $0x30] sm:$0xff] }
  0x3e   : > { %501 = vmatpush.bf16.msrb.mxu1 %v3076_v50  ;;  %1172 = vmatpush.bf16.msrb.mxu0 %v3108_v51  ;;  %v3442_v50 = vpack.c.bf16 %v2594_v48, %v2593_v45  ;;  %v590_v51 = vld [vmem:[%s3245_s5 + $0x32] sm:$0xff] }
  0x3f   : > { %v3124_v48 = vld [vmem:[%s4001_s1 + $0x198] sm:$0xff] }
  0x40   : > { %704 = vmatpush.bf16.msrb.mxu2 %v3091_v52  ;;  %v591_v52 = vld [vmem:[%s3245_s5 + $0x3a] sm:$0xff] }
  0x41   : > { %939 = vmatpush.bf16.msrb.mxu3 %v3099_v53  ;;  %v2595_v53 = vld [vmem:[%s3245_s5 + $0x48] sm:$0xff] }
  0x42   : > { %502 = vmatpush.bf16.msrb.mxu1 %v3075_v54  ;;  %1173 = vmatpush.bf16.msrb.mxu0 %v3107_v55  ;;  %v2596_v54 = vld [vmem:[%s3245_s5 + $0x50] sm:$0xff]  ;;  %v3450_v55 = vpack.c.bf16 %v591_v52, %v590_v51  ;;  %v3132_v51 = vld [vmem:[%s4001_s1 + $0x1d8] sm:$0xff] }
  0x44   : > { %705 = vmatpush.bf16.msrb.mxu2 %v3090_v56  ;;  %v3452_v56 = vpack.c.bf16 %v2596_v54, %v2595_v53 }
  0x45   : > { %940 = vmatpush.bf16.msrb.mxu3 %v3098_v57  ;;  %v3126_v57 = vld [vmem:[%s4001_s1 + $0x1a8] sm:$0xff] }
  0x46   : > { %503 = vmatpush.bf16.msrb.mxu1 %v3074_v58  ;;  %1174 = vmatpush.bf16.msrb.mxu0 %v3106_v59  ;;  %v3134_v58 = vld [vmem:[%s4001_s1 + $0x1e8] sm:$0xff] }
  0x47   : > { %v3118_v59 = vld [vmem:[%s4001_s1 + $0x168] sm:$0xff] }
  0x48   : > { %706 = vmatpush.bf16.msrb.mxu2 %v3089_v61  ;;  %v592_v61 = vld [vmem:[%s3245_s5 + $0x4a] sm:$0xff] }
  0x49   : > { %941 = vmatpush.bf16.msrb.mxu3 %v3097_v62  ;;  %v593_v62 = vld [vmem:[%s3245_s5 + $0x52] sm:$0xff] }
  0x4a   : > { %504 = vmatpush.bf16.msrb.mxu1 %v3073_v6  ;;  %1175 = vmatpush.bf16.msrb.mxu0 %v3105_v7  ;;  %v3473_v1 = vpack.c.bf16 %v593_v62, %v592_v61  ;;  %v2600_v6 = vld [vmem:[%s3245_s5 + $0x80] sm:$0xff]  ;;  %v3485_v7 = vpack.c.bf16 %v595_v4, %v594_v3  ;;  %v2606_v62 = vld [vmem:[%s3245_s5 + $0xc8] sm:$0xff] }
  0x4b   : > { %398 = vmatmul.bf16.gmra.mxu1 %v3385_v8  ;;  %418 = vmatmul.bf16.gmra.mxu2 %v3387_v9  ;;  %v2605_v61 = vld [vmem:[%s3245_s5 + $0xc0] sm:$0xff] }
  0x4c   : > { %438 = vmatmul.bf16.gmra.mxu3 %v293_v10  ;;  %1637 = vmatpush.bf16.msra.mxu2 %v3128_v12 }
  0x4d   : > { %378 = vmatmul.bf16.gmra.mxu0 %v281_v11  ;;  %1871 = vmatpush.bf16.msra.mxu3 %v3136_v13  ;;  %v3133_v13 = vld [vmem:[%s4001_s1 + $0x1e0] sm:$0xff] }
  0x4e   : > { %1402 = vmatpush.bf16.msra.mxu1 %v3120_v14  ;;  %2105 = vmatpush.bf16.msra.mxu0 %v3144_v15 }
  0x50   : > { %1638 = vmatpush.bf16.msra.mxu2 %v3127_v39  ;;  %v2603_v39 = vld [vmem:[%s3245_s5 + $0xa8] sm:$0xff] }
  0x51   : > { %1872 = vmatpush.bf16.msra.mxu3 %v3135_v40  ;;  %v2604_v40 = vld [vmem:[%s3245_s5 + $0xb0] sm:$0xff] }
  0x52   : > { %1403 = vmatpush.bf16.msra.mxu1 %v3119_v41  ;;  %2106 = vmatpush.bf16.msra.mxu0 %v3143_v42 }
  0x54   : > { %1639 = vmatpush.bf16.msra.mxu2 %v3126_v57 }
  0x55   : > { %1873 = vmatpush.bf16.msra.mxu3 %v3134_v58  ;;  %v3140_v58 = vld [vmem:[%s4001_s1 + $0x218] sm:$0xff] }
  0x56   : > { %1404 = vmatpush.bf16.msra.mxu1 %v3118_v59  ;;  %2107 = vmatpush.bf16.msra.mxu0 %v3142_v60  ;;  %v600_v59 = vld [vmem:[%s3245_s5 + $0xaa] sm:$0xff]  ;;  %v601_v60 = vld [vmem:[%s3245_s5 + $0xb2] sm:$0xff] }
  0x57   : > { %v3586_v3 = vpack.c.bf16 %v601_v60, %v600_v59 }
  0x59   : > { %1874 = vmatpush.bf16.msra.mxu3 %v3133_v13 }
  0x5a   : > { %1405 = vmatpush.bf16.msra.mxu1 %v3117_v16  ;;  %2108 = vmatpush.bf16.msra.mxu0 %v3141_v20  ;;  %v602_v20 = vld [vmem:[%s3245_s5 + $0xc2] sm:$0xff] }
  0x5b   : > { %403 = vmatmul.bf16.gmra.mxu1 %v3411_v26  ;;  %423 = vmatmul.bf16.gmra.mxu2 %v3413_v27 }
  0x5c   : > { %443 = vmatmul.bf16.gmra.mxu3 %v294_v28 }
  0x5d   : > { %383 = vmatmul.bf16.gmra.mxu0 %v282_v29  ;;  %1875 = vmatpush.bf16.msra.mxu3 %v3132_v51  ;;  %v3131_v51 = vld [vmem:[%s4001_s1 + $0x1d0] sm:$0xff] }
  0x5e   : > { %2109 = vmatpush.bf16.msra.mxu0 %v3140_v58 }
  0x61   : > { %1876 = vmatpush.bf16.msra.mxu3 %v3131_v51 }
  0x6b   : > { %505 = vmatmul.bf16.vlgmr.msrb.gmra.mxu1 %v215_v36  ;;  %707 = vmatmul.bf16.vlgmr.msrb.gmra.mxu2 %v618_v37  ;;  %v598_v37 = vld [vmem:[%s3245_s5 + $0x92] sm:$0xff] }
  0x6c   : > { %942 = vmatmul.bf16.vlgmr.msrb.gmra.mxu3 %v853_v38 }
  0x6d   : > { %1176 = vmatmul.bf16.vlgmr.msrb.gmra.mxu0 %v3330_v49  ;;  %v3440_v49 = vpack.c.bf16 %v589_v44, %v588_v43 }
  0x7b   : > { %510 = vmatmul.bf16.gmra.mxu1 %v853_v38  ;;  %712 = vmatmul.bf16.gmra.mxu2 %v3440_v49  ;;  %v599_v38 = vld [vmem:[%s3245_s5 + $0x9a] sm:$0xff] }
  0x7c   : > { %947 = vmatmul.bf16.gmra.mxu3 %v3442_v50  ;;  %v3549_v43 = vpack.c.bf16 %v599_v38, %v598_v37 }
  0x7d   : > { %1181 = vmatmul.bf16.gmra.mxu0 %v281_v11  ;;  %v857_v11 = vpack.c.bf16 %v2600_v6, %v2599_v5  ;;  %v3590_v5 = vpack.c.bf16 %v2606_v62, %v2605_v61  ;;  %v3115_v62 = vld [vmem:[%s4001_s1 + $0x150] sm:$0xff] }
  0x8b   : > { %515 = vmatmul.bf16.gmra.mxu1 %v3442_v50  ;;  %717 = vmatmul.bf16.gmra.mxu2 %v3450_v55 }
  0x8c   : > { %952 = vmatmul.bf16.gmra.mxu3 %v3452_v56 }
  0x8d   : > { %1186 = vmatmul.bf16.gmra.mxu0 %v282_v29  ;;  %v3522_v29 = vpack.c.bf16 %v597_v22, %v596_v21  ;;  %v603_v21 = vld [vmem:[%s3245_s5 + $0xca] sm:$0xff]  ;;  %v2607_v22 = vld [vmem:[%s3245_s5 + $0xd8] sm:$0xff] }
  0x8e   : > { %v3613_v38 = vpack.c.bf16 %v603_v21, %v602_v20  ;;  %v3139_v20 = vld [vmem:[%s4001_s1 + $0x210] sm:$0xff] }
  0x8f   : > { %2110 = vmatpush.bf16.msra.mxu0 %v3139_v20 }
  0x9b   : > { %520 = vmatmul.bf16.gmra.mxu1 %v3452_v56  ;;  %722 = vmatmul.bf16.gmra.mxu2 %v3473_v1 }
  0x9c   : > { %957 = vmatmul.bf16.gmra.mxu3 %v3475_v2 }
  0x9d   : > { %1191 = vmatmul.bf16.gmra.mxu0 %v3264_v18  ;;  %v3125_v18 = vld [vmem:[%s4001_s1 + $0x1a0] sm:$0xff] }
  0x9e   : > { %1640 = vmatpush.bf16.msra.mxu2 %v3125_v18 }
  0xa2   : > { %1641 = vmatpush.bf16.msra.mxu2 %v3124_v48  ;;  %v3123_v48 = vld [vmem:[%s4001_s1 + $0x190] sm:$0xff] }
  0xa6   : > { %1642 = vmatpush.bf16.msra.mxu2 %v3123_v48 }
  0xa8   : > { %v3487_v10 = vpop.f32.mrf.mxu1 }
  0xaa   : > { %v3489_v12 = vpop.f32.mrf.mxu0 }
  0xab   : > { %525 = vmatmul.bf16.gmra.mxu1 %v3475_v2  ;;  %727 = vmatmul.bf16.gmra.mxu2 %v3485_v7 }
  0xac   : > { %962 = vmatmul.bf16.gmra.mxu3 %v857_v11 }
  0xad   : > { %1196 = vmatmul.bf16.gmra.mxu0 %v3326_v46 }
  0xae   : > { %v3500_v14 = vpop.f32.mrf.mxu2 }
  0xaf   : > { %v3502_v15 = vpop.f32.mrf.mxu3 }
  0xb0   : > { %v3507_v46 = vpop.f32.mrf.mxu1 }
  0xb2   : > { %v3509_v17 = vpop.f32.mrf.mxu0 }
  0xb6   : > { %v3518_v25 = vpop.f32.mrf.mxu2 }
  0xb7   : > { %v3520_v28 = vpop.f32.mrf.mxu3 }
  0xb8   : > { %v3524_v30 = vpop.f32.mrf.mxu1 }
  0xba   : > { %v3528_v32 = vpop.f32.mrf.mxu0 }
  0xbb   : > { %530 = vmatmul.bf16.gmra.mxu1 %v857_v11  ;;  %732 = vmatmul.bf16.gmra.mxu2 %v3522_v29 }
  0xbc   : > { %967 = vmatmul.bf16.gmra.mxu3 %v3526_v31 }
  0xbd   : > { %1201 = vmatmul.bf16.gmra.mxu0 %v3385_v8  ;;  %v859_v8 = vpack.c.bf16 %v2604_v40, %v2603_v39 }
  0xbe   : > { %v3533_v33 = vpop.f32.mrf.mxu2 }
  0xbf   : > { %v3535_v34 = vpop.f32.mrf.mxu3 }
  0xc0   : > { %v3537_v35 = vpop.f32.mrf.mxu1 }
  0xc2   : > { %v3539_v36 = vpop.f32.mrf.mxu0 }
  0xc6   : > { %v3545_v41 = vpop.f32.mrf.mxu2 }
  0xc7   : > { %v3547_v42 = vpop.f32.mrf.mxu3 }
  0xc8   : > { %v3551_v44 = vpop.f32.mrf.mxu1 }
  0xca   : > { %v3553_v45 = vpop.f32.mrf.mxu0 }
  0xcb   : > { %535 = vmatmul.bf16.gmra.mxu1 %v3526_v31  ;;  %737 = vmatmul.bf16.gmra.mxu2 %v3549_v43 }
  0xcc   : > { %972 = vmatmul.bf16.gmra.mxu3 %v859_v8 }
  0xcd   : > { %1206 = vmatmul.bf16.gmra.mxu0 %v3411_v26  ;;  %v3116_v26 = vld [vmem:[%s4001_s1 + $0x158] sm:$0xff] }
  0xce   : > { %v3564_v52 = vpop.f32.mrf.mxu2  ;;  %1406 = vmatpush.bf16.msra.mxu1 %v3116_v26 }
  0xcf   : > { %v3566_v53 = vpop.f32.mrf.mxu3 }
  0xd0   : > { %v3568_v54 = vpop.f32.mrf.mxu1 }
  0xd2   : > { %v3570_v57 = vpop.f32.mrf.mxu0  ;;  %1407 = vmatpush.bf16.msra.mxu1 %v3115_v62 }
  0xd6   : > { %v3582_v63 = vpop.f32.mrf.mxu2 }
  0xd7   : > { %v3584_v0 = vpop.f32.mrf.mxu3 }
  0xd8   : > { %v3588_v4 = vpop.f32.mrf.mxu1 }
  0xda   : > { %v3592_v6 = vpop.f32.mrf.mxu0 }
  0xdb   : > { %540 = vmatmul.bf16.gmra.mxu1 %v859_v8  ;;  %742 = vmatmul.bf16.gmra.mxu2 %v3586_v3 }
  0xdc   : > { %977 = vmatmul.bf16.gmra.mxu3 %v3590_v5 }
  0xdd   : > { %1211 = vmatmul.bf16.gmra.mxu0 %v3266_v19  ;;  %v3615_v19 = vpack.c.bf16 %v2608_v23, %v2607_v22  ;;  %v604_v22 = vld [vmem:[%s3245_s5 + $0xda] sm:$0xff]  ;;  %v605_v23 = vld [vmem:[%s3245_s5 + $0xe2] sm:$0xff] }
  0xde   : > { %v3597_v11 = vpop.f32.mrf.mxu2 }
  0xdf   : > { %v3599_v18 = vpop.f32.mrf.mxu3 }
  0xe0   : > { %4005 = vst [vmem:[#allocation2_spill] sm:$0xff] %v3599_v18  ;;  %v3601_v13 = vpop.f32.mrf.mxu1 }
  0xe2   : > { %v3603_v16 = vpop.f32.mrf.mxu0 }
  0xe6   : > { %v3609_v24 = vpop.f32.mrf.mxu2 }
  0xe7   : > { %v3611_v37 = vpop.f32.mrf.mxu3 }
  0xe8   : > { %4006 = vst [vmem:[#allocation3_spill] sm:$0xff] %v3611_v37  ;;  %v506_v39 = vpop.f32.mrf.mxu1 }
  0xe9   : > { %v507_v40 = vadd.f32 %v506_v39, %v3489_v12  ;;  %v2609_v39 = vld [vmem:[%s3245_s5 + $0xf0] sm:$0xff] }
  0xea   : > { %v1177_v8 = vpop.f32.mrf.mxu0 }
  0xeb   : > { %545 = vmatmul.bf16.gmra.mxu1 %v3590_v5  ;;  %747 = vmatmul.bf16.gmra.mxu2 %v3613_v38 }
  0xec   : > { %982 = vmatmul.bf16.gmra.mxu3 %v3615_v19 }
  0xed   : > { %1216 = vmatmul.bf16.gmra.mxu0 %v3328_v47 }
  0xee   : > { %v708_v12 = vpop.f32.mrf.mxu2 }
  0xef   : > { %v788_v26 = vadd.f32 %v708_v12, %v507_v40  ;;  %v943_v58 = vpop.f32.mrf.mxu3  ;;  %v2610_v40 = vld [vmem:[%s3245_s5 + $0xf8] sm:$0xff]  ;;  %v3641_v12 = vpack.c.bf16 %v605_v23, %v604_v22 }
  0xf0   : > { %v508_v59 = vpop.f32.mrf.mxu1 }
  0xf1   : > { %v1023_v60 = vadd.f32 %v943_v58, %v788_v26  ;;  %v509_v47 = vadd.f32 %v508_v59, %v3509_v17  ;;  %v3643_v58 = vpack.c.bf16 %v2610_v40, %v2609_v39 }
  0xf2   : > { %v1179_v61 = vpop.f32.mrf.mxu0 }
  0xf3   : > { %v3635_v21 = vadd.f32 %v1177_v8, %v1023_v60 }
  0xf5   : > { %4007 = vst [vmem:[#allocation4_spill] sm:$0xff] %v3635_v21 }
  0xf6   : > { %v710_v48 = vpop.f32.mrf.mxu2 }
  0xf7   : > { %v789_v51 = vadd.f32 %v710_v48, %v509_v47  ;;  %v945_v17 = vpop.f32.mrf.mxu3  ;;  %v606_v48 = vld [vmem:[%s3245_s5 + $0xf2] sm:$0xff] }
  0xf8   : > { %v511_v26 = vpop.f32.mrf.mxu1 }
  0xf9   : > { %v1024_v59 = vadd.f32 %v945_v17, %v789_v51  ;;  %v512_v37 = vadd.f32 %v511_v26, %v3528_v32  ;;  %v607_v51 = vld [vmem:[%s3245_s5 + $0xfa] sm:$0xff]  ;;  %v2611_v17 = vld [vmem:[%s3245_s5 + $0x108] sm:$0xff]  ;;  %v2612_v26 = vld [vmem:[%s3245_s5 + $0x110] sm:$0xff] }
  0xfa   : > { %v1182_v62 = vpop.f32.mrf.mxu0  ;;  %v3659_v21 = vpack.c.bf16 %v607_v51, %v606_v48  ;;  %v3661_v18 = vpack.c.bf16 %v2612_v26, %v2611_v17  ;;  %v3114_v48 = vld [vmem:[%s4001_s1 + $0x148] sm:$0xff] }
  0xfb   : > { %550 = vmatmul.bf16.gmra.mxu1 %v3615_v19  ;;  %752 = vmatmul.bf16.gmra.mxu2 %v3641_v12  ;;  %v3648_v8 = vadd.f32 %v1179_v61, %v1024_v59  ;;  %v3138_v51 = vld [vmem:[%s4001_s1 + $0x208] sm:$0xff] }
  0xfc   : > { %987 = vmatmul.bf16.gmra.mxu3 %v3643_v58  ;;  %1408 = vmatpush.bf16.msra.mxu1 %v3114_v48  ;;  %v608_v26 = vld [vmem:[%s3245_s5 + $0x10a] sm:$0xff] }
  0xfd   : > { %4008 = vst [vmem:[#allocation5_spill] sm:$0xff] %v3648_v8  ;;  %1221 = vmatmul.bf16.gmra.mxu0 %v3387_v9 }
  0xfe   : > { %v713_v60 = vpop.f32.mrf.mxu2  ;;  %2111 = vmatpush.bf16.msra.mxu0 %v3138_v51 }
  0xff   : > { %v790_v47 = vadd.f32 %v713_v60, %v512_v37  ;;  %v948_v20 = vpop.f32.mrf.mxu3 }
 0x100   : > { %v513_v22 = vpop.f32.mrf.mxu1 }
 0x101   : > { %v1025_v23 = vadd.f32 %v948_v20, %v790_v47  ;;  %v514_v32 = vadd.f32 %v513_v22, %v3539_v36 }
 0x102   : > { %v1184_v39 = vpop.f32.mrf.mxu0 }
 0x103   : > { %v3653_v40 = vadd.f32 %v1182_v62, %v1025_v23  ;;  %v3122_v62 = vld [vmem:[%s4001_s1 + $0x188] sm:$0xff] }
 0x104   : > { %1643 = vmatpush.bf16.msra.mxu2 %v3122_v62 }
 0x105   : > { %4009 = vst [vmem:[#allocation6_spill] sm:$0xff] %v3653_v40 }
 0x106   : > { %v715_v61 = vpop.f32.mrf.mxu2 }
 0x107   : > { %v791_v59 = vadd.f32 %v715_v61, %v514_v32  ;;  %v950_v8 = vpop.f32.mrf.mxu3  ;;  %v609_v61 = vld [vmem:[%s3245_s5 + $0x112] sm:$0xff] }
 0x108   : > { %v516_v9 = vpop.f32.mrf.mxu1 }
 0x109   : > { %v1026_v37 = vadd.f32 %v950_v8, %v791_v59  ;;  %v517_v60 = vadd.f32 %v516_v9, %v3553_v45  ;;  %v3130_v45 = vld [vmem:[%s4001_s1 + $0x1c8] sm:$0xff]  ;;  %v2613_v59 = vld [vmem:[%s3245_s5 + $0x120] sm:$0xff] }
 0x10a   : > { %v1187_v47 = vpop.f32.mrf.mxu0  ;;  %1877 = vmatpush.bf16.msra.mxu3 %v3130_v45  ;;  %v2614_v9 = vld [vmem:[%s3245_s5 + $0x128] sm:$0xff] }
 0x10b   : > { %555 = vmatmul.bf16.gmra.mxu1 %v3643_v58  ;;  %757 = vmatmul.bf16.gmra.mxu2 %v3659_v21  ;;  %v3666_v36 = vadd.f32 %v1184_v39, %v1026_v37  ;;  %v2693_v37 = vld [vmem:[%s3245_s5 + $0x121] sm:$0xff] }
 0x10c   : > { %992 = vmatmul.bf16.gmra.mxu3 %v3661_v18 }
 0x10d   : > { %4010 = vst [vmem:[#allocation7_spill] sm:$0xff] %v3666_v36  ;;  %1226 = vmatmul.bf16.gmra.mxu0 %v3413_v27 }
 0x10e   : > { %v718_v8 = vpop.f32.mrf.mxu2 }
 0x10f   : > { %v792_v20 = vadd.f32 %v718_v8, %v517_v60  ;;  %v953_v22 = vpop.f32.mrf.mxu3  ;;  %v2694_v60 = vld [vmem:[%s3245_s5 + $0x129] sm:$0xff]  ;;  %v3691_v8 = vpack.c.bf16 %v609_v61, %v608_v26 }
 0x110   : > { %v518_v27 = vpop.f32.mrf.mxu1 }
 0x111   : > { %v1027_v23 = vadd.f32 %v953_v22, %v792_v20  ;;  %v519_v32 = vadd.f32 %v518_v27, %v3570_v57  ;;  %v3693_v22 = vpack.c.bf16 %v2614_v9, %v2613_v59  ;;  %v3695_v27 = vpack.c.bf16 %v2694_v60, %v2693_v37 }
 0x112   : > { %v1189_v39 = vpop.f32.mrf.mxu0 }
 0x113   : > { %v3683_v17 = vadd.f32 %v1187_v47, %v1027_v23  ;;  %4012 = vst [vmem:[#allocation9_spill] sm:$0xff] %v3695_v27 }
 0x115   : > { %4011 = vst [vmem:[#allocation8_spill] sm:$0xff] %v3683_v17 }
 0x116   : > { %v720_v57 = vpop.f32.mrf.mxu2 }
 0x117   : > { %v793_v62 = vadd.f32 %v720_v57, %v519_v32  ;;  %v955_v45 = vpop.f32.mrf.mxu3  ;;  %v610_v57 = vld [vmem:[%s3245_s5 + $0x122] sm:$0xff] }
 0x118   : > { %v521_v20 = vpop.f32.mrf.mxu1 }
 0x119   : > { %v1028_v48 = vadd.f32 %v955_v45, %v793_v62  ;;  %v522_v47 = vadd.f32 %v521_v20, %v3592_v6  ;;  %v611_v62 = vld [vmem:[%s3245_s5 + $0x12a] sm:$0xff]  ;;  %v2615_v45 = vld [vmem:[%s3245_s5 + $0x138] sm:$0xff] }
 0x11a   : > { %v1192_v23 = vpop.f32.mrf.mxu0  ;;  %v2695_v20 = vld [vmem:[%s3245_s5 + $0x139] sm:$0xff] }
 0x11b   : > { %560 = vmatmul.bf16.gmra.mxu1 %v3661_v18  ;;  %762 = vmatmul.bf16.gmra.mxu2 %v3691_v8  ;;  %v3700_v32 = vadd.f32 %v1189_v39, %v1028_v48  ;;  %v2616_v39 = vld [vmem:[%s3245_s5 + $0x140] sm:$0xff] }
 0x11c   : > { %997 = vmatmul.bf16.gmra.mxu3 %v3693_v22  ;;  %v2696_v48 = vld [vmem:[%s3245_s5 + $0x141] sm:$0xff] }
 0x11d   : > { %4013 = vst [vmem:[#allocation10_spill] sm:$0xff] %v3700_v32  ;;  %1231 = vmatmul.bf16.gmra.mxu0 %v3695_v27  ;;  %v3713_v27 = vpack.c.bf16 %v611_v62, %v610_v57  ;;  %v1099_v40 = vpack.c.bf16 %v2696_v48, %v2695_v20  ;;  %v3113_v57 = vld [vmem:[%s4001_s1 + $0x140] sm:$0xff]  ;;  %v2617_v20 = vld [vmem:[%s3245_s5 + $0x150] sm:$0xff] }
 0x11e   : > { %v723_v51 = vpop.f32.mrf.mxu2  ;;  %1409 = vmatpush.bf16.msra.mxu1 %v3113_v57 }
 0x11f   : > { %v794_v26 = vadd.f32 %v723_v51, %v522_v47  ;;  %v958_v61 = vpop.f32.mrf.mxu3  ;;  %v865_v51 = vpack.c.bf16 %v2616_v39, %v2615_v45  ;;  %v612_v45 = vld [vmem:[%s3245_s5 + $0x13a] sm:$0xff]  ;;  %v613_v39 = vld [vmem:[%s3245_s5 + $0x142] sm:$0xff] }
 0x120   : > { %v523_v6 = vpop.f32.mrf.mxu1 }
 0x121   : > { %v1029_v59 = vadd.f32 %v958_v61, %v794_v26  ;;  %v524_v9 = vadd.f32 %v523_v6, %v3603_v16 }
 0x122   : > { %v1194_v37 = vpop.f32.mrf.mxu0 }
 0x123   : > { %v3705_v60 = vadd.f32 %v1192_v23, %v1029_v59  ;;  %v3121_v23 = vld [vmem:[%s4001_s1 + $0x180] sm:$0xff] }
 0x124   : > { %1644 = vmatpush.bf16.msra.mxu2 %v3121_v23  ;;  %v2698_v23 = vld [vmem:[%s3245_s5 + $0x159] sm:$0xff] }
 0x125   : > { %4014 = vst [vmem:[#allocation11_spill] sm:$0xff] %v3705_v60 }
 0x126   : > { %v725_v32 = vpop.f32.mrf.mxu2 }
 0x127   : > { %v795_v17 = vadd.f32 %v725_v32, %v524_v9  ;;  %v960_v36 = vpop.f32.mrf.mxu3  ;;  %v3129_v32 = vld [vmem:[%s4001_s1 + $0x1c0] sm:$0xff] }
 0x128   : > { %v526_v47 = vpop.f32.mrf.mxu1  ;;  %1878 = vmatpush.bf16.msra.mxu3 %v3129_v32 }
 0x129   : > { %v1030_v26 = vadd.f32 %v960_v36, %v795_v17  ;;  %v527_v36 = vadd.f32 %v526_v47, %v3487_v10  ;;  %v3137_v10 = vld [vmem:[%s4001_s1 + $0x200] sm:$0xff]  ;;  %v2618_v47 = vld [vmem:[%s3245_s5 + $0x158] sm:$0xff] }
 0x12a   : > { %v1197_v61 = vpop.f32.mrf.mxu0  ;;  %2112 = vmatpush.bf16.msra.mxu0 %v3137_v10 }
 0x12b   : > { %565 = vmatmul.bf16.gmra.mxu1 %v3693_v22  ;;  %767 = vmatmul.bf16.gmra.mxu2 %v3713_v27  ;;  %v3717_v16 = vadd.f32 %v1194_v37, %v1030_v26  ;;  %v2697_v26 = vld [vmem:[%s3245_s5 + $0x151] sm:$0xff] }
 0x12c   : > { %1002 = vmatmul.bf16.gmra.mxu3 %v865_v51  ;;  %v1100_v60 = vpack.c.bf16 %v2698_v23, %v2697_v26  ;;  %v615_v26 = vld [vmem:[%s3245_s5 + $0x15a] sm:$0xff]  ;;  %v2619_v23 = vld [vmem:[%s3245_s5 + $0x168] sm:$0xff] }
 0x12d   : > { %4015 = vst [vmem:[#allocation12_spill] sm:$0xff] %v3717_v16  ;;  %1236 = vmatmul.bf16.gmra.mxu0 %v1099_v40  ;;  %v866_v16 = vpack.c.bf16 %v2618_v47, %v2617_v20 }
 0x12e   : > { %v728_v17 = vpop.f32.mrf.mxu2 }
 0x12f   : > { %v796_v6 = vadd.f32 %v728_v17, %v527_v36  ;;  %v963_v40 = vpop.f32.mrf.mxu3 }
 0x130   : > { %v528_v59 = vpop.f32.mrf.mxu1 }
 0x131   : > { %v1031_v9 = vadd.f32 %v963_v40, %v796_v6  ;;  %v529_v48 = vadd.f32 %v528_v59, %v3507_v46  ;;  %v3741_v6 = vpack.c.bf16 %v613_v39, %v612_v45 }
 0x132   : > { %v1199_v37 = vpop.f32.mrf.mxu0 }
 0x133   : > { %v3732_v62 = vadd.f32 %v1197_v61, %v1031_v9 }
 0x136   : > { %v730_v32 = vpop.f32.mrf.mxu2 }
 0x137   : > { %v797_v36 = vadd.f32 %v730_v32, %v529_v48  ;;  %v965_v17 = vpop.f32.mrf.mxu3  ;;  %v2620_v32 = vld [vmem:[%s3245_s5 + $0x170] sm:$0xff] }
 0x138   : > { %v531_v40 = vpop.f32.mrf.mxu1 }
 0x139   : > { %v1032_v57 = vadd.f32 %v965_v17, %v797_v36  ;;  %v532_v59 = vadd.f32 %v531_v40, %v3524_v30  ;;  %v2699_v36 = vld [vmem:[%s3245_s5 + $0x169] sm:$0xff]  ;;  %v2700_v17 = vld [vmem:[%s3245_s5 + $0x171] sm:$0xff] }
 0x13a   : > { %v1202_v61 = vpop.f32.mrf.mxu0 }
 0x13b   : > { %570 = vmatmul.bf16.gmra.mxu1 %v865_v51  ;;  %772 = vmatmul.bf16.gmra.mxu2 %v3741_v6  ;;  %v3744_v46 = vadd.f32 %v1199_v37, %v1032_v57  ;;  %v614_v51 = vld [vmem:[%s3245_s5 + $0x152] sm:$0xff] }
 0x13c   : > { %1007 = vmatmul.bf16.gmra.mxu3 %v866_v16  ;;  %v3756_v30 = vpack.c.bf16 %v615_v26, %v614_v51 }
 0x13d   : > { %4016 = vst [vmem:[#allocation13_spill] sm:$0xff] %v3744_v46  ;;  %1241 = vmatmul.bf16.gmra.mxu0 %v1100_v60 }
 0x13e   : > { %v733_v9 = vpop.f32.mrf.mxu2 }
 0x13f   : > { %v798_v10 = vadd.f32 %v733_v9, %v532_v59  ;;  %v968_v45 = vpop.f32.mrf.mxu3  ;;  %v867_v59 = vpack.c.bf16 %v2620_v32, %v2619_v23  ;;  %v1101_v9 = vpack.c.bf16 %v2700_v17, %v2699_v36  ;;  %v617_v32 = vld [vmem:[%s3245_s5 + $0x172] sm:$0xff]  ;;  %v2621_v36 = vld [vmem:[%s3245_s5 + $0x180] sm:$0xff]  ;;  %v2622_v17 = vld [vmem:[%s3245_s5 + $0x188] sm:$0xff] }
 0x140   : > { %v533_v39 = vpop.f32.mrf.mxu1 }
 0x141   : > { %v1033_v20 = vadd.f32 %v968_v45, %v798_v10  ;;  %v534_v37 = vadd.f32 %v533_v39, %v3537_v35 }
 0x142   : > { %v1204_v48 = vpop.f32.mrf.mxu0 }
 0x143   : > { %v3747_v47 = vadd.f32 %v1202_v61, %v1033_v20 }
 0x146   : > { %v735_v57 = vpop.f32.mrf.mxu2 }
 0x147   : > { %v799_v60 = vadd.f32 %v735_v57, %v534_v37  ;;  %v970_v46 = vpop.f32.mrf.mxu3  ;;  %v2701_v57 = vld [vmem:[%s3245_s5 + $0x181] sm:$0xff] }
 0x148   : > { %v536_v40 = vpop.f32.mrf.mxu1 }
 0x149   : > { %v1034_v10 = vadd.f32 %v970_v46, %v799_v60  ;;  %v537_v45 = vadd.f32 %v536_v40, %v3551_v44  ;;  %v2702_v60 = vld [vmem:[%s3245_s5 + $0x189] sm:$0xff] }
 0x14a   : > { %v1207_v61 = vpop.f32.mrf.mxu0 }
 0x14b   : > { %575 = vmatmul.bf16.gmra.mxu1 %v866_v16  ;;  %777 = vmatmul.bf16.gmra.mxu2 %v3756_v30  ;;  %v3759_v35 = vadd.f32 %v1204_v48, %v1034_v10  ;;  %v616_v16 = vld [vmem:[%s3245_s5 + $0x16a] sm:$0xff] }
 0x14c   : > { %1012 = vmatmul.bf16.gmra.mxu3 %v867_v59  ;;  %v3771_v44 = vpack.c.bf16 %v617_v32, %v616_v16 }
 0x14d   : > { %4017 = vst [vmem:[#allocation14_spill] sm:$0xff] %v3759_v35  ;;  %1246 = vmatmul.bf16.gmra.mxu0 %v1101_v9 }
 0x14e   : > { %v738_v39 = vpop.f32.mrf.mxu2 }
 0x14f   : > { %v800_v20 = vadd.f32 %v738_v39, %v537_v45  ;;  %v973_v51 = vpop.f32.mrf.mxu3  ;;  %v868_v45 = vpack.c.bf16 %v2622_v17, %v2621_v36  ;;  %v1102_v39 = vpack.c.bf16 %v2702_v60, %v2701_v57  ;;  %v2911_v57 = vld [vmem:[%s3245_s5 + $0x31] sm:$0xff] }
 0x150   : > { %v538_v26 = vpop.f32.mrf.mxu1 }
 0x151   : > { %v1035_v46 = vadd.f32 %v973_v51, %v800_v20  ;;  %v539_v48 = vadd.f32 %v538_v26, %v3568_v54 }
 0x152   : > { %v1209_v23 = vpop.f32.mrf.mxu0 }
 0x153   : > { %v3762_v37 = vadd.f32 %v1207_v61, %v1035_v46 }
 0x156   : > { %v740_v10 = vpop.f32.mrf.mxu2 }
 0x157   : > { %v801_v9 = vadd.f32 %v740_v10, %v539_v48  ;;  %v975_v35 = vpop.f32.mrf.mxu3 }
 0x158   : > { %v541_v40 = vpop.f32.mrf.mxu1 }
 0x159   : > { %v1036_v20 = vadd.f32 %v975_v35, %v801_v9  ;;  %v542_v54 = vadd.f32 %v541_v40, %v3588_v4 }
 0x15a   : > { %v1212_v61 = vpop.f32.mrf.mxu0 }
 0x15b   : > { %580 = vmatmul.bf16.gmra.mxu1 %v867_v59  ;;  %782 = vmatmul.bf16.gmra.mxu2 %v3771_v44  ;;  %v3774_v51 = vadd.f32 %v1209_v23, %v1036_v20  ;;  %v2912_v59 = vld [vmem:[%s3245_s5 + $0x39] sm:$0xff] }
 0x15c   : > { %1017 = vmatmul.bf16.gmra.mxu3 %v868_v45  ;;  %v1790_v45 = vpack.c.bf16 %v2912_v59, %v2911_v57 }
 0x15d   : > { %1251 = vmatmul.bf16.gmra.mxu0 %v1102_v39 }
 0x15e   : > { %v743_v26 = vpop.f32.mrf.mxu2 }
 0x15f   : > { %v802_v46 = vadd.f32 %v743_v26, %v542_v54  ;;  %v978_v16 = vpop.f32.mrf.mxu3 }
 0x160   : > { %v543_v32 = vpop.f32.mrf.mxu1 }
 0x161   : > { %v1037_v48 = vadd.f32 %v978_v16, %v802_v46  ;;  %v544_v35 = vadd.f32 %v543_v32, %v3601_v13 }
 0x162   : > { %v1214_v36 = vpop.f32.mrf.mxu0 }
 0x163   : > { %v3777_v17 = vadd.f32 %v1212_v61, %v1037_v48 }
 0x166   : > { %v745_v60 = vpop.f32.mrf.mxu2 }
 0x167   : > { %v803_v10 = vadd.f32 %v745_v60, %v544_v35  ;;  %v980_v23 = vpop.f32.mrf.mxu3  ;;  %v2914_v35 = vld [vmem:[%s3245_s5 + $0x51] sm:$0xff] }
 0x168   : > { %v546_v9 = vpop.f32.mrf.mxu1 }
 0x169   : > { %v1038_v39 = vadd.f32 %v980_v23, %v803_v10  ;;  %v547_v13 = vadd.f32 %v546_v9, %v3500_v14 }
 0x16a   : > { %v1217_v4 = vpop.f32.mrf.mxu0 }
 0x16b   : > { %1410 = vmatmul.bf16.vlgmr.msra.gmra.mxu1 %v3440_v49  ;;  %1645 = vmatmul.bf16.vlgmr.msra.gmra.mxu2 %v3442_v50  ;;  %v3784_v40 = vadd.f32 %v1214_v36, %v1038_v39  ;;  %v2913_v49 = vld [vmem:[%s3245_s5 + $0x49] sm:$0xff] }
 0x16c   : > { %1879 = vmatmul.bf16.vlgmr.msra.gmra.mxu3 %v1790_v45  ;;  %v1791_v60 = vpack.c.bf16 %v2914_v35, %v2913_v49 }
 0x16d   : > { %2113 = vmatmul.bf16.vlgmr.msra.gmra.mxu0 %v3450_v55 }
 0x16e   : > { %v748_v20 = vpop.f32.mrf.mxu2 }
 0x16f   : > { %v804_v61 = vadd.f32 %v748_v20, %v547_v13  ;;  %v983_v54 = vpop.f32.mrf.mxu3 }
 0x170   : > { %v548_v26 = vpop.f32.mrf.mxu1 }
 0x171   : > { %v1039_v46 = vadd.f32 %v983_v54, %v804_v61  ;;  %v549_v48 = vadd.f32 %v548_v26, %v3518_v25  ;;  %v2916_v26 = vld [vmem:[%s3245_s5 + $0x69] sm:$0xff] }
 0x172   : > { %v1219_v16 = vpop.f32.mrf.mxu0 }
 0x173   : > { %v3788_v32 = vadd.f32 %v1217_v4, %v1039_v46 }
 0x176   : > { %v750_v50 = vpop.f32.mrf.mxu2 }
 0x177   : > { %v805_v36 = vadd.f32 %v750_v50, %v549_v48  ;;  %v985_v57 = vpop.f32.mrf.mxu3 }
 0x178   : > { %v551_v59 = vpop.f32.mrf.mxu1 }
 0x179   : > { %v1040_v10 = vadd.f32 %v985_v57, %v805_v36  ;;  %v552_v25 = vadd.f32 %v551_v59, %v3533_v33 }
 0x17a   : > { %v1222_v14 = vpop.f32.mrf.mxu0 }
 0x17b   : > { %1415 = vmatmul.bf16.gmra.mxu1 %v3450_v55  ;;  %1650 = vmatmul.bf16.gmra.mxu2 %v3452_v56  ;;  %v3795_v23 = vadd.f32 %v1219_v16, %v1040_v10  ;;  %v2915_v55 = vld [vmem:[%s3245_s5 + $0x61] sm:$0xff] }
 0x17c   : > { %1884 = vmatmul.bf16.gmra.mxu3 %v1791_v60  ;;  %v1792_v49 = vpack.c.bf16 %v2916_v26, %v2915_v55 }
 0x17d   : > { %2118 = vmatmul.bf16.gmra.mxu0 %v3473_v1 }
 0x17e   : > { %v753_v9 = vpop.f32.mrf.mxu2 }
 0x17f   : > { %v806_v45 = vadd.f32 %v753_v9, %v552_v25  ;;  %v988_v39 = vpop.f32.mrf.mxu3  ;;  %v2757_v25 = vld [vmem:[%s3245_s5 + $0x62] sm:$0xff]  ;;  %v2758_v9 = vld [vmem:[%s3245_s5 + $0x6a] sm:$0xff] }
 0x180   : > { %v553_v4 = vpop.f32.mrf.mxu1 }
 0x181   : > { %v1041_v13 = vadd.f32 %v988_v39, %v806_v45  ;;  %v554_v54 = vadd.f32 %v553_v4, %v3545_v41  ;;  %v2838_v45 = vld [vmem:[%s3245_s5 + $0x80] sm:$0xff] }
 0x182   : > { %v1224_v20 = vpop.f32.mrf.mxu0  ;;  %v2917_v4 = vld [vmem:[%s3245_s5 + $0x79] sm:$0xff] }
 0x183   : > { %v3799_v61 = vadd.f32 %v1222_v14, %v1041_v13  ;;  %v2918_v13 = vld [vmem:[%s3245_s5 + $0x81] sm:$0xff] }
 0x186   : > { %v755_v56 = vpop.f32.mrf.mxu2 }
 0x187   : > { %v807_v46 = vadd.f32 %v755_v56, %v554_v54  ;;  %v990_v16 = vpop.f32.mrf.mxu3  ;;  %v1793_v56 = vpack.c.bf16 %v2918_v13, %v2917_v4 }
 0x188   : > { %v556_v48 = vpop.f32.mrf.mxu1 }
 0x189   : > { %v1042_v35 = vadd.f32 %v990_v16, %v807_v46  ;;  %v557_v41 = vadd.f32 %v556_v48, %v3564_v52  ;;  %v1324_v52 = vpack.c.bf16 %v2758_v9, %v2757_v25  ;;  %v2920_v25 = vld [vmem:[%s3245_s5 + $0x99] sm:$0xff] }
 0x18a   : > { %v1227_v33 = vpop.f32.mrf.mxu0 }
 0x18b   : > { %1420 = vmatmul.bf16.gmra.mxu1 %v3473_v1  ;;  %1655 = vmatmul.bf16.gmra.mxu2 %v3475_v2  ;;  %v3806_v50 = vadd.f32 %v1224_v20, %v1042_v35  ;;  %v2837_v2 = vld [vmem:[%s3245_s5 + $0x78] sm:$0xff] }
 0x18c   : > { %1889 = vmatmul.bf16.gmra.mxu3 %v1792_v49  ;;  %v1559_v55 = vpack.c.bf16 %v2838_v45, %v2837_v2 }
 0x18d   : > { %2123 = vmatmul.bf16.gmra.mxu0 %v3485_v7 }
 0x18e   : > { %v758_v36 = vpop.f32.mrf.mxu2 }
 0x18f   : > { %v808_v57 = vadd.f32 %v758_v36, %v557_v41  ;;  %v993_v59 = vpop.f32.mrf.mxu3 }
 0x190   : > { %v558_v60 = vpop.f32.mrf.mxu1 }
 0x191   : > { %v1043_v10 = vadd.f32 %v993_v59, %v808_v57  ;;  %v559_v39 = vadd.f32 %v558_v60, %v3582_v63 }
 0x192   : > { %v1229_v14 = vpop.f32.mrf.mxu0 }
 0x193   : > { %v3811_v1 = vadd.f32 %v1227_v33, %v1043_v10  ;;  %v2919_v10 = vld [vmem:[%s3245_s5 + $0x91] sm:$0xff] }
 0x196   : > { %v760_v20 = vpop.f32.mrf.mxu2 }
 0x197   : > { %v809_v7 = vadd.f32 %v760_v20, %v559_v39  ;;  %v995_v54 = vpop.f32.mrf.mxu3  ;;  %v1794_v39 = vpack.c.bf16 %v2920_v25, %v2919_v10 }
 0x198   : > { %v561_v26 = vpop.f32.mrf.mxu1 }
 0x199   : > { %v1044_v46 = vadd.f32 %v995_v54, %v809_v7  ;;  %v562_v63 = vadd.f32 %v561_v26, %v3597_v11 }
 0x19a   : > { %v1232_v16 = vpop.f32.mrf.mxu0 }
 0x19b   : > { %1425 = vmatmul.bf16.gmra.mxu1 %v1324_v52  ;;  %1660 = vmatmul.bf16.gmra.mxu2 %v1559_v55  ;;  %v3819_v48 = vadd.f32 %v1229_v14, %v1044_v46  ;;  %v2762_v46 = vld [vmem:[%s3245_s5 + $0x9a] sm:$0xff] }
 0x19c   : > { %1894 = vmatmul.bf16.gmra.mxu3 %v1793_v56  ;;  %v2761_v56 = vld [vmem:[%s3245_s5 + $0x92] sm:$0xff] }
 0x19d   : > { %2128 = vmatmul.bf16.gmra.mxu0 %v3522_v29 }
 0x19e   : > { %v763_v49 = vpop.f32.mrf.mxu2 }
 0x19f   : > { %v810_v35 = vadd.f32 %v763_v49, %v562_v63  ;;  %v998_v33 = vpop.f32.mrf.mxu3  ;;  %v2921_v49 = vld [vmem:[%s3245_s5 + $0xa9] sm:$0xff] }
 0x1a0   : > { %v563_v41 = vpop.f32.mrf.mxu1 }
 0x1a1   : > { %v1045_v36 = vadd.f32 %v998_v33, %v810_v35  ;;  %v564_v60 = vadd.f32 %v563_v41, %v3609_v24  ;;  %v2922_v35 = vld [vmem:[%s3245_s5 + $0xb1] sm:$0xff] }
 0x1a2   : > { %v1234_v57 = vpop.f32.mrf.mxu0 }
 0x1a3   : > { %v3823_v59 = vadd.f32 %v1232_v16, %v1045_v36  ;;  %v2842_v16 = vld [vmem:[%s3245_s5 + $0xb0] sm:$0xff] }
 0x1a6   : > { %v765_v9 = vpop.f32.mrf.mxu2 }
 0x1a7   : > { %v811_v14 = vadd.f32 %v765_v9, %v564_v60  ;;  %v1000_v2 = vpop.f32.mrf.mxu3  ;;  %v1795_v60 = vpack.c.bf16 %v2922_v35, %v2921_v49 }
 0x1a8   : > { %v566_v45 = vpop.f32.mrf.mxu1 }
 0x1a9   : > { %v1046_v4 = vadd.f32 %v1000_v2, %v811_v14  ;;  %v567_v24 = vadd.f32 %v566_v45, %v3502_v15  ;;  %v1326_v15 = vpack.c.bf16 %v2762_v46, %v2761_v56 }
 0x1aa   : > { %v1237_v11 = vpop.f32.mrf.mxu0 }
 0x1ab   : > { %1430 = vmatmul.bf16.gmra.mxu1 %v3522_v29  ;;  %1665 = vmatmul.bf16.gmra.mxu2 %v3526_v31  ;;  %v3830_v13 = vadd.f32 %v1234_v57, %v1046_v4  ;;  %v2841_v31 = vld [vmem:[%s3245_s5 + $0xa8] sm:$0xff] }
 0x1ac   : > { %1899 = vmatmul.bf16.gmra.mxu3 %v1794_v39  ;;  %v1561_v36 = vpack.c.bf16 %v2842_v16, %v2841_v31 }
 0x1ad   : > { %2133 = vmatmul.bf16.gmra.mxu0 %v3549_v43 }
 0x1ae   : > { %v768_v20 = vpop.f32.mrf.mxu2 }
 0x1af   : > { %v812_v7 = vadd.f32 %v768_v20, %v567_v24  ;;  %v1003_v54 = vpop.f32.mrf.mxu3 }
 0x1b0   : > { %v568_v52 = vpop.f32.mrf.mxu1 }
 0x1b1   : > { %v1047_v55 = vadd.f32 %v1003_v54, %v812_v7  ;;  %v569_v63 = vadd.f32 %v568_v52, %v3520_v28  ;;  %v2923_v7 = vld [vmem:[%s3245_s5 + $0xc1] sm:$0xff]  ;;  %v2924_v54 = vld [vmem:[%s3245_s5 + $0xc9] sm:$0xff] }
 0x1b2   : > { %v1239_v26 = vpop.f32.mrf.mxu0  ;;  %v1796_v46 = vpack.c.bf16 %v2924_v54, %v2923_v7 }
 0x1b3   : > { %v3835_v29 = vadd.f32 %v1237_v11, %v1047_v55 }
 0x1b6   : > { %v770_v33 = vpop.f32.mrf.mxu2 }
 0x1b7   : > { %v813_v43 = vadd.f32 %v770_v33, %v569_v63  ;;  %v1005_v41 = vpop.f32.mrf.mxu3 }
 0x1b8   : > { %v571_v57 = vpop.f32.mrf.mxu1 }
 0x1b9   : > { %v1048_v10 = vadd.f32 %v1005_v41, %v813_v43  ;;  %v572_v28 = vadd.f32 %v571_v57, %v3535_v34  ;;  %v2926_v57 = vld [vmem:[%s3245_s5 + $0xe1] sm:$0xff] }
 0x1ba   : > { %v1242_v25 = vpop.f32.mrf.mxu0 }
 0x1bb   : > { %1435 = vmatmul.bf16.gmra.mxu1 %v1326_v15  ;;  %1670 = vmatmul.bf16.gmra.mxu2 %v1561_v36  ;;  %v3843_v9 = vadd.f32 %v1239_v26, %v1048_v10 }
 0x1bc   : > { %1904 = vmatmul.bf16.gmra.mxu3 %v1795_v60 }
 0x1bd   : > { %2138 = vmatmul.bf16.gmra.mxu0 %v3586_v3 }
 0x1be   : > { %v773_v14 = vpop.f32.mrf.mxu2 }
 0x1bf   : > { %v814_v2 = vadd.f32 %v773_v14, %v572_v28  ;;  %v1008_v45 = vpop.f32.mrf.mxu3 }
 0x1c0   : > { %v573_v39 = vpop.f32.mrf.mxu1 }
 0x1c1   : > { %v1049_v4 = vadd.f32 %v1008_v45, %v814_v2  ;;  %v574_v20 = vadd.f32 %v573_v39, %v3547_v42 }
 0x1c2   : > { %v1244_v11 = vpop.f32.mrf.mxu0 }
 0x1c3   : > { %v3847_v24 = vadd.f32 %v1242_v25, %v1049_v4 }
 0x1c6   : > { %v775_v52 = vpop.f32.mrf.mxu2 }
 0x1c7   : > { %v815_v55 = vadd.f32 %v775_v52, %v574_v20  ;;  %v1010_v26 = vpop.f32.mrf.mxu3 }
 0x1c8   : > { %v576_v56 = vpop.f32.mrf.mxu1 }
 0x1c9   : > { %v1050_v31 = vadd.f32 %v1010_v26, %v815_v55  ;;  %v577_v42 = vadd.f32 %v576_v56, %v3566_v53  ;;  %v2927_v26 = vld [vmem:[%s3245_s5 + $0xf1] sm:$0xff] }
 0x1ca   : > { %v1247_v34 = vpop.f32.mrf.mxu0 }
 0x1cb   : > { %1440 = vmatmul.bf16.gmra.mxu1 %v3586_v3  ;;  %1675 = vmatmul.bf16.gmra.mxu2 %v3590_v5  ;;  %v3854_v16 = vadd.f32 %v1244_v11, %v1050_v31  ;;  %v2925_v3 = vld [vmem:[%s3245_s5 + $0xd9] sm:$0xff] }
 0x1cc   : > { %1909 = vmatmul.bf16.gmra.mxu3 %v1796_v46  ;;  %v1797_v28 = vpack.c.bf16 %v2926_v57, %v2925_v3 }
 0x1cd   : > { %2143 = vmatmul.bf16.gmra.mxu0 %v3613_v38 }
 0x1ce   : > { %v778_v63 = vpop.f32.mrf.mxu2 }
 0x1cf   : > { %v816_v49 = vadd.f32 %v778_v63, %v577_v42  ;;  %v1013_v35 = vpop.f32.mrf.mxu3 }
 0x1d0   : > { %v578_v33 = vpop.f32.mrf.mxu1 }
 0x1d1   : > { %v1051_v43 = vadd.f32 %v1013_v35, %v816_v49  ;;  %v579_v36 = vadd.f32 %v578_v33, %v3584_v0  ;;  %v4018_v0 = vld [vmem:[#allocation2_spill] sm:$0xff]  ;;  %v4020_v33 = vld [vmem:[#allocation4_spill] sm:$0xff] }
 0x1d2   : > { %v1249_v41 = vpop.f32.mrf.mxu0 }
 0x1d3   : > { %v3858_v15 = vadd.f32 %v1247_v34, %v1051_v43 }
 0x1d6   : > { %v780_v5 = vpop.f32.mrf.mxu2 }
 0x1d7   : > { %v817_v60 = vadd.f32 %v780_v5, %v579_v36  ;;  %v1015_v10 = vpop.f32.mrf.mxu3 }
 0x1d8   : > { %v581_v25 = vpop.f32.mrf.mxu1 }
 0x1d9   : > { %v1052_v14 = vadd.f32 %v1015_v10, %v817_v60  ;;  %v582_v45 = vadd.f32 %v581_v25, %v4018_v0  ;;  %v2929_v25 = vld [vmem:[%s3245_s5 + $0x109] sm:$0xff] }
 0x1da   : > { %v1252_v53 = vpop.f32.mrf.mxu0 }
 0x1db   : > { %1445 = vmatmul.bf16.gmra.mxu1 %v3613_v38  ;;  %1680 = vmatmul.bf16.gmra.mxu2 %v3615_v19  ;;  %v3865_v2 = vadd.f32 %v1249_v41, %v1052_v14  ;;  %v4019_v38 = vld [vmem:[#allocation3_spill] sm:$0xff]  ;;  %v2928_v19 = vld [vmem:[%s3245_s5 + $0xf9] sm:$0xff] }
 0x1dc   : > { %1914 = vmatmul.bf16.gmra.mxu3 %v1797_v28  ;;  %v1798_v42 = vpack.c.bf16 %v2928_v19, %v2927_v26  ;;  %v2930_v28 = vld [vmem:[%s3245_s5 + $0x111] sm:$0xff] }
 0x1dd   : > { %2148 = vmatmul.bf16.gmra.mxu0 %v3641_v12 }
 0x1de   : > { %v783_v39 = vpop.f32.mrf.mxu2 }
 0x1df   : > { %v818_v4 = vadd.f32 %v783_v39, %v582_v45  ;;  %v1018_v11 = vpop.f32.mrf.mxu3  ;;  %v1799_v39 = vpack.c.bf16 %v2930_v28, %v2929_v25 }
 0x1e0   : > { %v583_v20 = vpop.f32.mrf.mxu1 }
 0x1e1   : > { %v1053_v7 = vadd.f32 %v1018_v11, %v818_v4  ;;  %v584_v55 = vadd.f32 %v583_v20, %v4019_v38 }
 0x1e2   : > { %v1254_v54 = vpop.f32.mrf.mxu0 }
 0x1e3   : > { %v3869_v52 = vadd.f32 %v1252_v53, %v1053_v7 }
 0x1e6   : > { %v785_v56 = vpop.f32.mrf.mxu2 }
 0x1e7   : > { %v819_v46 = vadd.f32 %v785_v56, %v584_v55  ;;  %v1020_v31 = vpop.f32.mrf.mxu3  ;;  %v4022_v55 = vld [vmem:[#allocation6_spill] sm:$0xff] }
 0x1e8   : > { %v1411_v34 = vpop.f32.mrf.mxu1 }
 0x1e9   : > { %v1054_v63 = vadd.f32 %v1020_v31, %v819_v46  ;;  %v1491_v43 = vadd.f32 %v1411_v34, %v4020_v33  ;;  %v4023_v33 = vld [vmem:[#allocation7_spill] sm:$0xff] }
 0x1ea   : > { %v2114_v49 = vpop.f32.mrf.mxu0 }
 0x1eb   : > { %1450 = vmatmul.bf16.gmra.mxu1 %v3641_v12  ;;  %1685 = vmatmul.bf16.gmra.mxu2 %v3643_v58  ;;  %v3877_v35 = vadd.f32 %v1254_v54, %v1054_v63  ;;  %v4021_v58 = vld [vmem:[#allocation5_spill] sm:$0xff] }
 0x1ec   : > { %1919 = vmatmul.bf16.gmra.mxu3 %v1798_v42 }
 0x1ed   : > { %2153 = vmatmul.bf16.gmra.mxu0 %v3659_v21 }
 0x1ee   : > { %v1646_v41 = vpop.f32.mrf.mxu2 }
 0x1ef   : > { %v1726_v36 = vadd.f32 %v1646_v41, %v1491_v43  ;;  %v1880_v3 = vpop.f32.mrf.mxu3 }
 0x1f0   : > { %v1413_v57 = vpop.f32.mrf.mxu1 }
 0x1f1   : > { %v1960_v5 = vadd.f32 %v1880_v3, %v1726_v36  ;;  %v1492_v10 = vadd.f32 %v1413_v57, %v4021_v58 }
 0x1f2   : > { %v2116_v60 = vpop.f32.mrf.mxu0 }
 0x1f3   : > { %v2194_v12 = vadd.f32 %v2114_v49, %v1960_v5 }
 0x1f5   : > { %2226 = vst [vmem:[%s3884_s27] sm:$0xff] %v2194_v12  ;;  %v2295_v7 = vmul.f32 %v2194_v12, %v2194_v12 }
 0x1f6   : > { %v1648_v14 = vpop.f32.mrf.mxu2 }
 0x1f7   : > { %v1727_v53 = vadd.f32 %v1648_v14, %v1492_v10  ;;  %v1882_v0 = vpop.f32.mrf.mxu3  ;;  %v4024_v10 = vld [vmem:[#allocation9_spill] sm:$0xff]  ;;  %v4025_v14 = vld [vmem:[#allocation8_spill] sm:$0xff] }
 0x1f8   : > { %v1416_v45 = vpop.f32.mrf.mxu1 }
 0x1f9   : > { %v1961_v4 = vadd.f32 %v1882_v0, %v1727_v53  ;;  %v1493_v26 = vadd.f32 %v1416_v45, %v4022_v55 }
 0x1fa   : > { %v2119_v11 = vpop.f32.mrf.mxu0 }
 0x1fb   : > { %v2195_v20 = vadd.f32 %v2116_v60, %v1961_v4  ;;  %1455 = vmatmul.bf16.gmra.mxu1 %v3659_v21  ;;  %1690 = vmatmul.bf16.gmra.mxu2 %v3661_v18 }
 0x1fc   : > { %1924 = vmatmul.bf16.gmra.mxu3 %v1799_v39 }
 0x1fd   : > { %2158 = vmatmul.bf16.gmra.mxu0 %v3691_v8  ;;  %2227 = vst [vmem:[%s3884_s27 + $0x8] sm:$0xff] %v2195_v20  ;;  %v2258_v54 = vadd.f32 %v2195_v20, %v2194_v12  ;;  %v2296_v38 = vmul.f32 %v2195_v20, %v2195_v20 }
 0x1fe   : > { %v1651_v19 = vpop.f32.mrf.mxu2 }
 0x1ff   : > { %v2327_v56 = vadd.f32 %v2296_v38, %v2295_v7  ;;  %v1728_v46 = vadd.f32 %v1651_v19, %v1493_v26  ;;  %v1885_v31 = vpop.f32.mrf.mxu3  ;;  %v2773_v7 = vld [vmem:[%s3245_s5 + $0x122] sm:$0xff] }
 0x200   : > { %v1418_v34 = vpop.f32.mrf.mxu1  ;;  %v2854_v38 = vld [vmem:[%s3245_s5 + $0x140] sm:$0xff] }
 0x201   : > { %v1962_v42 = vadd.f32 %v1885_v31, %v1728_v46  ;;  %v1494_v43 = vadd.f32 %v1418_v34, %v4023_v33  ;;  %v4026_v19 = vld [vmem:[#allocation10_spill] sm:$0xff] }
 0x202   : > { %v2121_v63 = vpop.f32.mrf.mxu0  ;;  %v2933_v46 = vld [vmem:[%s3245_s5 + $0x139] sm:$0xff]  ;;  %v2934_v31 = vld [vmem:[%s3245_s5 + $0x141] sm:$0xff] }
 0x203   : > { %v2196_v21 = vadd.f32 %v2119_v11, %v1962_v42 }
 0x205   : > { %2228 = vst [vmem:[%s3884_s27 + $0x10] sm:$0xff] %v2196_v21  ;;  %v2259_v18 = vadd.f32 %v2258_v54, %v2196_v21  ;;  %v2297_v49 = vmul.f32 %v2196_v21, %v2196_v21  ;;  %v2774_v54 = vld [vmem:[%s3245_s5 + $0x12a] sm:$0xff] }
 0x206   : > { %v1653_v41 = vpop.f32.mrf.mxu2 }
 0x207   : > { %v2328_v36 = vadd.f32 %v2327_v56, %v2297_v49  ;;  %v1729_v3 = vadd.f32 %v1653_v41, %v1494_v43  ;;  %v1887_v57 = vpop.f32.mrf.mxu3  ;;  %v1801_v43 = vpack.c.bf16 %v2934_v31, %v2933_v46 }
 0x208   : > { %v1421_v5 = vpop.f32.mrf.mxu1 }
 0x209   : > { %v1963_v60 = vadd.f32 %v1887_v57, %v1729_v3  ;;  %v1495_v53 = vadd.f32 %v1421_v5, %v4025_v14 }
 0x20a   : > { %v2124_v12 = vpop.f32.mrf.mxu0 }
 0x20b   : > { %v2197_v58 = vadd.f32 %v2121_v63, %v1963_v60  ;;  %1460 = vmatmul.bf16.gmra.mxu1 %v3691_v8  ;;  %1695 = vmatmul.bf16.gmra.mxu2 %v3693_v22  ;;  %v4027_v60 = vld [vmem:[#allocation11_spill] sm:$0xff] }
 0x20c   : > { %1929 = vmatmul.bf16.gmra.mxu3 %v4024_v10 }
 0x20d   : > { %2163 = vmatmul.bf16.gmra.mxu0 %v3713_v27  ;;  %2229 = vst [vmem:[%s3884_s27 + $0x18] sm:$0xff] %v2197_v58  ;;  %v2260_v25 = vadd.f32 %v2259_v18, %v2197_v58  ;;  %v2298_v28 = vmul.f32 %v2197_v58, %v2197_v58  ;;  %v2853_v27 = vld [vmem:[%s3245_s5 + $0x138] sm:$0xff]  ;;  %v1332_v18 = vpack.c.bf16 %v2774_v54, %v2773_v7 }
 0x20e   : > { %v1656_v0 = vpop.f32.mrf.mxu2  ;;  %v1567_v49 = vpack.c.bf16 %v2854_v38, %v2853_v27  ;;  %v2935_v54 = vld [vmem:[%s3245_s5 + $0x151] sm:$0xff]  ;;  %v2936_v27 = vld [vmem:[%s3245_s5 + $0x159] sm:$0xff] }
 0x20f   : > { %v2329_v45 = vadd.f32 %v2328_v36, %v2298_v28  ;;  %v1730_v8 = vadd.f32 %v1656_v0, %v1495_v53  ;;  %v1890_v39 = vpop.f32.mrf.mxu3 }
 0x210   : > { %v1423_v22 = vpop.f32.mrf.mxu1 }
 0x211   : > { %v1964_v4 = vadd.f32 %v1890_v39, %v1730_v8  ;;  %v1496_v56 = vadd.f32 %v1423_v22, %v4026_v19  ;;  %v2775_v8 = vld [vmem:[%s3245_s5 + $0x13a] sm:$0xff]  ;;  %v2776_v39 = vld [vmem:[%s3245_s5 + $0x142] sm:$0xff] }
 0x212   : > { %v2126_v11 = vpop.f32.mrf.mxu0  ;;  %v2856_v22 = vld [vmem:[%s3245_s5 + $0x158] sm:$0xff] }
 0x213   : > { %v2198_v20 = vadd.f32 %v2124_v12, %v1964_v4 }
 0x215   : > { %2230 = vst [vmem:[%s3884_s27 + $0x20] sm:$0xff] %v2198_v20  ;;  %v2261_v55 = vadd.f32 %v2260_v25, %v2198_v20  ;;  %v2299_v26 = vmul.f32 %v2198_v20, %v2198_v20  ;;  %v4028_v20 = vld [vmem:[#allocation12_spill] sm:$0xff] }
 0x216   : > { %v1658_v34 = vpop.f32.mrf.mxu2 }
 0x217   : > { %v2330_v42 = vadd.f32 %v2329_v45, %v2299_v26  ;;  %v1731_v63 = vadd.f32 %v1658_v34, %v1496_v56  ;;  %v1892_v21 = vpop.f32.mrf.mxu3  ;;  %v1333_v56 = vpack.c.bf16 %v2776_v39, %v2775_v8  ;;  %v1802_v34 = vpack.c.bf16 %v2936_v27, %v2935_v54 }
 0x218   : > { %v1426_v33 = vpop.f32.mrf.mxu1 }
 0x219   : > { %v1965_v41 = vadd.f32 %v1892_v21, %v1731_v63  ;;  %v1497_v12 = vadd.f32 %v1426_v33, %v4027_v60 }
 0x21a   : > { %v2129_v36 = vpop.f32.mrf.mxu0 }
 0x21b   : > { %v2199_v3 = vadd.f32 %v2126_v11, %v1965_v41  ;;  %1465 = vmatmul.bf16.gmra.mxu1 %v1332_v18  ;;  %1700 = vmatmul.bf16.gmra.mxu2 %v1567_v49 }
 0x21c   : > { %1934 = vmatmul.bf16.gmra.mxu3 %v1801_v43 }
 0x21d   : > { %2168 = vmatmul.bf16.gmra.mxu0 %v3741_v6  ;;  %2231 = vst [vmem:[%s3884_s27 + $0x28] sm:$0xff] %v2199_v3  ;;  %v2262_v57 = vadd.f32 %v2261_v55, %v2199_v3  ;;  %v2300_v5 = vmul.f32 %v2199_v3, %v2199_v3  ;;  %v2855_v6 = vld [vmem:[%s3245_s5 + $0x150] sm:$0xff] }
 0x21e   : > { %v1661_v58 = vpop.f32.mrf.mxu2  ;;  %v1568_v46 = vpack.c.bf16 %v2856_v22, %v2855_v6 }
 0x21f   : > { %v2331_v10 = vadd.f32 %v2330_v42, %v2300_v5  ;;  %v1732_v25 = vadd.f32 %v1661_v58, %v1497_v12  ;;  %v1895_v28 = vpop.f32.mrf.mxu3  ;;  %v2777_v58 = vld [vmem:[%s3245_s5 + $0x152] sm:$0xff] }
 0x220   : > { %v1428_v14 = vpop.f32.mrf.mxu1 }
 0x221   : > { %v1966_v53 = vadd.f32 %v1895_v28, %v1732_v25  ;;  %v1498_v7 = vadd.f32 %v1428_v14, %v4028_v20  ;;  %v2858_v25 = vld [vmem:[%s3245_s5 + $0x170] sm:$0xff] }
 0x222   : > { %v2131_v0 = vpop.f32.mrf.mxu0 }
 0x223   : > { %v2200_v45 = vadd.f32 %v2129_v36, %v1966_v53  ;;  %v4029_v53 = vld [vmem:[#allocation13_spill] sm:$0xff] }
 0x225   : > { %2232 = vst [vmem:[%s3884_s27 + $0x30] sm:$0xff] %v2200_v45  ;;  %v2263_v4 = vadd.f32 %v2262_v57, %v2200_v45  ;;  %v2301_v11 = vmul.f32 %v2200_v45, %v2200_v45  ;;  %v2938_v45 = vld [vmem:[%s3245_s5 + $0x171] sm:$0xff] }
 0x226   : > { %v1663_v38 = vpop.f32.mrf.mxu2 }
 0x227   : > { %v2332_v55 = vadd.f32 %v2331_v10, %v2301_v11  ;;  %v1733_v26 = vadd.f32 %v1663_v38, %v1498_v7  ;;  %v1897_v19 = vpop.f32.mrf.mxu3  ;;  %v2778_v10 = vld [vmem:[%s3245_s5 + $0x15a] sm:$0xff] }
 0x228   : > { %v1431_v31 = vpop.f32.mrf.mxu1 }
 0x229   : > { %v1967_v42 = vadd.f32 %v1897_v19, %v1733_v26  ;;  %v1499_v33 = vadd.f32 %v1431_v31, %v3732_v62  ;;  %v2937_v62 = vld [vmem:[%s3245_s5 + $0x169] sm:$0xff] }
 0x22a   : > { %v2134_v63 = vpop.f32.mrf.mxu0  ;;  %v1803_v7 = vpack.c.bf16 %v2938_v45, %v2937_v62 }
 0x22b   : > { %v2201_v21 = vadd.f32 %v2131_v0, %v1967_v42  ;;  %1470 = vmatmul.bf16.gmra.mxu1 %v1333_v56  ;;  %1705 = vmatmul.bf16.gmra.mxu2 %v1568_v46 }
 0x22c   : > { %1939 = vmatmul.bf16.gmra.mxu3 %v1802_v34 }
 0x22d   : > { %2173 = vmatmul.bf16.gmra.mxu0 %v3756_v30  ;;  %2233 = vst [vmem:[%s3884_s27 + $0x38] sm:$0xff] %v2201_v21  ;;  %v2264_v18 = vadd.f32 %v2263_v4, %v2201_v21  ;;  %v2302_v49 = vmul.f32 %v2201_v21, %v2201_v21  ;;  %v2857_v30 = vld [vmem:[%s3245_s5 + $0x168] sm:$0xff]  ;;  %v1334_v4 = vpack.c.bf16 %v2778_v10, %v2777_v58 }
 0x22e   : > { %v1666_v43 = vpop.f32.mrf.mxu2  ;;  %v1569_v11 = vpack.c.bf16 %v2858_v25, %v2857_v30 }
 0x22f   : > { %v2333_v41 = vadd.f32 %v2332_v55, %v2302_v49  ;;  %v1734_v36 = vadd.f32 %v1666_v43, %v1499_v33  ;;  %v1900_v3 = vpop.f32.mrf.mxu3  ;;  %v2780_v49 = vld [vmem:[%s3245_s5 + $0x172] sm:$0xff]  ;;  %v2859_v33 = vld [vmem:[%s3245_s5 + $0x180] sm:$0xff]  ;;  %v2860_v43 = vld [vmem:[%s3245_s5 + $0x188] sm:$0xff] }
 0x230   : > { %v1433_v57 = vpop.f32.mrf.mxu1 }
 0x231   : > { %v1968_v5 = vadd.f32 %v1900_v3, %v1734_v36  ;;  %v1500_v0 = vadd.f32 %v1433_v57, %v4029_v53 }
 0x232   : > { %v2136_v60 = vpop.f32.mrf.mxu0 }
 0x233   : > { %v2202_v12 = vadd.f32 %v2134_v63, %v1968_v5  ;;  %v2940_v5 = vld [vmem:[%s3245_s5 + $0x189] sm:$0xff] }
 0x235   : > { %2234 = vst [vmem:[%s3884_s27 + $0x40] sm:$0xff] %v2202_v12  ;;  %v2265_v28 = vadd.f32 %v2264_v18, %v2202_v12  ;;  %v2303_v14 = vmul.f32 %v2202_v12, %v2202_v12  ;;  %v3020_v12 = vld [vmem:[%s3245_s5 + $0x18a] sm:$0xff] }
 0x236   : > { %v1668_v8 = vpop.f32.mrf.mxu2 }
 0x237   : > { %v2334_v39 = vadd.f32 %v2333_v41, %v2303_v14  ;;  %v1735_v6 = vadd.f32 %v1668_v8, %v1500_v0  ;;  %v1902_v22 = vpop.f32.mrf.mxu3  ;;  %v2939_v41 = vld [vmem:[%s3245_s5 + $0x181] sm:$0xff]  ;;  %v1570_v14 = vpack.c.bf16 %v2860_v43, %v2859_v33 }
 0x238   : > { %v1436_v20 = vpop.f32.mrf.mxu1  ;;  %v1804_v0 = vpack.c.bf16 %v2940_v5, %v2939_v41 }
 0x239   : > { %v1969_v54 = vadd.f32 %v1902_v22, %v1735_v6  ;;  %v1501_v19 = vadd.f32 %v1436_v20, %v3747_v47  ;;  %v4030_v47 = vld [vmem:[#allocation14_spill] sm:$0xff] }
 0x23a   : > { %v2139_v27 = vpop.f32.mrf.mxu0 }
 0x23b   : > { %v2203_v38 = vadd.f32 %v2136_v60, %v1969_v54  ;;  %1475 = vmatmul.bf16.gmra.mxu1 %v1334_v4  ;;  %1710 = vmatmul.bf16.gmra.mxu2 %v1569_v11  ;;  %v3019_v60 = vld [vmem:[%s3245_s5 + $0x182] sm:$0xff] }
 0x23c   : > { %1944 = vmatmul.bf16.gmra.mxu3 %v1803_v7  ;;  %v2038_v62 = vpack.c.bf16 %v3020_v12, %v3019_v60 }
 0x23d   : > { %2178 = vmatmul.bf16.gmra.mxu0 %v3771_v44  ;;  %2235 = vst [vmem:[%s3884_s27 + $0x48] sm:$0xff] %v2203_v38  ;;  %v2266_v55 = vadd.f32 %v2265_v28, %v2203_v38  ;;  %v2304_v26 = vmul.f32 %v2203_v38, %v2203_v38  ;;  %v2779_v44 = vld [vmem:[%s3245_s5 + $0x16a] sm:$0xff] }
 0x23e   : > { %v1671_v56 = vpop.f32.mrf.mxu2  ;;  %v1335_v28 = vpack.c.bf16 %v2780_v49, %v2779_v44 }
 0x23f   : > { %v2335_v46 = vadd.f32 %v2334_v39, %v2304_v26  ;;  %v1736_v31 = vadd.f32 %v1671_v56, %v1501_v19  ;;  %v1905_v34 = vpop.f32.mrf.mxu3  ;;  %v2861_v19 = vld [vmem:[%s3245_s5 + $0x198] sm:$0xff]  ;;  %v2862_v56 = vld [vmem:[%s3245_s5 + $0x1a0] sm:$0xff] }
 0x240   : > { %v1438_v42 = vpop.f32.mrf.mxu1  ;;  %v1571_v43 = vpack.c.bf16 %v2862_v56, %v2861_v19 }
 0x241   : > { %v1970_v63 = vadd.f32 %v1905_v34, %v1736_v31  ;;  %v1502_v57 = vadd.f32 %v1438_v42, %v4030_v47 }
 0x242   : > { %v2141_v21 = vpop.f32.mrf.mxu0 }
 0x243   : > { %v2204_v18 = vadd.f32 %v2139_v27, %v1970_v63  ;;  %v3021_v63 = vld [vmem:[%s3245_s5 + $0x19a] sm:$0xff] }
 0x245   : > { %2236 = vst [vmem:[%s3884_s27 + $0x50] sm:$0xff] %v2204_v18  ;;  %v2267_v36 = vadd.f32 %v2266_v55, %v2204_v18  ;;  %v2305_v3 = vmul.f32 %v2204_v18, %v2204_v18 }
 0x246   : > { %v1673_v58 = vpop.f32.mrf.mxu2 }
 0x247   : > { %v2336_v10 = vadd.f32 %v2335_v46, %v2305_v3  ;;  %v1737_v30 = vadd.f32 %v1673_v58, %v1502_v57  ;;  %v1907_v25 = vpop.f32.mrf.mxu3  ;;  %v2941_v46 = vld [vmem:[%s3245_s5 + $0x199] sm:$0xff] }
 0x248   : > { %v1441_v53 = vpop.f32.mrf.mxu1 }
 0x249   : > { %v1971_v45 = vadd.f32 %v1907_v25, %v1737_v30  ;;  %v1503_v4 = vadd.f32 %v1441_v53, %v3762_v37  ;;  %v2942_v37 = vld [vmem:[%s3245_s5 + $0x1a1] sm:$0xff] }
 0x24a   : > { %v2144_v8 = vpop.f32.mrf.mxu0 }
 0x24b   : > { %v2205_v39 = vadd.f32 %v2141_v21, %v1971_v45  ;;  %1480 = vmatmul.bf16.gmra.mxu1 %v1335_v28  ;;  %1715 = vmatmul.bf16.gmra.mxu2 %v1570_v14  ;;  %v3022_v21 = vld [vmem:[%s3245_s5 + $0x1a2] sm:$0xff]  ;;  %s2462_s5 = sshll.u32 %s3233_s24, 1 }
 0x24c   : > { %1949 = vmatmul.bf16.gmra.mxu3 %v1804_v0  ;;  %v2039_v3 = vpack.c.bf16 %v3022_v21, %v3021_v63  ;;  %s182_s30 = scalar_lea.vmem %s4003_s3, %s2462_s5 }
 0x24d   : > { %2183 = vmatmul.bf16.gmra.mxu0 %v2038_v62  ;;  %2237 = vst [vmem:[%s3884_s27 + $0x58] sm:$0xff] %v2205_v39  ;;  %v2268_v6 = vadd.f32 %v2267_v36, %v2205_v39  ;;  %v2306_v22 = vmul.f32 %v2205_v39, %v2205_v39  ;;  %v1805_v36 = vpack.c.bf16 %v2942_v37, %v2941_v46 }
 0x24e   : > { %v1676_v11 = vpop.f32.mrf.mxu2 }
 0x24f   : > { %v2337_v20 = vadd.f32 %v2336_v10, %v2306_v22  ;;  %v1738_v7 = vadd.f32 %v1676_v11, %v1503_v4  ;;  %v1910_v54 = vpop.f32.mrf.mxu3 }
 0x250   : > { %v1443_v27 = vpop.f32.mrf.mxu1 }
 0x251   : > { %v1972_v38 = vadd.f32 %v1910_v54, %v1738_v7  ;;  %v1504_v42 = vadd.f32 %v1443_v27, %v3774_v51 }
 0x252   : > { %v2146_v55 = vpop.f32.mrf.mxu0 }
 0x253   : > { %v2206_v26 = vadd.f32 %v2144_v8, %v1972_v38 }
 0x255   : > { %2238 = vst [vmem:[%s3884_s27 + $0x60] sm:$0xff] %v2206_v26  ;;  %v2269_v31 = vadd.f32 %v2268_v6, %v2206_v26  ;;  %v2307_v34 = vmul.f32 %v2206_v26, %v2206_v26 }
 0x256   : > { %v1678_v18 = vpop.f32.mrf.mxu2 }
 0x257   : > { %v2338_v44 = vadd.f32 %v2337_v20, %v2307_v34  ;;  %v1739_v49 = vadd.f32 %v1678_v18, %v1504_v42  ;;  %v1912_v33 = vpop.f32.mrf.mxu3 }
 0x258   : > { %v1446_v41 = vpop.f32.mrf.mxu1 }
 0x259   : > { %v1973_v47 = vadd.f32 %v1912_v33, %v1739_v49  ;;  %v1505_v12 = vadd.f32 %v1446_v41, %v3777_v17 }
 0x25a   : > { %v2149_v57 = vpop.f32.mrf.mxu0 }
 0x25b   : > { %v2207_v5 = vadd.f32 %v2146_v55, %v1973_v47  ;;  %1485 = vmatmul.bf16.gmra.mxu1 %v2038_v62  ;;  %1720 = vmatmul.bf16.gmra.mxu2 %v1571_v43 }
 0x25c   : > { %1954 = vmatmul.bf16.gmra.mxu3 %v1805_v36 }
 0x25d   : > { %2188 = vmatmul.bf16.gmra.mxu0 %v2039_v3  ;;  %2239 = vst [vmem:[%s3884_s27 + $0x68] sm:$0xff] %v2207_v5  ;;  %v2270_v51 = vadd.f32 %v2269_v31, %v2207_v5  ;;  %v2308_v60 = vmul.f32 %v2207_v5, %v2207_v5 }
 0x25e   : > { %v1681_v58 = vpop.f32.mrf.mxu2 }
 0x25f   : > { %v2339_v10 = vadd.f32 %v2338_v44, %v2308_v60  ;;  %v1740_v30 = vadd.f32 %v1681_v58, %v1505_v12  ;;  %v1915_v25 = vpop.f32.mrf.mxu3 }
 0x260   : > { %v1448_v28 = vpop.f32.mrf.mxu1 }
 0x261   : > { %v1974_v14 = vadd.f32 %v1915_v25, %v1740_v30  ;;  %v1506_v8 = vadd.f32 %v1448_v28, %v3784_v40 }
 0x262   : > { %v2151_v53 = vpop.f32.mrf.mxu0 }
 0x263   : > { %v2208_v0 = vadd.f32 %v2149_v57, %v1974_v14 }
 0x265   : > { %2240 = vst [vmem:[%s3884_s27 + $0x70] sm:$0xff] %v2208_v0  ;;  %v2271_v62 = vadd.f32 %v2270_v51, %v2208_v0  ;;  %v2309_v45 = vmul.f32 %v2208_v0, %v2208_v0 }
 0x266   : > { %v1683_v39 = vpop.f32.mrf.mxu2 }
 0x267   : > { %v2340_v6 = vadd.f32 %v2339_v10, %v2309_v45  ;;  %v1741_v22 = vadd.f32 %v1683_v39, %v1506_v8  ;;  %v1917_v4 = vpop.f32.mrf.mxu3 }
 0x268   : > { %v1451_v11 = vpop.f32.mrf.mxu1 }
 0x269   : > { %v1975_v17 = vadd.f32 %v1917_v4, %v1741_v22  ;;  %v1507_v38 = vadd.f32 %v1451_v11, %v3788_v32 }
 0x26a   : > { %v2154_v20 = vpop.f32.mrf.mxu0 }
 0x26b   : > { %v2209_v7 = vadd.f32 %v2151_v53, %v1975_v17 }
 0x26d   : > { %2241 = vst [vmem:[%s3884_s27 + $0x78] sm:$0xff] %v2209_v7  ;;  %v2272_v54 = vadd.f32 %v2271_v62, %v2209_v7  ;;  %v2310_v27 = vmul.f32 %v2209_v7, %v2209_v7 }
 0x26e   : > { %v1686_v55 = vpop.f32.mrf.mxu2 }
 0x26f   : > { %v2341_v26 = vadd.f32 %v2340_v6, %v2310_v27  ;;  %v1742_v19 = vadd.f32 %v1686_v55, %v1507_v38  ;;  %v1920_v56 = vpop.f32.mrf.mxu3 }
 0x270   : > { %v1453_v46 = vpop.f32.mrf.mxu1 }
 0x271   : > { %v1976_v40 = vadd.f32 %v1920_v56, %v1742_v19  ;;  %v1508_v63 = vadd.f32 %v1453_v46, %v3795_v23 }
 0x272   : > { %v2156_v31 = vpop.f32.mrf.mxu0 }
 0x273   : > { %v2210_v34 = vadd.f32 %v2154_v20, %v1976_v40 }
 0x275   : > { %2242 = vst [vmem:[%s3884_s27 + $0x80] sm:$0xff] %v2210_v34  ;;  %v2273_v42 = vadd.f32 %v2272_v54, %v2210_v34  ;;  %v2311_v37 = vmul.f32 %v2210_v34, %v2210_v34 }
 0x276   : > { %v1688_v21 = vpop.f32.mrf.mxu2 }
 0x277   : > { %v2342_v18 = vadd.f32 %v2341_v26, %v2311_v37  ;;  %v1743_v44 = vadd.f32 %v1688_v21, %v1508_v63  ;;  %v1922_v49 = vpop.f32.mrf.mxu3 }
 0x278   : > { %v1456_v33 = vpop.f32.mrf.mxu1 }
 0x279   : > { %v1977_v32 = vadd.f32 %v1922_v49, %v1743_v44  ;;  %v1509_v47 = vadd.f32 %v1456_v33, %v3799_v61 }
 0x27a   : > { %v2159_v43 = vpop.f32.mrf.mxu0 }
 0x27b   : > { %v2211_v41 = vadd.f32 %v2156_v31, %v1977_v32 }
 0x27d   : > { %2243 = vst [vmem:[%s3884_s27 + $0x88] sm:$0xff] %v2211_v41  ;;  %v2274_v36 = vadd.f32 %v2273_v42, %v2211_v41  ;;  %v2312_v3 = vmul.f32 %v2211_v41, %v2211_v41 }
 0x27e   : > { %v1691_v57 = vpop.f32.mrf.mxu2 }
 0x27f   : > { %v2343_v5 = vadd.f32 %v2342_v18, %v2312_v3  ;;  %v1744_v51 = vadd.f32 %v1691_v57, %v1509_v47  ;;  %v1925_v60 = vpop.f32.mrf.mxu3 }
 0x280   : > { %v1458_v12 = vpop.f32.mrf.mxu1 }
 0x281   : > { %v1978_v23 = vadd.f32 %v1925_v60, %v1744_v51  ;;  %v1510_v28 = vadd.f32 %v1458_v12, %v3806_v50 }
 0x282   : > { %v2161_v58 = vpop.f32.mrf.mxu0 }
 0x283   : > { %v2212_v10 = vadd.f32 %v2159_v43, %v1978_v23 }
 0x285   : > { %2244 = vst [vmem:[%s3884_s27 + $0x90] sm:$0xff] %v2212_v10  ;;  %v2275_v30 = vadd.f32 %v2274_v36, %v2212_v10  ;;  %v2313_v25 = vmul.f32 %v2212_v10, %v2212_v10 }
 0x286   : > { %v1693_v14 = vpop.f32.mrf.mxu2 }
 0x287   : > { %v2344_v53 = vadd.f32 %v2343_v5, %v2313_v25  ;;  %v1745_v0 = vadd.f32 %v1693_v14, %v1510_v28  ;;  %v1927_v62 = vpop.f32.mrf.mxu3 }
 0x288   : > { %v1461_v45 = vpop.f32.mrf.mxu1 }
 0x289   : > { %v1979_v61 = vadd.f32 %v1927_v62, %v1745_v0  ;;  %v1511_v4 = vadd.f32 %v1461_v45, %v3811_v1 }
 0x28a   : > { %v2164_v8 = vpop.f32.mrf.mxu0 }
 0x28b   : > { %v2213_v39 = vadd.f32 %v2161_v58, %v1979_v61 }
 0x28d   : > { %2245 = vst [vmem:[%s3884_s27 + $0x98] sm:$0xff] %v2213_v39  ;;  %v2276_v6 = vadd.f32 %v2275_v30, %v2213_v39  ;;  %v2314_v22 = vmul.f32 %v2213_v39, %v2213_v39 }
 0x28e   : > { %v1696_v11 = vpop.f32.mrf.mxu2 }
 0x28f   : > { %v2345_v17 = vadd.f32 %v2344_v53, %v2314_v22  ;;  %v1746_v20 = vadd.f32 %v1696_v11, %v1511_v4  ;;  %v1930_v7 = vpop.f32.mrf.mxu3 }
 0x290   : > { %v1463_v54 = vpop.f32.mrf.mxu1 }
 0x291   : > { %v1980_v50 = vadd.f32 %v1930_v7, %v1746_v20  ;;  %v1512_v19 = vadd.f32 %v1463_v54, %v3819_v48 }
 0x292   : > { %v2166_v27 = vpop.f32.mrf.mxu0 }
 0x293   : > { %v2214_v38 = vadd.f32 %v2164_v8, %v1980_v50 }
 0x295   : > { %2246 = vst [vmem:[%s3884_s27 + $0xa0] sm:$0xff] %v2214_v38  ;;  %v2277_v55 = vadd.f32 %v2276_v6, %v2214_v38  ;;  %v2315_v26 = vmul.f32 %v2214_v38, %v2214_v38 }
 0x296   : > { %v1698_v56 = vpop.f32.mrf.mxu2 }
 0x297   : > { %v2346_v46 = vadd.f32 %v2345_v17, %v2315_v26  ;;  %v1747_v40 = vadd.f32 %v1698_v56, %v1512_v19  ;;  %v1932_v31 = vpop.f32.mrf.mxu3 }
 0x298   : > { %v1466_v34 = vpop.f32.mrf.mxu1 }
 0x299   : > { %v1981_v1 = vadd.f32 %v1932_v31, %v1747_v40  ;;  %v1513_v18 = vadd.f32 %v1466_v34, %v3823_v59 }
 0x29a   : > { %v2169_v42 = vpop.f32.mrf.mxu0 }
 0x29b   : > { %v2215_v37 = vadd.f32 %v2166_v27, %v1981_v1 }
 0x29d   : > { %2247 = vst [vmem:[%s3884_s27 + $0xa8] sm:$0xff] %v2215_v37  ;;  %v2278_v63 = vadd.f32 %v2277_v55, %v2215_v37  ;;  %v2316_v21 = vmul.f32 %v2215_v37, %v2215_v37 }
 0x29e   : > { %v1701_v44 = vpop.f32.mrf.mxu2 }
 0x29f   : > { %v2347_v49 = vadd.f32 %v2346_v46, %v2316_v21  ;;  %v1748_v33 = vadd.f32 %v1701_v44, %v1513_v18  ;;  %v1935_v32 = vpop.f32.mrf.mxu3 }
 0x2a0   : > { %v1468_v43 = vpop.f32.mrf.mxu1 }
 0x2a1   : > { %v1982_v48 = vadd.f32 %v1935_v32, %v1748_v33  ;;  %v1514_v57 = vadd.f32 %v1468_v43, %v3830_v13 }
 0x2a2   : > { %v2171_v41 = vpop.f32.mrf.mxu0 }
 0x2a3   : > { %v2216_v36 = vadd.f32 %v2169_v42, %v1982_v48 }
 0x2a5   : > { %2248 = vst [vmem:[%s3884_s27 + $0xb0] sm:$0xff] %v2216_v36  ;;  %v2279_v3 = vadd.f32 %v2278_v63, %v2216_v36  ;;  %v2317_v47 = vmul.f32 %v2216_v36, %v2216_v36 }
 0x2a6   : > { %v1703_v5 = vpop.f32.mrf.mxu2 }
 0x2a7   : > { %v2348_v51 = vadd.f32 %v2347_v49, %v2317_v47  ;;  %v1749_v60 = vadd.f32 %v1703_v5, %v1514_v57  ;;  %v1937_v12 = vpop.f32.mrf.mxu3 }
 0x2a8   : > { %v1471_v23 = vpop.f32.mrf.mxu1 }
 0x2a9   : > { %v1983_v59 = vadd.f32 %v1937_v12, %v1749_v60  ;;  %v1515_v28 = vadd.f32 %v1471_v23, %v3835_v29 }
 0x2aa   : > { %v2174_v58 = vpop.f32.mrf.mxu0 }
 0x2ab   : > { %v2217_v10 = vadd.f32 %v2171_v41, %v1983_v59 }
 0x2ad   : > { %2249 = vst [vmem:[%s3884_s27 + $0xb8] sm:$0xff] %v2217_v10  ;;  %v2280_v30 = vadd.f32 %v2279_v3, %v2217_v10  ;;  %v2318_v25 = vmul.f32 %v2217_v10, %v2217_v10 }
 0x2ae   : > { %v1706_v14 = vpop.f32.mrf.mxu2 }
 0x2af   : > { %v2349_v53 = vadd.f32 %v2348_v51, %v2318_v25  ;;  %v1750_v0 = vadd.f32 %v1706_v14, %v1515_v28  ;;  %v1940_v62 = vpop.f32.mrf.mxu3 }
 0x2b0   : > { %v1473_v45 = vpop.f32.mrf.mxu1 }
 0x2b1   : > { %v1984_v13 = vadd.f32 %v1940_v62, %v1750_v0  ;;  %v1516_v22 = vadd.f32 %v1473_v45, %v3843_v9 }
 0x2b2   : > { %v2176_v61 = vpop.f32.mrf.mxu0 }
 0x2b3   : > { %v2218_v8 = vadd.f32 %v2174_v58, %v1984_v13 }
 0x2b5   : > { %2250 = vst [vmem:[%s3884_s27 + $0xc0] sm:$0xff] %v2218_v8  ;;  %v2281_v39 = vadd.f32 %v2280_v30, %v2218_v8  ;;  %v2319_v6 = vmul.f32 %v2218_v8, %v2218_v8 }
 0x2b6   : > { %v1708_v4 = vpop.f32.mrf.mxu2 }
 0x2b7   : > { %v2350_v11 = vadd.f32 %v2349_v53, %v2319_v6  ;;  %v1751_v17 = vadd.f32 %v1708_v4, %v1516_v22  ;;  %v1942_v20 = vpop.f32.mrf.mxu3 }
 0x2b8   : > { %v1476_v7 = vpop.f32.mrf.mxu1 }
 0x2b9   : > { %v1985_v29 = vadd.f32 %v1942_v20, %v1751_v17  ;;  %v1517_v55 = vadd.f32 %v1476_v7, %v3847_v24 }
 0x2ba   : > { %v2179_v54 = vpop.f32.mrf.mxu0 }
 0x2bb   : > { %v2219_v50 = vadd.f32 %v2176_v61, %v1985_v29 }
 0x2bd   : > { %2251 = vst [vmem:[%s3884_s27 + $0xc8] sm:$0xff] %v2219_v50  ;;  %v2282_v27 = vadd.f32 %v2281_v39, %v2219_v50  ;;  %v2320_v38 = vmul.f32 %v2219_v50, %v2219_v50 }
 0x2be   : > { %v1711_v26 = vpop.f32.mrf.mxu2 }
 0x2bf   : > { %v2351_v19 = vadd.f32 %v2350_v11, %v2320_v38  ;;  %v1752_v56 = vadd.f32 %v1711_v26, %v1517_v55  ;;  %v1945_v46 = vpop.f32.mrf.mxu3 }
 0x2c0   : > { %v1478_v40 = vpop.f32.mrf.mxu1 }
 0x2c1   : > { %v1986_v9 = vadd.f32 %v1945_v46, %v1752_v56  ;;  %v1518_v37 = vadd.f32 %v1478_v40, %v3854_v16 }
 0x2c2   : > { %v2181_v31 = vpop.f32.mrf.mxu0 }
 0x2c3   : > { %v2220_v34 = vadd.f32 %v2179_v54, %v1986_v9 }
 0x2c5   : > { %2252 = vst [vmem:[%s3884_s27 + $0xd0] sm:$0xff] %v2220_v34  ;;  %v2283_v1 = vadd.f32 %v2282_v27, %v2220_v34  ;;  %v2321_v42 = vmul.f32 %v2220_v34, %v2220_v34 }
 0x2c6   : > { %v1713_v63 = vpop.f32.mrf.mxu2 }
 0x2c7   : > { %v2352_v21 = vadd.f32 %v2351_v19, %v2321_v42  ;;  %v1753_v18 = vadd.f32 %v1713_v63, %v1518_v37  ;;  %v1947_v44 = vpop.f32.mrf.mxu3 }
 0x2c8   : > { %v1481_v24 = vpop.f32.mrf.mxu1 }
 0x2c9   : > { %v1987_v49 = vadd.f32 %v1947_v44, %v1753_v18  ;;  %v1519_v41 = vadd.f32 %v1481_v24, %v3858_v15 }
 0x2ca   : > { %v2184_v32 = vpop.f32.mrf.mxu0 }
 0x2cb   : > { %v2221_v33 = vadd.f32 %v2181_v31, %v1987_v49 }
 0x2cd   : > { %2253 = vst [vmem:[%s3884_s27 + $0xd8] sm:$0xff] %v2221_v33  ;;  %v2284_v43 = vadd.f32 %v2283_v1, %v2221_v33  ;;  %v2322_v48 = vmul.f32 %v2221_v33, %v2221_v33 }
 0x2ce   : > { %v1716_v36 = vpop.f32.mrf.mxu2 }
 0x2cf   : > { %v2353_v3 = vadd.f32 %v2352_v21, %v2322_v48  ;;  %v1754_v47 = vadd.f32 %v1716_v36, %v1519_v41  ;;  %v1950_v57 = vpop.f32.mrf.mxu3 }
 0x2d0   : > { %v1483_v16 = vpop.f32.mrf.mxu1 }
 0x2d1   : > { %v1988_v5 = vadd.f32 %v1950_v57, %v1754_v47  ;;  %v1520_v23 = vadd.f32 %v1483_v16, %v3865_v2 }
 0x2d2   : > { %v2186_v59 = vpop.f32.mrf.mxu0 }
 0x2d3   : > { %v2222_v51 = vadd.f32 %v2184_v32, %v1988_v5 }
 0x2d5   : > { %2254 = vst [vmem:[%s3884_s27 + $0xe0] sm:$0xff] %v2222_v51  ;;  %v2285_v60 = vadd.f32 %v2284_v43, %v2222_v51  ;;  %v2323_v12 = vmul.f32 %v2222_v51, %v2222_v51 }
 0x2d6   : > { %v1718_v58 = vpop.f32.mrf.mxu2 }
 0x2d7   : > { %v2354_v10 = vadd.f32 %v2353_v3, %v2323_v12  ;;  %v1755_v30 = vadd.f32 %v1718_v58, %v1520_v23  ;;  %v1952_v25 = vpop.f32.mrf.mxu3 }
 0x2d8   : > { %v1486_v15 = vpop.f32.mrf.mxu1 }
 0x2d9   : > { %v1989_v28 = vadd.f32 %v1952_v25, %v1755_v30  ;;  %v1521_v62 = vadd.f32 %v1486_v15, %v3869_v52 }
 0x2da   : > { %v2189_v2 = vpop.f32.mrf.mxu0 }
 0x2db   : > { %v2223_v14 = vadd.f32 %v2186_v59, %v1989_v28 }
 0x2dd   : > { %2255 = vst [vmem:[%s3884_s27 + $0xe8] sm:$0xff] %v2223_v14  ;;  %v2286_v53 = vadd.f32 %v2285_v60, %v2223_v14  ;;  %v2324_v0 = vmul.f32 %v2223_v14, %v2223_v14 }
 0x2de   : > { %v1721_v45 = vpop.f32.mrf.mxu2 }
 0x2df   : > { %v2355_v13 = vadd.f32 %v2354_v10, %v2324_v0  ;;  %v1756_v61 = vadd.f32 %v1721_v45, %v1521_v62  ;;  %v1955_v8 = vpop.f32.mrf.mxu3 }
 0x2e0   : > { %v1488_v6 = vpop.f32.mrf.mxu1 }
 0x2e1   : > { %v1990_v39 = vadd.f32 %v1955_v8, %v1756_v61  ;;  %v1522_v17 = vadd.f32 %v1488_v6, %v3877_v35 }
 0x2e2   : > { %v2191_v52 = vpop.f32.mrf.mxu0 }
 0x2e3   : > { %v2224_v22 = vadd.f32 %v2189_v2, %v1990_v39 }
 0x2e5   : > { %2256 = vst [vmem:[%s3884_s27 + $0xf0] sm:$0xff] %v2224_v22  ;;  %v2287_v4 = vadd.f32 %v2286_v53, %v2224_v22  ;;  %v2325_v11 = vmul.f32 %v2224_v22, %v2224_v22 }
 0x2e6   : > { %v1723_v20 = vpop.f32.mrf.mxu2 }
 0x2e7   : > { %v2356_v7 = vadd.f32 %v2355_v13, %v2325_v11  ;;  %v1757_v29 = vadd.f32 %v1723_v20, %v1522_v17  ;;  %v1957_v54 = vpop.f32.mrf.mxu3 }
 0x2e9   : > { %v1991_v50 = vadd.f32 %v1957_v54, %v1757_v29 }
 0x2eb   : > { %v2225_v27 = vadd.f32 %v2191_v52, %v1991_v50 }
 0x2ed   : > { %2257 = vst [vmem:[%s3884_s27 + $0xf8] sm:$0xff] %v2225_v27  ;;  %v2288_v38 = vadd.f32 %v2287_v4, %v2225_v27  ;;  %v2326_v55 = vmul.f32 %v2225_v27, %v2225_v27 }
 0x2ef   : > { %v2289_v26 = vrot.slane %v2288_v38, 4  ;;  %v2357_v19 = vadd.f32 %v2356_v7, %v2326_v55 }
 0x2f1   : > { %v2290_v56 = vadd.f32 %v2289_v26, %v2288_v38  ;;  %v2358_v46 = vrot.slane %v2357_v19, 4 }
 0x2f3   : > { %v2291_v40 = vrot.slane %v2290_v56, 2  ;;  %v2359_v9 = vadd.f32 %v2358_v46, %v2357_v19 }
 0x2f5   : > { %v2292_v31 = vadd.f32 %v2291_v40, %v2290_v56  ;;  %v2360_v34 = vrot.slane %v2359_v9, 2 }
 0x2f7   : > { %v2293_v35 = vrot.slane %v2292_v31, 1  ;;  %v2361_v1 = vadd.f32 %v2360_v34, %v2359_v9 }
 0x2f9   : > { %v2362_v42 = vrot.slane %v2361_v1, 1  ;;  %v2294_v37 = vadd.f32 %v2293_v35, %v2292_v31 }
 0x2fb   : > { %v2363_v63 = vadd.f32 %v2362_v42, %v2361_v1 }
 0x2fd   : > { %v2365_v21 = vsel %vm2364_vm0, %v2294_v37, %v2363_v63 }
 0x2fe   : > { %2366 = vst [vmem:[%s182_s30] sm:$0x3] %v2365_v21 }
 0x2ff PF: > { %s14_s12 = sadd.s32 1, %s3184_s12  }
 0x300   : > { %p11_p5 = scmp.ge.s32.totalorder %s14_s12, 4  }
 0x302   :  { %13 = sbr.rel (!%p11_p5) target bundleno = 1 (0x1), region = 80 }

// kernel: residual_block_forward.4
= control target key start
LH: loop header
LB: loop body
LE: loop exit
PB: predicated region body
PF: predicated region fallthrough
CT: control target
= control target key end

     0   :  { %s3328_s18 = smov 0   ;;  %s4152_s0 = inlined_call_operand.vmem [shape: f32[512,128], index: 0, kind: input, shape index: {}]   ;;  %s4153_s1 = inlined_call_operand.vmem [shape: f32[1,128], index: 1, kind: input, shape index: {}]   ;;  %s4154_s2 = inlined_call_operand.vmem [shape: f32[1,128], index: 2, kind: input, shape index: {}]   ;;  %s4155_s3 = inlined_call_operand.vmem [shape: bf16[9,128,128], index: 3, kind: input, shape index: {}]   ;;  %s4156_s4 = inlined_call_operand.vmem [shape: f32[512,128], index: 4, kind: output, shape index: {0}]   ;;  %s4157_s5 = inlined_call_operand.vmem [shape: f32[2,2,128], index: 5, kind: output, shape index: {1}]  }
   0x1 LB: > { %s3334_s19 = sadd.s32 4294967295, %s3294_s18   ;;  %p2754_p0 = scmp.ge.s32.totalorder %s3294_s18, 1  ;;  %s3294_s18 = sphi %s3328_s18, %s16_s18  }
   0x2   : > { %p191_p1 = scmp.lt.s32.totalorder %s3294_s18, 3 }
   0x4   : > { %p192_p2 = pnand %p2754_p0, %p191_p1 }
   0x6   : > { %195 = sbr.rel (%p192_p2) target bundleno = 767 (0x2ff), region = 36 }
   0xb   : > { %v3193_v0 = vld [vmem:[%s4155_s3 + $0x78] sm:$0xff]  ;;  %s2755_s22 = sshll.u32 %s3334_s19, 5  ;;  %v3296_v1 = vmov 0.0   ;;  %v3192_v2 = vld [vmem:[%s4155_s3 + $0x70] sm:$0xff]  ;;  %v3353_v3 = vld [vmem:[%s4153_s1] ss:$0 sm:$0xff] }
   0xc   : > { %p224_p3 = scmp.lt.s32.totalorder %s2755_s22, 63  ;;  %375 = vst [vmem:[#allocation2] sm:$0xff] %v3296_v1  ;;  %3250 = vmatpush.bf16.msra.mxu1 %v3193_v0  ;;  %3251 = vmatpush.bf16.msra.mxu2 %v3193_v0  ;;  %v3191_v4 = vld [vmem:[%s4155_s3 + $0x68] sm:$0xff]  ;;  %v3371_v5 = vld [vmem:[%s4154_s2] ss:$0 sm:$0xff]  ;;  %v3189_v15 = vld [vmem:[%s4155_s3 + $0x58] sm:$0xff] }
   0xd   : > { %376 = vst [vmem:[#allocation2 + $0x8] sm:$0xff] %v3296_v1  ;;  %3252 = vmatpush.bf16.msra.mxu3 %v3193_v0  ;;  %657 = vmatpush.bf16.msra.mxu0 %v3193_v0  ;;  %v3190_v10 = vld [vmem:[%s4155_s3 + $0x60] sm:$0xff]  ;;  %v3188_v22 = vld [vmem:[%s4155_s3 + $0x50] sm:$0xff]  ;;  %v3187_v27 = vld [vmem:[%s4155_s3 + $0x48] sm:$0xff]  ;;  %v3297_v57 = vmov 0.0|0.0   ;;  %p235_p4 = scmp.lt.s32.totalorder %s3334_s19, 1 }
   0xe   : > { %s4184_s22 = smov (!%p224_p3, %s2755_s22), 63  ;;  %377 = vst [vmem:[#allocation2 + $0x10] sm:$0xff] %v3296_v1  ;;  %v3186_v32 = vld [vmem:[%s4155_s3 + $0x40] sm:$0xff]  ;;  %v3201_v35 = vld [vmem:[%s4155_s3 + $0xb8] sm:$0xff]  ;;  %v3200_v50 = vld [vmem:[%s4155_s3 + $0xb0] sm:$0xff]  ;;  %vm2660_vm0 = vcmask 1040384  }
   0xf   : > { %378 = vst [vmem:[#allocation2 + $0x18] sm:$0xff] %v3296_v1  ;;  %s2756_s27 = sshll.u32 %s4184_s22, 3  ;;  %v3209_v36 = vld [vmem:[%s4155_s3 + $0xf8] sm:$0xff]  ;;  %v3208_v51 = vld [vmem:[%s4155_s3 + $0xf0] sm:$0xff]  ;;  %v3199_v63 = vld [vmem:[%s4155_s3 + $0xa8] sm:$0xff]  ;;  %s4186_s19 = smov (!%p235_p4, %s3334_s19), 1 }
  0x10   : > { %379 = vst [vmem:[#allocation2 + $0x20] sm:$0xff] %v3296_v1  ;;  %3253 = vmatpush.bf16.msra.mxu1 %v3192_v2  ;;  %3254 = vmatpush.bf16.msra.mxu2 %v3192_v2  ;;  %s3366_s7 = scalar_lea.vmem %s4152_s0, %s2756_s27  ;;  %v3185_v47 = vld [vmem:[%s4155_s3 + $0x38] sm:$0xff]  ;;  %v3184_v61 = vld [vmem:[%s4155_s3 + $0x30] sm:$0xff]  ;;  %v3207_v0 = vld [vmem:[%s4155_s3 + $0xe8] sm:$0xff]  ;;  %s4071_s13 = scalar_lea.vmem %s4156_s4, %s2756_s27 }
  0x11   : > { %382 = vst [vmem:[#allocation2 + $0x38] sm:$0xff] %v3296_v1  ;;  %3255 = vmatpush.bf16.msra.mxu3 %v3192_v2  ;;  %658 = vmatpush.bf16.msra.mxu0 %v3192_v2  ;;  %v245_v6 = vld [vmem:[%s3366_s7 + $0x30] sm:$0xff]  ;;  %v246_v7 = vld [vmem:[%s3366_s7 + $0x38] sm:$0xff]  ;;  %v247_v37 = vld [vmem:[%s3366_s7 + $0x40] sm:$0xff]  ;;  %s2759_s22 = sshll.u32 %s4186_s19, 1 }
  0x12   : > { %383 = vst [vmem:[#allocation2 + $0x40] sm:$0xff] %v3296_v1  ;;  %v281_v8 = vmul.f32 %v3353_v3, %v245_v6  ;;  %v282_v9 = vmul.f32 %v3353_v3, %v246_v7  ;;  %v253_v16 = vld [vmem:[%s3366_s7 + $0x70] sm:$0xff]  ;;  %v254_v17 = vld [vmem:[%s3366_s7 + $0x78] sm:$0xff]  ;;  %v248_v40 = vld [vmem:[%s3366_s7 + $0x48] sm:$0xff]  ;;  %v283_v52 = vmul.f32 %v3353_v3, %v247_v37  ;;  %s238_s15 = scalar_lea.vmem %s4157_s5, %s2759_s22 }
  0x13   : > { %386 = vst [vmem:[#allocation2 + $0x58] sm:$0xff] %v3296_v1  ;;  %v261_v18 = vld [vmem:[%s3366_s7 + $0xb0] sm:$0xff]  ;;  %v262_v19 = vld [vmem:[%s3366_s7 + $0xb8] sm:$0xff]  ;;  %v289_v20 = vmul.f32 %v3353_v3, %v253_v16  ;;  %v290_v21 = vmul.f32 %v3353_v3, %v254_v17  ;;  %v255_v41 = vld [vmem:[%s3366_s7 + $0x80] sm:$0xff]  ;;  %v284_v53 = vmul.f32 %v3353_v3, %v248_v40 }
  0x14   : > { %387 = vst [vmem:[#allocation2 + $0x60] sm:$0xff] %v3296_v1  ;;  %3256 = vmatpush.bf16.msra.mxu1 %v3191_v4  ;;  %3257 = vmatpush.bf16.msra.mxu2 %v3191_v4  ;;  %v3385_v11 = vadd.f32 %v3371_v5, %v281_v8  ;;  %v3388_v12 = vadd.f32 %v3371_v5, %v282_v9  ;;  %v256_v42 = vld [vmem:[%s3366_s7 + $0x88] sm:$0xff]  ;;  %v263_v44 = vld [vmem:[%s3366_s7 + $0xc0] sm:$0xff]  ;;  %v3217_v48 = vld [vmem:[%s4155_s3 + $0x138] sm:$0xff] }
  0x15   : > { %390 = vst [vmem:[#allocation2 + $0x78] sm:$0xff] %v3296_v1  ;;  %3258 = vmatpush.bf16.msra.mxu3 %v3191_v4  ;;  %659 = vmatpush.bf16.msra.mxu0 %v3191_v4  ;;  %v297_v23 = vmul.f32 %v3353_v3, %v261_v18  ;;  %v298_v24 = vmul.f32 %v3353_v3, %v262_v19  ;;  %v264_v45 = vld [vmem:[%s3366_s7 + $0xc8] sm:$0xff]  ;;  %v239_v46 = vld [vmem:[%s3366_s7] sm:$0xff]  ;;  %v3216_v62 = vld [vmem:[%s4155_s3 + $0x130] sm:$0xff] }
  0x16   : > { %391 = vst [vmem:[#allocation2 + $0x80] sm:$0xff] %v3296_v1  ;;  %v349_v13 = vmax.f32 %v3385_v11, 0.0  ;;  %v350_v14 = vmax.f32 %v3388_v12, 0.0  ;;  %v3417_v25 = vadd.f32 %v3371_v5, %v289_v20  ;;  %v3420_v26 = vadd.f32 %v3371_v5, %v290_v21  ;;  %v240_v49 = vld [vmem:[%s3366_s7 + $0x8] sm:$0xff]  ;;  %v258_v37 = vld [vmem:[%s3366_s7 + $0x98] sm:$0xff] }
  0x17   : > { %394 = vst [vmem:[#allocation2 + $0x98] sm:$0xff] %v3296_v1  ;;  %v3427_v28 = vadd.f32 %v3371_v5, %v297_v23  ;;  %v3430_v29 = vadd.f32 %v3371_v5, %v298_v24  ;;  %v291_v54 = vmul.f32 %v3353_v3, %v255_v41  ;;  %v292_v55 = vmul.f32 %v3353_v3, %v256_v42  ;;  %v3183_v12 = vld [vmem:[%s4155_s3 + $0x28] sm:$0xff]  ;;  %v249_v24 = vld [vmem:[%s3366_s7 + $0x50] sm:$0xff]  ;;  %v266_v41 = vld [vmem:[%s3366_s7 + $0xd8] sm:$0xff] }
  0x18   : > { %395 = vst [vmem:[#allocation2 + $0xa0] sm:$0xff] %v3296_v1  ;;  %3259 = vmatpush.bf16.msra.mxu1 %v3190_v10  ;;  %3260 = vmatpush.bf16.msra.mxu2 %v3190_v10  ;;  %v357_v30 = vmax.f32 %v3417_v25, 0.0  ;;  %v358_v31 = vmax.f32 %v3420_v26, 0.0  ;;  %v3452_v38 = vpack.c.bf16 %v350_v14, %v349_v13  ;;  %v299_v56 = vmul.f32 %v3353_v3, %v263_v44  ;;  %v257_v25 = vld [vmem:[%s3366_s7 + $0x90] sm:$0xff]  ;;  %v242_v44 = vld [vmem:[%s3366_s7 + $0x18] sm:$0xff] }
  0x19   : > { %454 = vst [vmem:[#allocation2 + $0x88] sm:$0xff] %v349_v13  ;;  %3261 = vmatpush.bf16.msra.mxu3 %v3190_v10  ;;  %660 = vmatpush.bf16.msra.mxu0 %v3190_v10  ;;  %v365_v33 = vmax.f32 %v3427_v28, 0.0  ;;  %v366_v34 = vmax.f32 %v3430_v29, 0.0  ;;  %v300_v58 = vmul.f32 %v3353_v3, %v264_v45  ;;  %v275_v59 = vmul.f32 %v3353_v3, %v239_v46  ;;  %v3215_v13 = vld [vmem:[%s4155_s3 + $0x128] sm:$0xff]  ;;  %v241_v42 = vld [vmem:[%s3366_s7 + $0x10] sm:$0xff]  ;;  %v3181_v29 = vld [vmem:[%s4155_s3 + $0x18] sm:$0xff] }
  0x1a   : > { %455 = vst [vmem:[#allocation2 + $0x90] sm:$0xff] %v350_v14  ;;  %v584_v39 = vpack.c.bf16 %v358_v31, %v357_v30  ;;  %v276_v60 = vmul.f32 %v3353_v3, %v240_v49  ;;  %v319_v2 = vadd.f32 %v3371_v5, %v283_v52  ;;  %v320_v4 = vadd.f32 %v3371_v5, %v284_v53  ;;  %v3198_v14 = vld [vmem:[%s4155_s3 + $0xa0] sm:$0xff]  ;;  %v3196_v46 = vld [vmem:[%s4155_s3 + $0x90] sm:$0xff] }
  0x1b   : > { %398 = vst [vmem:[#allocation2 + $0xb8] sm:$0xff] %v3296_v1  ;;  %v588_v43 = vpack.c.bf16 %v366_v34, %v365_v33  ;;  %v3514_v6 = vadd.f32 %v3371_v5, %v291_v54  ;;  %v3517_v7 = vadd.f32 %v3371_v5, %v292_v55  ;;  %v3521_v8 = vadd.f32 %v3371_v5, %v299_v56  ;;  %v251_v54 = vld [vmem:[%s3366_s7 + $0x60] sm:$0xff]  ;;  %v3180_v56 = vld [vmem:[%s4155_s3 + $0x10] sm:$0xff] }
  0x1c   : > { %399 = vst [vmem:[#allocation2 + $0xc0] sm:$0xff] %v3296_v1  ;;  %3262 = vmatpush.bf16.msra.mxu1 %v3189_v15  ;;  %3263 = vmatpush.bf16.msra.mxu2 %v3189_v15  ;;  %v3524_v9 = vadd.f32 %v3371_v5, %v300_v58  ;;  %v3527_v10 = vadd.f32 %v3371_v5, %v275_v59  ;;  %v351_v16 = vmax.f32 %v319_v2, 0.0  ;;  %v352_v17 = vmax.f32 %v320_v4, 0.0  ;;  %v3212_v58 = vld [vmem:[%s4155_s3 + $0x110] sm:$0xff] }
  0x1d   : > { %402 = vst [vmem:[#allocation2 + $0xd8] sm:$0xff] %v3296_v1  ;;  %3264 = vmatpush.bf16.msra.mxu3 %v3189_v15  ;;  %661 = vmatpush.bf16.msra.mxu0 %v3189_v15  ;;  %v3530_v11 = vadd.f32 %v3371_v5, %v276_v60  ;;  %v3206_v15 = vld [vmem:[%s4155_s3 + $0xe0] sm:$0xff]  ;;  %v359_v18 = vmax.f32 %v3514_v6, 0.0  ;;  %v360_v19 = vmax.f32 %v3517_v7, 0.0  ;;  %v367_v20 = vmax.f32 %v3521_v8, 0.0  ;;  %v260_v6 = vld [vmem:[%s3366_s7 + $0xa8] sm:$0xff] }
  0x1e   : > { %403 = vst [vmem:[#allocation2 + $0xe0] sm:$0xff] %v3296_v1  ;;  %v368_v21 = vmax.f32 %v3524_v9, 0.0  ;;  %v3575_v26 = vpack.c.bf16 %v352_v17, %v351_v16  ;;  %v294_v45 = vmul.f32 %v3353_v3, %v258_v37  ;;  %v277_v52 = vmul.f32 %v3353_v3, %v241_v42  ;;  %v259_v60 = vld [vmem:[%s3366_s7 + $0xa0] sm:$0xff] }
  0x1f   : > { %406 = vst [vmem:[#allocation2 + $0xf8] sm:$0xff] %v3296_v1  ;;  %v344_v23 = vmax.f32 %v3530_v11, 0.0  ;;  %v278_v53 = vmul.f32 %v3353_v3, %v242_v44  ;;  %v287_v4 = vmul.f32 %v3353_v3, %v251_v54  ;;  %v3179_v11 = vld [vmem:[%s4155_s3 + $0x8] sm:$0xff]  ;;  %v3241_v54 = vld [vmem:[%s4155_s3 + $0x1f8] sm:$0xff] }
  0x20   : > { %407 = vst [vmem:[#allocation2 + $0x100] sm:$0xff] %v3296_v1  ;;  %3265 = vmatpush.bf16.msra.mxu1 %v3188_v22  ;;  %3266 = vmatpush.bf16.msra.mxu2 %v3188_v22  ;;  %v330_v59 = vadd.f32 %v3371_v5, %v294_v45  ;;  %v313_v8 = vadd.f32 %v3371_v5, %v277_v52 }
  0x21   : > { %410 = vst [vmem:[#allocation2 + $0x118] sm:$0xff] %v3296_v1  ;;  %3267 = vmatpush.bf16.msra.mxu3 %v3188_v22  ;;  %662 = vmatpush.bf16.msra.mxu0 %v3188_v22  ;;  %v343_v22 = vmax.f32 %v3527_v10, 0.0  ;;  %v314_v9 = vadd.f32 %v3371_v5, %v278_v53  ;;  %v3233_v53 = vld [vmem:[%s4155_s3 + $0x1b8] sm:$0xff] }
  0x22   : > { %411 = vst [vmem:[#allocation2 + $0x120] sm:$0xff] %v3296_v1 }
  0x23   : > { %414 = vst [vmem:[#allocation2 + $0x138] sm:$0xff] %v3296_v1  ;;  %v3587_v40 = vpack.c.bf16 %v344_v23, %v343_v22 }
  0x24   : > { %415 = vst [vmem:[#allocation2 + $0x140] sm:$0xff] %v3296_v1  ;;  %3268 = vmatpush.bf16.msra.mxu1 %v3187_v27  ;;  %3269 = vmatpush.bf16.msra.mxu2 %v3187_v27 }
  0x25   : > { %418 = vst [vmem:[#allocation2 + $0x158] sm:$0xff] %v3296_v1  ;;  %3270 = vmatpush.bf16.msra.mxu3 %v3187_v27  ;;  %663 = vmatpush.bf16.msra.mxu0 %v3187_v27  ;;  %v3182_v27 = vld [vmem:[%s4155_s3 + $0x20] sm:$0xff] }
  0x26   : > { %419 = vst [vmem:[#allocation2 + $0x160] sm:$0xff] %v3296_v1 }
  0x27   : > { %422 = vst [vmem:[#allocation2 + $0x178] sm:$0xff] %v3296_v1 }
  0x28   : > { %423 = vst [vmem:[#allocation2 + $0x180] sm:$0xff] %v3296_v1  ;;  %3271 = vmatpush.bf16.msra.mxu1 %v3186_v32  ;;  %3272 = vmatpush.bf16.msra.mxu2 %v3186_v32 }
  0x29   : > { %426 = vst [vmem:[#allocation2 + $0x198] sm:$0xff] %v3296_v1  ;;  %3273 = vmatpush.bf16.msra.mxu3 %v3186_v32  ;;  %664 = vmatpush.bf16.msra.mxu0 %v3186_v32  ;;  %v3214_v32 = vld [vmem:[%s4155_s3 + $0x120] sm:$0xff] }
  0x2a   : > { %427 = vst [vmem:[#allocation2 + $0x1a0] sm:$0xff] %v3296_v1 }
  0x2b   : > { %430 = vst [vmem:[#allocation2 + $0x1b8] sm:$0xff] %v3296_v1  ;;  %685 = vmatmul.bf16.vlgmr.msra.gmra.mxu1 %v3452_v38  ;;  %705 = vmatmul.bf16.vlgmr.msra.gmra.mxu2 %v584_v39  ;;  %v589_v39 = vpack.c.bf16 %v368_v21, %v367_v20 }
  0x2c   : > { %996 = vmatpush.bf16.msrb.mxu2 %v3201_v35  ;;  %431 = vst [vmem:[#allocation2 + $0x1c0] sm:$0xff] %v3296_v1  ;;  %725 = vmatmul.bf16.vlgmr.msra.gmra.mxu3 %v588_v43  ;;  %v3205_v35 = vld [vmem:[%s4155_s3 + $0xd8] sm:$0xff]  ;;  %v293_v43 = vmul.f32 %v3353_v3, %v257_v25  ;;  %v346_v25 = vmax.f32 %v314_v9, 0.0 }
  0x2d   : > { %1230 = vmatpush.bf16.msrb.mxu3 %v3209_v36  ;;  %434 = vst [vmem:[#allocation2 + $0x1d8] sm:$0xff] %v3296_v1  ;;  %665 = vmatmul.bf16.vlgmr.msra.gmra.mxu0 %v3297_v57  ;;  %v285_v36 = vmul.f32 %v3353_v3, %v249_v24  ;;  %v252_v57 = vld [vmem:[%s3366_s7 + $0x68] sm:$0xff]  ;;  %v323_v24 = vadd.f32 %v3371_v5, %v287_v4 }
  0x2e   : > { %435 = vst [vmem:[#allocation2 + $0x1e0] sm:$0xff] %v3296_v1  ;;  %794 = vmatpush.bf16.msrb.mxu1 %v3185_v47  ;;  %1464 = vmatpush.bf16.msrb.mxu0 %v3217_v48  ;;  %v3204_v47 = vld [vmem:[%s4155_s3 + $0xd0] sm:$0xff]  ;;  %v3623_v55 = vadd.f32 %v3371_v5, %v293_v43  ;;  %v288_v10 = vmul.f32 %v3353_v3, %v252_v57 }
  0x2f   : > { %438 = vst [vmem:[#allocation2 + $0x1f8] sm:$0xff] %v3296_v1  ;;  %v3611_v48 = vadd.f32 %v3371_v5, %v285_v36  ;;  %v355_v44 = vmax.f32 %v323_v24, 0.0 }
  0x30   : > { %997 = vmatpush.bf16.msrb.mxu2 %v3200_v50  ;;  %439 = vst [vmem:[#allocation2 + $0x200] sm:$0xff] %v3296_v1  ;;  %v302_v50 = vmul.f32 %v3353_v3, %v266_v41 }
  0x31   : > { %1231 = vmatpush.bf16.msrb.mxu3 %v3208_v51  ;;  %442 = vst [vmem:[#allocation2 + $0x218] sm:$0xff] %v3296_v1 }
  0x32   : > { %443 = vst [vmem:[#allocation2 + $0x220] sm:$0xff] %v3296_v1  ;;  %795 = vmatpush.bf16.msrb.mxu1 %v3184_v61  ;;  %1465 = vmatpush.bf16.msrb.mxu0 %v3216_v62  ;;  %v3195_v61 = vld [vmem:[%s4155_s3 + $0x88] sm:$0xff]  ;;  %v338_v2 = vadd.f32 %v3371_v5, %v302_v50 }
  0x33   : > { %444 = vst [vmem:[#allocation2 + $0x228] sm:$0xff] %v3296_v1  ;;  %v3203_v62 = vld [vmem:[%s4155_s3 + $0xc8] sm:$0xff] }
  0x34   : > { %998 = vmatpush.bf16.msrb.mxu2 %v3199_v63  ;;  %445 = vst [vmem:[#allocation2 + $0x230] sm:$0xff] %v3296_v1  ;;  %v353_v63 = vmax.f32 %v3611_v48, 0.0 }
  0x35   : > { %1232 = vmatpush.bf16.msrb.mxu3 %v3207_v0  ;;  %446 = vst [vmem:[#allocation2 + $0x238] sm:$0xff] %v3296_v1  ;;  %v250_v1 = vld [vmem:[%s3366_s7 + $0x58] sm:$0xff] }
  0x36   : > { %462 = vst [vmem:[#allocation2 + $0x108] sm:$0xff] %v357_v30  ;;  %796 = vmatpush.bf16.msrb.mxu1 %v3183_v12  ;;  %1466 = vmatpush.bf16.msrb.mxu0 %v3215_v13  ;;  %v3197_v30 = vld [vmem:[%s4155_s3 + $0x98] sm:$0xff]  ;;  %v286_v28 = vmul.f32 %v3353_v3, %v250_v1  ;;  %v267_v12 = vld [vmem:[%s3366_s7 + $0xe0] sm:$0xff]  ;;  %v361_v13 = vmax.f32 %v3623_v55, 0.0  ;;  %v244_v1 = vld [vmem:[%s3366_s7 + $0x28] sm:$0xff] }
  0x37   : > { %463 = vst [vmem:[#allocation2 + $0x110] sm:$0xff] %v358_v31  ;;  %v3577_v31 = vpack.c.bf16 %v360_v19, %v359_v18  ;;  %v280_v41 = vmul.f32 %v3353_v3, %v244_v1  ;;  %v3239_v1 = vld [vmem:[%s4155_s3 + $0x1e8] sm:$0xff] }
  0x38   : > { %999 = vmatpush.bf16.msrb.mxu2 %v3198_v14  ;;  %470 = vst [vmem:[#allocation2 + $0x188] sm:$0xff] %v365_v33  ;;  %v265_v33 = vld [vmem:[%s3366_s7 + $0xd0] sm:$0xff]  ;;  %v3617_v51 = vadd.f32 %v3371_v5, %v286_v28  ;;  %v295_v14 = vmul.f32 %v3353_v3, %v259_v60  ;;  %v3210_v28 = vld [vmem:[%s4155_s3 + $0x100] sm:$0xff] }
  0x39   : > { %1233 = vmatpush.bf16.msrb.mxu3 %v3206_v15  ;;  %471 = vst [vmem:[#allocation2 + $0x190] sm:$0xff] %v366_v34  ;;  %v3213_v34 = vld [vmem:[%s4155_s3 + $0x118] sm:$0xff]  ;;  %v301_v49 = vmul.f32 %v3353_v3, %v265_v33  ;;  %v268_v15 = vld [vmem:[%s3366_s7 + $0xe8] sm:$0xff]  ;;  %v316_v50 = vadd.f32 %v3371_v5, %v280_v41 }
  0x3a   : > { %456 = vst [vmem:[#allocation2 + $0xa8] sm:$0xff] %v351_v16  ;;  %797 = vmatpush.bf16.msrb.mxu1 %v3182_v27  ;;  %1467 = vmatpush.bf16.msrb.mxu0 %v3214_v32  ;;  %v354_v7 = vmax.f32 %v3617_v51, 0.0  ;;  %v3211_v16 = vld [vmem:[%s4155_s3 + $0x108] sm:$0xff]  ;;  %v303_v27 = vmul.f32 %v3353_v3, %v267_v12  ;;  %v345_v32 = vmax.f32 %v313_v8, 0.0  ;;  %v331_v36 = vadd.f32 %v3371_v5, %v295_v14  ;;  %v3240_v12 = vld [vmem:[%s4155_s3 + $0x1f0] sm:$0xff] }
  0x3b   : > { %457 = vst [vmem:[#allocation2 + $0xb0] sm:$0xff] %v352_v17  ;;  %690 = vmatmul.bf16.gmra.mxu1 %v3575_v26  ;;  %710 = vmatmul.bf16.gmra.mxu2 %v3577_v31  ;;  %v337_v0 = vadd.f32 %v3371_v5, %v301_v49  ;;  %v362_v17 = vmax.f32 %v330_v59, 0.0  ;;  %v348_v57 = vmax.f32 %v316_v50, 0.0  ;;  %v3248_v14 = vld [vmem:[%s4155_s3 + $0x230] sm:$0xff]  ;;  %v3222_v50 = vld [vmem:[%s4155_s3 + $0x160] sm:$0xff] }
  0x3c   : > { %1000 = vmatpush.bf16.msrb.mxu2 %v3197_v30  ;;  %464 = vst [vmem:[#allocation2 + $0x128] sm:$0xff] %v359_v18  ;;  %730 = vmatmul.bf16.gmra.mxu3 %v589_v39  ;;  %v296_v18 = vmul.f32 %v3353_v3, %v260_v6  ;;  %v324_v30 = vadd.f32 %v3371_v5, %v288_v10  ;;  %v3178_v39 = vld [vmem:[%s4155_s3] sm:$0xff]  ;;  %v363_v48 = vmax.f32 %v331_v36, 0.0  ;;  %v3232_v10 = vld [vmem:[%s4155_s3 + $0x1b0] sm:$0xff] }
  0x3d   : > { %1234 = vmatpush.bf16.msrb.mxu3 %v3205_v35  ;;  %465 = vst [vmem:[#allocation2 + $0x130] sm:$0xff] %v360_v19  ;;  %670 = vmatmul.bf16.gmra.mxu0 %v3587_v40  ;;  %v243_v19 = vld [vmem:[%s3366_s7 + $0x20] sm:$0xff]  ;;  %v304_v35 = vmul.f32 %v3353_v3, %v268_v15  ;;  %v3686_v42 = vpack.c.bf16 %v354_v7, %v353_v63  ;;  %v892_v41 = vld [vmem:[#allocation2 + $0x91] sm:$0xff] }
  0x3e   : > { %472 = vst [vmem:[#allocation2 + $0x1a8] sm:$0xff] %v367_v20  ;;  %798 = vmatpush.bf16.msrb.mxu1 %v3181_v29  ;;  %1468 = vmatpush.bf16.msrb.mxu0 %v3213_v34  ;;  %v3194_v20 = vld [vmem:[%s4155_s3 + $0x80] sm:$0xff]  ;;  %v279_v37 = vmul.f32 %v3353_v3, %v243_v19  ;;  %v332_v33 = vadd.f32 %v3371_v5, %v296_v18 }
  0x3f   : > { %473 = vst [vmem:[#allocation2 + $0x1b0] sm:$0xff] %v368_v21  ;;  %v3202_v21 = vld [vmem:[%s4155_s3 + $0xc0] sm:$0xff]  ;;  %v3688_v43 = vpack.c.bf16 %v362_v17, %v361_v13  ;;  %v339_v29 = vadd.f32 %v3371_v5, %v303_v27  ;;  %v3691_v45 = vpack.c.bf16 %v346_v25, %v345_v32  ;;  %v3231_v27 = vld [vmem:[%s4155_s3 + $0x1a8] sm:$0xff] }
  0x40   : > { %1001 = vmatpush.bf16.msrb.mxu2 %v3196_v46  ;;  %448 = vst [vmem:[#allocation2 + $0x28] sm:$0xff] %v343_v22  ;;  %v369_v22 = vmax.f32 %v337_v0, 0.0  ;;  %v356_v46 = vmax.f32 %v324_v30, 0.0  ;;  %v315_v3 = vadd.f32 %v3371_v5, %v279_v37  ;;  %v364_v49 = vmax.f32 %v332_v33, 0.0  ;;  %v883_v0 = vld [vmem:[#allocation2 + $0x9] sm:$0xff] }
  0x41   : > { %1235 = vmatpush.bf16.msrb.mxu3 %v3204_v47  ;;  %449 = vst [vmem:[#allocation2 + $0x30] sm:$0xff] %v344_v23  ;;  %v370_v23 = vmax.f32 %v338_v2, 0.0  ;;  %v340_v47 = vadd.f32 %v3371_v5, %v304_v35  ;;  %v371_v51 = vmax.f32 %v339_v29, 0.0  ;;  %v3225_v5 = vld [vmem:[%s4155_s3 + $0x178] sm:$0xff]  ;;  %v1123_v36 = vld [vmem:[#allocation2 + $0x87] sm:$0xff]  ;;  %v1124_v37 = vld [vmem:[#allocation2 + $0x8f] sm:$0xff] }
  0x42   : > { %458 = vst [vmem:[#allocation2 + $0xc8] sm:$0xff] %v353_v63  ;;  %799 = vmatpush.bf16.msrb.mxu1 %v3180_v56  ;;  %1469 = vmatpush.bf16.msrb.mxu0 %v3212_v58  ;;  %v347_v55 = vmax.f32 %v315_v3, 0.0  ;;  %v3249_v56 = vld [vmem:[%s4155_s3 + $0x238] sm:$0xff]  ;;  %v3711_v58 = vpack.c.bf16 %v356_v46, %v355_v44  ;;  %v3713_v59 = vpack.c.bf16 %v364_v49, %v363_v48  ;;  %v481_v63 = vld [vmem:[#allocation2 + $0xf] sm:$0xff] }
  0x43   : > { %459 = vst [vmem:[#allocation2 + $0xd0] sm:$0xff] %v354_v7  ;;  %v590_v34 = vpack.c.bf16 %v370_v23, %v369_v22  ;;  %v372_v52 = vmax.f32 %v340_v47, 0.0  ;;  %v884_v2 = vld [vmem:[#allocation2 + $0x11] sm:$0xff]  ;;  %v891_v33 = vld [vmem:[#allocation2 + $0x89] sm:$0xff] }
  0x44   : > { %1002 = vmatpush.bf16.msrb.mxu2 %v3195_v61  ;;  %466 = vst [vmem:[#allocation2 + $0x148] sm:$0xff] %v361_v13  ;;  %v579_v61 = vpack.c.bf16 %v348_v57, %v347_v55  ;;  %v915_v8 = vpack.c.bf16 %v884_v2, %v883_v0  ;;  %v3224_v13 = vld [vmem:[%s4155_s3 + $0x170] sm:$0xff] }
  0x45   : > { %1236 = vmatpush.bf16.msrb.mxu3 %v3203_v62  ;;  %467 = vst [vmem:[#allocation2 + $0x150] sm:$0xff] %v362_v17  ;;  %v591_v60 = vpack.c.bf16 %v372_v52, %v371_v51  ;;  %v480_v62 = vld [vmem:[#allocation2 + $0x7] sm:$0xff]  ;;  %v1126_v29 = vld [vmem:[#allocation2 + $0xaf] sm:$0xff] }
  0x46   : > { %474 = vst [vmem:[#allocation2 + $0x1c8] sm:$0xff] %v369_v22  ;;  %800 = vmatpush.bf16.msrb.mxu1 %v3179_v11  ;;  %1470 = vmatpush.bf16.msrb.mxu0 %v3211_v16  ;;  %v512_v7 = vpack.c.bf16 %v481_v63, %v480_v62 }
  0x47   : > { %475 = vst [vmem:[#allocation2 + $0x1d0] sm:$0xff] %v370_v23  ;;  %v1117_v4 = vld [vmem:[#allocation2 + $0x27] sm:$0xff] }
  0x48   : > { %1003 = vmatpush.bf16.msrb.mxu2 %v3194_v20  ;;  %450 = vst [vmem:[#allocation2 + $0x48] sm:$0xff] %v345_v32  ;;  %v1118_v6 = vld [vmem:[#allocation2 + $0x2f] sm:$0xff] }
  0x49   : > { %1237 = vmatpush.bf16.msrb.mxu3 %v3202_v21  ;;  %451 = vst [vmem:[#allocation2 + $0x50] sm:$0xff] %v346_v25  ;;  %v1149_v9 = vpack.c.bf16 %v1118_v6, %v1117_v4  ;;  %v886_v15 = vld [vmem:[#allocation2 + $0x31] sm:$0xff]  ;;  %v3223_v32 = vld [vmem:[%s4155_s3 + $0x168] sm:$0xff] }
  0x4a   : > { %460 = vst [vmem:[#allocation2 + $0xe8] sm:$0xff] %v355_v44  ;;  %801 = vmatpush.bf16.msrb.mxu1 %v3178_v39  ;;  %1471 = vmatpush.bf16.msrb.mxu0 %v3210_v28  ;;  %v3247_v25 = vld [vmem:[%s4155_s3 + $0x228] sm:$0xff]  ;;  %v1152_v28 = vpack.c.bf16 %v1124_v37, %v1123_v36 }
  0x4b   : > { %461 = vst [vmem:[#allocation2 + $0xf0] sm:$0xff] %v356_v46  ;;  %695 = vmatmul.bf16.gmra.mxu1 %v3686_v42  ;;  %715 = vmatmul.bf16.gmra.mxu2 %v3688_v43  ;;  %v1125_v44 = vld [vmem:[#allocation2 + $0xa7] sm:$0xff] }
  0x4c   : > { %468 = vst [vmem:[#allocation2 + $0x168] sm:$0xff] %v363_v48  ;;  %735 = vmatmul.bf16.gmra.mxu3 %v590_v34  ;;  %1933 = vmatpush.bf16.msra.mxu2 %v3233_v53  ;;  %v3757_v34 = vpack.c.bf16 %v892_v41, %v891_v33  ;;  %v1153_v46 = vpack.c.bf16 %v1126_v29, %v1125_v44  ;;  %v3238_v48 = vld [vmem:[%s4155_s3 + $0x1e0] sm:$0xff]  ;;  %v893_v53 = vld [vmem:[#allocation2 + $0xa9] sm:$0xff] }
  0x4d   : > { %675 = vmatmul.bf16.gmra.mxu0 %v3691_v45  ;;  %469 = vst [vmem:[#allocation2 + $0x170] sm:$0xff] %v364_v49  ;;  %2167 = vmatpush.bf16.msra.mxu3 %v3241_v54  ;;  %v894_v54 = vld [vmem:[#allocation2 + $0xb1] sm:$0xff] }
  0x4e   : > { %476 = vst [vmem:[#allocation2 + $0x1e8] sm:$0xff] %v371_v51  ;;  %1698 = vmatpush.bf16.msra.mxu1 %v3225_v5  ;;  %2401 = vmatpush.bf16.msra.mxu0 %v3249_v56  ;;  %v1127_v5 = vld [vmem:[#allocation2 + $0xc7] sm:$0xff] }
  0x4f   : > { %477 = vst [vmem:[#allocation2 + $0x1f0] sm:$0xff] %v372_v52  ;;  %v1119_v11 = vld [vmem:[#allocation2 + $0x47] sm:$0xff] }
  0x50   : > { %452 = vst [vmem:[#allocation2 + $0x68] sm:$0xff] %v347_v55  ;;  %1934 = vmatpush.bf16.msra.mxu2 %v3232_v10  ;;  %v1120_v16 = vld [vmem:[#allocation2 + $0x4f] sm:$0xff]  ;;  %v3246_v52 = vld [vmem:[%s4155_s3 + $0x220] sm:$0xff] }
  0x51   : > { %453 = vst [vmem:[#allocation2 + $0x70] sm:$0xff] %v348_v57  ;;  %2168 = vmatpush.bf16.msra.mxu3 %v3240_v12  ;;  %v3732_v18 = vpack.c.bf16 %v1120_v16, %v1119_v11  ;;  %v887_v19 = vld [vmem:[#allocation2 + $0x49] sm:$0xff]  ;;  %v888_v20 = vld [vmem:[#allocation2 + $0x51] sm:$0xff] }
  0x52   : > { %1699 = vmatpush.bf16.msra.mxu1 %v3224_v13  ;;  %2402 = vmatpush.bf16.msra.mxu0 %v3248_v14  ;;  %v3737_v23 = vpack.c.bf16 %v888_v20, %v887_v19  ;;  %v1128_v55 = vld [vmem:[#allocation2 + $0xcf] sm:$0xff]  ;;  %v3229_v11 = vld [vmem:[%s4155_s3 + $0x198] sm:$0xff] }
  0x53   : > { %v1154_v62 = vpack.c.bf16 %v1128_v55, %v1127_v5  ;;  %v1130_v10 = vld [vmem:[#allocation2 + $0xef] sm:$0xff]  ;;  %v3237_v16 = vld [vmem:[%s4155_s3 + $0x1d8] sm:$0xff] }
  0x54   : > { %1935 = vmatpush.bf16.msra.mxu2 %v3231_v27  ;;  %v897_v27 = vld [vmem:[#allocation2 + $0xe9] sm:$0xff] }
  0x55   : > { %2169 = vmatpush.bf16.msra.mxu3 %v3239_v1  ;;  %v898_v1 = vld [vmem:[#allocation2 + $0xf1] sm:$0xff] }
  0x56   : > { %1700 = vmatpush.bf16.msra.mxu1 %v3223_v32  ;;  %2403 = vmatpush.bf16.msra.mxu0 %v3247_v25  ;;  %v1131_v32 = vld [vmem:[#allocation2 + $0x107] sm:$0xff]  ;;  %v1132_v25 = vld [vmem:[#allocation2 + $0x10f] sm:$0xff] }
  0x57   : > { %v1121_v21 = vld [vmem:[#allocation2 + $0x67] sm:$0xff]  ;;  %v1156_v41 = vpack.c.bf16 %v1132_v25, %v1131_v32  ;;  %v1134_v5 = vld [vmem:[#allocation2 + $0x12f] sm:$0xff] }
  0x58   : > { %v1122_v22 = vld [vmem:[#allocation2 + $0x6f] sm:$0xff] }
  0x59   : > { %v1151_v24 = vpack.c.bf16 %v1122_v22, %v1121_v21  ;;  %v889_v30 = vld [vmem:[#allocation2 + $0x69] sm:$0xff]  ;;  %v890_v35 = vld [vmem:[#allocation2 + $0x71] sm:$0xff]  ;;  %2170 = vmatpush.bf16.msra.mxu3 %v3238_v48 }
  0x5a   : > { %v3753_v39 = vpack.c.bf16 %v890_v35, %v889_v30  ;;  %1701 = vmatpush.bf16.msra.mxu1 %v3222_v50  ;;  %2404 = vmatpush.bf16.msra.mxu0 %v3246_v52  ;;  %v1365_v30 = vld [vmem:[#allocation2 + $0x108] sm:$0xff]  ;;  %v1366_v35 = vld [vmem:[#allocation2 + $0x110] sm:$0xff] }
  0x5b   : > { %700 = vmatmul.bf16.gmra.mxu1 %v3711_v58  ;;  %720 = vmatmul.bf16.gmra.mxu2 %v3713_v59  ;;  %v1390_v44 = vpack.c.bf16 %v1366_v35, %v1365_v30  ;;  %v899_v52 = vld [vmem:[#allocation2 + $0x109] sm:$0xff] }
  0x5c   : > { %740 = vmatmul.bf16.gmra.mxu3 %v591_v60  ;;  %v3789_v60 = vpack.c.bf16 %v894_v54, %v893_v53  ;;  %v900_v53 = vld [vmem:[#allocation2 + $0x111] sm:$0xff]  ;;  %v1133_v54 = vld [vmem:[#allocation2 + $0x127] sm:$0xff] }
  0x5d   : > { %680 = vmatmul.bf16.gmra.mxu0 %v579_v61  ;;  %2171 = vmatpush.bf16.msra.mxu3 %v3237_v16  ;;  %v3236_v16 = vld [vmem:[%s4155_s3 + $0x1d0] sm:$0xff] }
  0x5e   : > { %v3244_v30 = vld [vmem:[%s4155_s3 + $0x210] sm:$0xff] }
  0x61   : > { %2172 = vmatpush.bf16.msra.mxu3 %v3236_v16 }
  0x6b   : > { %802 = vmatmul.bf16.vlgmr.msrb.gmra.mxu1 %v512_v7  ;;  %1004 = vmatmul.bf16.vlgmr.msrb.gmra.mxu2 %v915_v8  ;;  %v895_v7 = vld [vmem:[#allocation2 + $0xc9] sm:$0xff]  ;;  %v896_v8 = vld [vmem:[#allocation2 + $0xd1] sm:$0xff] }
  0x6c   : > { %1238 = vmatmul.bf16.vlgmr.msrb.gmra.mxu3 %v1149_v9  ;;  %v3809_v14 = vpack.c.bf16 %v896_v8, %v895_v7  ;;  %v3860_v7 = vpack.c.bf16 %v900_v53, %v899_v52  ;;  %v1135_v52 = vld [vmem:[#allocation2 + $0x147] sm:$0xff]  ;;  %v1136_v53 = vld [vmem:[#allocation2 + $0x14f] sm:$0xff] }
  0x6d   : > { %1472 = vmatmul.bf16.vlgmr.msrb.gmra.mxu0 %v3587_v40  ;;  %v885_v40 = vld [vmem:[#allocation2 + $0x29] sm:$0xff] }
  0x6e   : > { %v3730_v17 = vpack.c.bf16 %v886_v15, %v885_v40 }
  0x7b   : > { %807 = vmatmul.bf16.gmra.mxu1 %v1149_v9  ;;  %1009 = vmatmul.bf16.gmra.mxu2 %v3730_v17  ;;  %v1129_v9 = vld [vmem:[#allocation2 + $0xe7] sm:$0xff] }
  0x7c   : > { %1243 = vmatmul.bf16.gmra.mxu3 %v3732_v18 }
  0x7d   : > { %1477 = vmatmul.bf16.gmra.mxu0 %v3691_v45 }
  0x8b   : > { %812 = vmatmul.bf16.gmra.mxu1 %v3732_v18  ;;  %1014 = vmatmul.bf16.gmra.mxu2 %v3737_v23 }
  0x8c   : > { %1248 = vmatmul.bf16.gmra.mxu3 %v1151_v24 }
  0x8d   : > { %1482 = vmatmul.bf16.gmra.mxu0 %v579_v61 }
  0x9b   : > { %817 = vmatmul.bf16.gmra.mxu1 %v1151_v24  ;;  %1019 = vmatmul.bf16.gmra.mxu2 %v3753_v39  ;;  %v3245_v24 = vld [vmem:[%s4155_s3 + $0x218] sm:$0xff] }
  0x9c   : > { %1253 = vmatmul.bf16.gmra.mxu3 %v1152_v28  ;;  %2405 = vmatpush.bf16.msra.mxu0 %v3245_v24 }
  0x9d   : > { %1487 = vmatmul.bf16.gmra.mxu0 %v3452_v38  ;;  %v3230_v38 = vld [vmem:[%s4155_s3 + $0x1a0] sm:$0xff] }
  0x9e   : > { %1936 = vmatpush.bf16.msra.mxu2 %v3230_v38 }
  0xa0   : > { %2406 = vmatpush.bf16.msra.mxu0 %v3244_v30 }
  0xa2   : > { %1937 = vmatpush.bf16.msra.mxu2 %v3229_v11  ;;  %v3228_v11 = vld [vmem:[%s4155_s3 + $0x190] sm:$0xff] }
  0xa6   : > { %1938 = vmatpush.bf16.msra.mxu2 %v3228_v11  ;;  %v3882_v11 = vpack.c.bf16 %v1136_v53, %v1135_v52  ;;  %v1137_v52 = vld [vmem:[#allocation2 + $0x167] sm:$0xff]  ;;  %v1138_v53 = vld [vmem:[#allocation2 + $0x16f] sm:$0xff] }
  0xa8   : > { %v3759_v45 = vpop.f32.mrf.mxu1 }
  0xaa   : > { %v3761_v47 = vpop.f32.mrf.mxu0 }
  0xab   : > { %822 = vmatmul.bf16.gmra.mxu1 %v1152_v28  ;;  %1024 = vmatmul.bf16.gmra.mxu2 %v3757_v34  ;;  %v3841_v28 = vpack.c.bf16 %v898_v1, %v897_v27 }
  0xac   : > { %1258 = vmatmul.bf16.gmra.mxu3 %v1153_v46 }
  0xad   : > { %1492 = vmatmul.bf16.gmra.mxu0 %v3575_v26 }
  0xae   : > { %v3771_v3 = vpop.f32.mrf.mxu2 }
  0xaf   : > { %v3773_v49 = vpop.f32.mrf.mxu3 }
  0xb0   : > { %v3778_v51 = vpop.f32.mrf.mxu1 }
  0xb2   : > { %v3780_v26 = vpop.f32.mrf.mxu0 }
  0xb6   : > { %v3785_v56 = vpop.f32.mrf.mxu2 }
  0xb7   : > { %v3787_v57 = vpop.f32.mrf.mxu3 }
  0xb8   : > { %v3791_v61 = vpop.f32.mrf.mxu1 }
  0xba   : > { %v3793_v63 = vpop.f32.mrf.mxu0 }
  0xbb   : > { %827 = vmatmul.bf16.gmra.mxu1 %v1153_v46  ;;  %1029 = vmatmul.bf16.gmra.mxu2 %v3789_v60 }
  0xbc   : > { %1263 = vmatmul.bf16.gmra.mxu3 %v1154_v62 }
  0xbd   : > { %1497 = vmatmul.bf16.gmra.mxu0 %v3686_v42  ;;  %v1155_v42 = vpack.c.bf16 %v1130_v10, %v1129_v9  ;;  %v1157_v9 = vpack.c.bf16 %v1134_v5, %v1133_v54 }
  0xbe   : > { %v3797_v0 = vpop.f32.mrf.mxu2 }
  0xbf   : > { %v3799_v2 = vpop.f32.mrf.mxu3 }
  0xc0   : > { %v3801_v4 = vpop.f32.mrf.mxu1 }
  0xc2   : > { %v3803_v6 = vpop.f32.mrf.mxu0 }
  0xc6   : > { %v3805_v12 = vpop.f32.mrf.mxu2 }
  0xc7   : > { %v3807_v13 = vpop.f32.mrf.mxu3 }
  0xc8   : > { %v3811_v40 = vpop.f32.mrf.mxu1 }
  0xca   : > { %v3813_v15 = vpop.f32.mrf.mxu0 }
  0xcb   : > { %832 = vmatmul.bf16.gmra.mxu1 %v1154_v62  ;;  %1034 = vmatmul.bf16.gmra.mxu2 %v3809_v14 }
  0xcc   : > { %1268 = vmatmul.bf16.gmra.mxu3 %v1155_v42 }
  0xcd   : > { %1502 = vmatmul.bf16.gmra.mxu0 %v3711_v58  ;;  %v3221_v58 = vld [vmem:[%s4155_s3 + $0x158] sm:$0xff] }
  0xce   : > { %v3823_v19 = vpop.f32.mrf.mxu2  ;;  %1702 = vmatpush.bf16.msra.mxu1 %v3221_v58 }
  0xcf   : > { %v3825_v20 = vpop.f32.mrf.mxu3 }
  0xd0   : > { %v3827_v21 = vpop.f32.mrf.mxu1 }
  0xd2   : > { %v3829_v22 = vpop.f32.mrf.mxu0 }
  0xd6   : > { %v3837_v36 = vpop.f32.mrf.mxu2 }
  0xd7   : > { %v3839_v37 = vpop.f32.mrf.mxu3 }
  0xd8   : > { %v3843_v33 = vpop.f32.mrf.mxu1 }
  0xda   : > { %v3845_v29 = vpop.f32.mrf.mxu0 }
  0xdb   : > { %837 = vmatmul.bf16.gmra.mxu1 %v1155_v42  ;;  %1039 = vmatmul.bf16.gmra.mxu2 %v3841_v28 }
  0xdc   : > { %1273 = vmatmul.bf16.gmra.mxu3 %v1156_v41 }
  0xdd   : > { %1507 = vmatmul.bf16.gmra.mxu0 %v1390_v44  ;;  %v902_v44 = vld [vmem:[#allocation2 + $0x131] sm:$0xff] }
  0xde   : > { %v3848_v46 = vpop.f32.mrf.mxu2 }
  0xdf   : > { %v3850_v38 = vpop.f32.mrf.mxu3 }
  0xe0   : > { %v3852_v48 = vpop.f32.mrf.mxu1 }
  0xe2   : > { %v3854_v50 = vpop.f32.mrf.mxu0 }
  0xe6   : > { %v3856_v55 = vpop.f32.mrf.mxu2 }
  0xe7   : > { %v3858_v62 = vpop.f32.mrf.mxu3 }
  0xe8   : > { %v803_v8 = vpop.f32.mrf.mxu1 }
  0xe9   : > { %v804_v10 = vadd.f32 %v803_v8, %v3761_v47 }
  0xea   : > { %v1473_v42 = vpop.f32.mrf.mxu0 }
  0xeb   : > { %842 = vmatmul.bf16.gmra.mxu1 %v1156_v41  ;;  %1044 = vmatmul.bf16.gmra.mxu2 %v3860_v7  ;;  %v901_v41 = vld [vmem:[#allocation2 + $0x129] sm:$0xff] }
  0xec   : > { %1278 = vmatmul.bf16.gmra.mxu3 %v1157_v9  ;;  %v3880_v8 = vpack.c.bf16 %v902_v44, %v901_v41 }
  0xed   : > { %1512 = vmatmul.bf16.gmra.mxu0 %v3577_v31  ;;  %v3220_v31 = vld [vmem:[%s4155_s3 + $0x150] sm:$0xff] }
  0xee   : > { %v1005_v58 = vpop.f32.mrf.mxu2  ;;  %1703 = vmatpush.bf16.msra.mxu1 %v3220_v31 }
  0xef   : > { %v1085_v24 = vadd.f32 %v1005_v58, %v804_v10  ;;  %v1239_v47 = vpop.f32.mrf.mxu3 }
  0xf0   : > { %v805_v27 = vpop.f32.mrf.mxu1 }
  0xf1   : > { %v1319_v1 = vadd.f32 %v1239_v47, %v1085_v24  ;;  %v806_v32 = vadd.f32 %v805_v27, %v3780_v26 }
  0xf2   : > { %v1475_v25 = vpop.f32.mrf.mxu0 }
  0xf3   : > { %v3878_v35 = vadd.f32 %v1473_v42, %v1319_v1 }
  0xf6   : > { %v1007_v54 = vpop.f32.mrf.mxu2 }
  0xf7   : > { %v1086_v5 = vadd.f32 %v1007_v54, %v806_v32  ;;  %v1241_v26 = vpop.f32.mrf.mxu3 }
  0xf8   : > { %v808_v10 = vpop.f32.mrf.mxu1 }
  0xf9   : > { %v1320_v16 = vadd.f32 %v1241_v26, %v1086_v5  ;;  %v809_v58 = vadd.f32 %v808_v10, %v3793_v63  ;;  %v903_v63 = vld [vmem:[#allocation2 + $0x149] sm:$0xff]  ;;  %v1159_v10 = vpack.c.bf16 %v1138_v53, %v1137_v52 }
  0xfa   : > { %v1478_v24 = vpop.f32.mrf.mxu0  ;;  %v905_v53 = vld [vmem:[#allocation2 + $0x169] sm:$0xff] }
  0xfb   : > { %847 = vmatmul.bf16.gmra.mxu1 %v1157_v9  ;;  %1049 = vmatmul.bf16.gmra.mxu2 %v3880_v8  ;;  %v3886_v42 = vadd.f32 %v1475_v25, %v1320_v16  ;;  %v904_v9 = vld [vmem:[#allocation2 + $0x151] sm:$0xff] }
  0xfc   : > { %1283 = vmatmul.bf16.gmra.mxu3 %v3882_v11  ;;  %v3893_v26 = vpack.c.bf16 %v904_v9, %v903_v63  ;;  %v3243_v9 = vld [vmem:[%s4155_s3 + $0x208] sm:$0xff] }
  0xfd   : > { %1517 = vmatmul.bf16.gmra.mxu0 %v3688_v43 }
  0xfe   : > { %v1010_v47 = vpop.f32.mrf.mxu2  ;;  %2407 = vmatpush.bf16.msra.mxu0 %v3243_v9 }
  0xff   : > { %v1087_v27 = vadd.f32 %v1010_v47, %v809_v58  ;;  %v1244_v1 = vpop.f32.mrf.mxu3 }
 0x100   : > { %v810_v32 = vpop.f32.mrf.mxu1 }
 0x101   : > { %v1321_v31 = vadd.f32 %v1244_v1, %v1087_v27  ;;  %v811_v30 = vadd.f32 %v810_v32, %v3803_v6  ;;  %v3235_v27 = vld [vmem:[%s4155_s3 + $0x1c8] sm:$0xff] }
 0x102   : > { %v1480_v41 = vpop.f32.mrf.mxu0  ;;  %2173 = vmatpush.bf16.msra.mxu3 %v3235_v27 }
 0x103   : > { %v3891_v44 = vadd.f32 %v1478_v24, %v1321_v31  ;;  %v3227_v24 = vld [vmem:[%s4155_s3 + $0x188] sm:$0xff] }
 0x104   : > { %1939 = vmatpush.bf16.msra.mxu2 %v3227_v24 }
 0x106   : > { %v1012_v25 = vpop.f32.mrf.mxu2 }
 0x107   : > { %v1088_v54 = vadd.f32 %v1012_v25, %v811_v30  ;;  %v1246_v5 = vpop.f32.mrf.mxu3  ;;  %v906_v25 = vld [vmem:[#allocation2 + $0x171] sm:$0xff] }
 0x108   : > { %v813_v43 = vpop.f32.mrf.mxu1  ;;  %v3916_v27 = vpack.c.bf16 %v906_v25, %v905_v53 }
 0x109   : > { %v1322_v16 = vadd.f32 %v1246_v5, %v1088_v54  ;;  %v814_v58 = vadd.f32 %v813_v43, %v3813_v15  ;;  %v1139_v54 = vld [vmem:[#allocation2 + $0x187] sm:$0xff]  ;;  %v1140_v5 = vld [vmem:[#allocation2 + $0x18f] sm:$0xff] }
 0x10a   : > { %v1483_v47 = vpop.f32.mrf.mxu0  ;;  %v1373_v43 = vld [vmem:[#allocation2 + $0x188] sm:$0xff] }
 0x10b   : > { %852 = vmatmul.bf16.gmra.mxu1 %v3882_v11  ;;  %1054 = vmatmul.bf16.gmra.mxu2 %v3893_v26  ;;  %v3898_v6 = vadd.f32 %v1480_v41, %v1322_v16  ;;  %v1374_v16 = vld [vmem:[#allocation2 + $0x190] sm:$0xff] }
 0x10c   : > { %1288 = vmatmul.bf16.gmra.mxu3 %v1159_v10 }
 0x10d   : > { %1522 = vmatmul.bf16.gmra.mxu0 %v3713_v59  ;;  %v3219_v59 = vld [vmem:[%s4155_s3 + $0x148] sm:$0xff] }
 0x10e   : > { %v1015_v1 = vpop.f32.mrf.mxu2  ;;  %1704 = vmatpush.bf16.msra.mxu1 %v3219_v59 }
 0x10f   : > { %v1089_v15 = vadd.f32 %v1015_v1, %v814_v58  ;;  %v1249_v32 = vpop.f32.mrf.mxu3 }
 0x110   : > { %v815_v31 = vpop.f32.mrf.mxu1 }
 0x111   : > { %v1323_v30 = vadd.f32 %v1249_v32, %v1089_v15  ;;  %v816_v41 = vadd.f32 %v815_v31, %v3829_v22  ;;  %v3918_v15 = vpack.c.bf16 %v1140_v5, %v1139_v54  ;;  %v3920_v32 = vpack.c.bf16 %v1374_v16, %v1373_v43 }
 0x112   : > { %v1485_v63 = vpop.f32.mrf.mxu0 }
 0x113   : > { %v3914_v52 = vadd.f32 %v1483_v47, %v1323_v30  ;;  %4164 = vst [vmem:[#allocation4_spill] sm:$0xff] %v3918_v15 }
 0x114   : > { %4165 = vst [vmem:[#allocation5_spill] sm:$0xff] %v3920_v32 }
 0x115   : > { %4163 = vst [vmem:[#allocation3_spill] sm:$0xff] %v3914_v52 }
 0x116   : > { %v1017_v22 = vpop.f32.mrf.mxu2 }
 0x117   : > { %v1090_v58 = vadd.f32 %v1017_v22, %v816_v41  ;;  %v1251_v24 = vpop.f32.mrf.mxu3  ;;  %v1141_v22 = vld [vmem:[#allocation2 + $0x1a7] sm:$0xff] }
 0x118   : > { %v818_v1 = vpop.f32.mrf.mxu1 }
 0x119   : > { %v1324_v31 = vadd.f32 %v1251_v24, %v1090_v58  ;;  %v819_v47 = vadd.f32 %v818_v1, %v3845_v29  ;;  %v907_v29 = vld [vmem:[#allocation2 + $0x189] sm:$0xff] }
 0x11a   : > { %v1488_v30 = vpop.f32.mrf.mxu0  ;;  %v1375_v58 = vld [vmem:[#allocation2 + $0x1a8] sm:$0xff]  ;;  %v1376_v24 = vld [vmem:[#allocation2 + $0x1b0] sm:$0xff] }
 0x11b   : > { %857 = vmatmul.bf16.gmra.mxu1 %v1159_v10  ;;  %1059 = vmatmul.bf16.gmra.mxu2 %v3916_v27  ;;  %v3924_v59 = vadd.f32 %v1485_v63, %v1324_v31  ;;  %v908_v10 = vld [vmem:[#allocation2 + $0x191] sm:$0xff] }
 0x11c   : > { %1293 = vmatmul.bf16.gmra.mxu3 %v3918_v15  ;;  %v1142_v63 = vld [vmem:[#allocation2 + $0x1af] sm:$0xff] }
 0x11d   : > { %4166 = vst [vmem:[#allocation6_spill] sm:$0xff] %v3924_v59  ;;  %1527 = vmatmul.bf16.gmra.mxu0 %v3920_v32 }
 0x11e   : > { %v1020_v41 = vpop.f32.mrf.mxu2 }
 0x11f   : > { %v1091_v9 = vadd.f32 %v1020_v41, %v819_v47  ;;  %v1254_v53 = vpop.f32.mrf.mxu3  ;;  %v3931_v47 = vpack.c.bf16 %v908_v10, %v907_v29  ;;  %v3234_v29 = vld [vmem:[%s4155_s3 + $0x1c0] sm:$0xff]  ;;  %v270_v10 = vld [vmem:[%s3366_s7 + $0xf8] sm:$0xff] }
 0x120   : > { %v820_v25 = vpop.f32.mrf.mxu1  ;;  %2174 = vmatpush.bf16.msra.mxu3 %v3234_v29 }
 0x121   : > { %v1325_v54 = vadd.f32 %v1254_v53, %v1091_v9  ;;  %v821_v5 = vadd.f32 %v820_v25, %v3854_v50  ;;  %4168 = vst [vmem:[#allocation8_spill] sm:$0xff] %v3931_v47  ;;  %v1161_v9 = vpack.c.bf16 %v1142_v63, %v1141_v22  ;;  %v1395_v53 = vpack.c.bf16 %v1376_v24, %v1375_v58  ;;  %v3286_v24 = vld [vmem:[%s4154_s2] ss:$0 sm:$0xff] }
 0x122   : > { %v1490_v43 = vpop.f32.mrf.mxu0 }
 0x123   : > { %v3929_v16 = vadd.f32 %v1488_v30, %v1325_v54  ;;  %v269_v30 = vld [vmem:[%s3366_s7 + $0xf0] sm:$0xff] }
 0x125   : > { %4167 = vst [vmem:[#allocation7_spill] sm:$0xff] %v3929_v16 }
 0x126   : > { %v1022_v1 = vpop.f32.mrf.mxu2 }
 0x127   : > { %v1092_v31 = vadd.f32 %v1022_v1, %v821_v5  ;;  %v1256_v59 = vpop.f32.mrf.mxu3  ;;  %v3226_v5 = vld [vmem:[%s4155_s3 + $0x180] sm:$0xff] }
 0x128   : > { %v823_v41 = vpop.f32.mrf.mxu1  ;;  %1940 = vmatpush.bf16.msra.mxu2 %v3226_v5 }
 0x129   : > { %v1326_v50 = vadd.f32 %v1256_v59, %v1092_v31  ;;  %v3285_v59 = vld [vmem:[%s4153_s1] ss:$0 sm:$0xff]  ;;  %v824_v63 = vadd.f32 %v823_v41, %v3759_v45 }
 0x12a   : > { %v1493_v25 = vpop.f32.mrf.mxu0  ;;  %v305_v22 = vmul.f32 %v3285_v59, %v269_v30  ;;  %v3218_v45 = vld [vmem:[%s4155_s3 + $0x140] sm:$0xff] }
 0x12b   : > { %862 = vmatmul.bf16.gmra.mxu1 %v3918_v15  ;;  %1064 = vmatmul.bf16.gmra.mxu2 %v3931_v47  ;;  %v3936_v54 = vadd.f32 %v1490_v43, %v1326_v50  ;;  %v306_v43 = vmul.f32 %v3285_v59, %v270_v10  ;;  %v3242_v41 = vld [vmem:[%s4155_s3 + $0x200] sm:$0xff]  ;;  %v909_v10 = vld [vmem:[#allocation2 + $0x1a9] sm:$0xff]  ;;  %v910_v59 = vld [vmem:[#allocation2 + $0x1b1] sm:$0xff] }
 0x12c   : > { %1298 = vmatmul.bf16.gmra.mxu3 %v1161_v9  ;;  %v3952_v1 = vadd.f32 %v3286_v24, %v305_v22  ;;  %1705 = vmatpush.bf16.msra.mxu1 %v3218_v45  ;;  %v1143_v22 = vld [vmem:[#allocation2 + $0x1c7] sm:$0xff]  ;;  %v3971_v32 = vpack.c.bf16 %v910_v59, %v909_v10 }
 0x12d   : > { %4169 = vst [vmem:[#allocation9_spill] sm:$0xff] %v3936_v54  ;;  %1532 = vmatmul.bf16.gmra.mxu0 %v1395_v53  ;;  %v3954_v50 = vadd.f32 %v3286_v24, %v306_v43  ;;  %v1144_v43 = vld [vmem:[#allocation2 + $0x1cf] sm:$0xff] }
 0x12e   : > { %v1025_v58 = vpop.f32.mrf.mxu2  ;;  %v4160_v16 = vmax.f32 %v3952_v1, 0.0  ;;  %2408 = vmatpush.bf16.msra.mxu0 %v3242_v41  ;;  %v1378_v24 = vld [vmem:[#allocation2 + $0x1d0] sm:$0xff]  ;;  %v1162_v41 = vpack.c.bf16 %v1144_v43, %v1143_v22  ;;  %v1145_v43 = vld [vmem:[#allocation2 + $0x1e7] sm:$0xff] }
 0x12f   : > { %v1093_v31 = vadd.f32 %v1025_v58, %v824_v63  ;;  %v1259_v53 = vpop.f32.mrf.mxu3  ;;  %v4162_v5 = vmax.f32 %v3954_v50, 0.0  ;;  %v1377_v58 = vld [vmem:[#allocation2 + $0x1c8] sm:$0xff] }
 0x130   : > { %v825_v54 = vpop.f32.mrf.mxu1  ;;  %478 = vst [vmem:[#allocation2 + $0x208] sm:$0xff] %v4160_v16  ;;  %v1396_v16 = vpack.c.bf16 %v1378_v24, %v1377_v58  ;;  %v911_v22 = vld [vmem:[#allocation2 + $0x1c9] sm:$0xff] }
 0x131   : > { %v1327_v30 = vadd.f32 %v1259_v53, %v1093_v31  ;;  %479 = vst [vmem:[#allocation2 + $0x210] sm:$0xff] %v4162_v5  ;;  %v826_v63 = vadd.f32 %v825_v54, %v3778_v51  ;;  %v1146_v58 = vld [vmem:[#allocation2 + $0x1ef] sm:$0xff] }
 0x132   : > { %v1495_v52 = vpop.f32.mrf.mxu0 }
 0x133   : > { %v3968_v29 = vadd.f32 %v1493_v25, %v1327_v30 }
 0x135   : > { %4170 = vst [vmem:[#allocation10_spill] sm:$0xff] %v3968_v29 }
 0x136   : > { %v1027_v31 = vpop.f32.mrf.mxu2 }
 0x137   : > { %v1094_v53 = vadd.f32 %v1027_v31, %v826_v63  ;;  %v1261_v47 = vpop.f32.mrf.mxu3 }
 0x138   : > { %v828_v45 = vpop.f32.mrf.mxu1 }
 0x139   : > { %v1328_v15 = vadd.f32 %v1261_v47, %v1094_v53  ;;  %v829_v51 = vadd.f32 %v828_v45, %v3791_v61  ;;  %v912_v47 = vld [vmem:[#allocation2 + $0x1d1] sm:$0xff] }
 0x13a   : > { %v1498_v5 = vpop.f32.mrf.mxu0  ;;  %v3980_v61 = vpack.c.bf16 %v912_v47, %v911_v22 }
 0x13b   : > { %867 = vmatmul.bf16.gmra.mxu1 %v1161_v9  ;;  %1069 = vmatmul.bf16.gmra.mxu2 %v3971_v32  ;;  %v3974_v25 = vadd.f32 %v1495_v52, %v1328_v15  ;;  %v1379_v52 = vld [vmem:[#allocation2 + $0x1e8] sm:$0xff]  ;;  %v1380_v15 = vld [vmem:[#allocation2 + $0x1f0] sm:$0xff] }
 0x13c   : > { %1303 = vmatmul.bf16.gmra.mxu3 %v1162_v41 }
 0x13d   : > { %1537 = vmatmul.bf16.gmra.mxu0 %v1396_v16 }
 0x13e   : > { %v1030_v54 = vpop.f32.mrf.mxu2 }
 0x13f   : > { %v1095_v30 = vadd.f32 %v1030_v54, %v829_v51  ;;  %v1264_v63 = vpop.f32.mrf.mxu3  ;;  %v1163_v51 = vpack.c.bf16 %v1146_v58, %v1145_v43  ;;  %v1397_v54 = vpack.c.bf16 %v1380_v15, %v1379_v52  ;;  %v913_v43 = vld [vmem:[#allocation2 + $0x1e9] sm:$0xff]  ;;  %v914_v58 = vld [vmem:[#allocation2 + $0x1f1] sm:$0xff] }
 0x140   : > { %v830_v31 = vpop.f32.mrf.mxu1  ;;  %v1147_v52 = vld [vmem:[#allocation2 + $0x207] sm:$0xff]  ;;  %v1148_v15 = vld [vmem:[#allocation2 + $0x20f] sm:$0xff] }
 0x141   : > { %v1329_v10 = vadd.f32 %v1264_v63, %v1095_v30  ;;  %v831_v9 = vadd.f32 %v830_v31, %v3801_v4 }
 0x142   : > { %v1500_v59 = vpop.f32.mrf.mxu0 }
 0x143   : > { %v3977_v29 = vadd.f32 %v1498_v5, %v1329_v10 }
 0x145   : > { %4171 = vst [vmem:[#allocation11_spill] sm:$0xff] %v3977_v29 }
 0x146   : > { %v1032_v24 = vpop.f32.mrf.mxu2 }
 0x147   : > { %v1096_v16 = vadd.f32 %v1032_v24, %v831_v9  ;;  %v1266_v53 = vpop.f32.mrf.mxu3 }
 0x148   : > { %v833_v45 = vpop.f32.mrf.mxu1 }
 0x149   : > { %v1330_v30 = vadd.f32 %v1266_v53, %v1096_v16  ;;  %v834_v4 = vadd.f32 %v833_v45, %v3811_v40  ;;  %v1164_v45 = vpack.c.bf16 %v1148_v15, %v1147_v52  ;;  %v2054_v15 = vld [vmem:[#allocation2 + $0x48] sm:$0xff] }
 0x14a   : > { %v1503_v63 = vpop.f32.mrf.mxu0 }
 0x14b   : > { %872 = vmatmul.bf16.gmra.mxu1 %v1162_v41  ;;  %1074 = vmatmul.bf16.gmra.mxu2 %v3980_v61  ;;  %v3983_v5 = vadd.f32 %v1500_v59, %v1330_v30  ;;  %v4172_v30 = vmax.f32 %v3952_v1, 0.0 }
 0x14c   : > { %1308 = vmatmul.bf16.gmra.mxu3 %v1163_v51 }
 0x14d   : > { %1542 = vmatmul.bf16.gmra.mxu0 %v1397_v54  ;;  %v3989_v54 = vpack.c.bf16 %v914_v58, %v913_v43 }
 0x14e   : > { %v1035_v31 = vpop.f32.mrf.mxu2 }
 0x14f   : > { %v1097_v10 = vadd.f32 %v1035_v31, %v834_v4  ;;  %v1269_v9 = vpop.f32.mrf.mxu3  ;;  %v4173_v4 = vmax.f32 %v3954_v50, 0.0 }
 0x150   : > { %v835_v24 = vpop.f32.mrf.mxu1 }
 0x151   : > { %v1331_v22 = vadd.f32 %v1269_v9, %v1097_v10  ;;  %v836_v41 = vadd.f32 %v835_v24, %v3827_v21  ;;  %v1398_v31 = vpack.c.bf16 %v4173_v4, %v4172_v30 }
 0x152   : > { %v1505_v47 = vpop.f32.mrf.mxu0 }
 0x153   : > { %v3986_v29 = vadd.f32 %v1503_v63, %v1331_v22 }
 0x156   : > { %v1037_v59 = vpop.f32.mrf.mxu2 }
 0x157   : > { %v1098_v16 = vadd.f32 %v1037_v59, %v836_v41  ;;  %v1271_v53 = vpop.f32.mrf.mxu3 }
 0x158   : > { %v838_v40 = vpop.f32.mrf.mxu1 }
 0x159   : > { %v1332_v63 = vadd.f32 %v1271_v53, %v1098_v16  ;;  %v839_v9 = vadd.f32 %v838_v40, %v3843_v33 }
 0x15a   : > { %v1508_v10 = vpop.f32.mrf.mxu0 }
 0x15b   : > { %877 = vmatmul.bf16.gmra.mxu1 %v1163_v51  ;;  %1079 = vmatmul.bf16.gmra.mxu2 %v3989_v54  ;;  %v3996_v21 = vadd.f32 %v1505_v47, %v1332_v63  ;;  %v2055_v51 = vld [vmem:[#allocation2 + $0x50] sm:$0xff] }
 0x15c   : > { %1313 = vmatmul.bf16.gmra.mxu3 %v1164_v45  ;;  %v2086_v45 = vpack.c.bf16 %v2055_v51, %v2054_v15 }
 0x15d   : > { %1547 = vmatmul.bf16.gmra.mxu0 %v1398_v31 }
 0x15e   : > { %v1040_v24 = vpop.f32.mrf.mxu2 }
 0x15f   : > { %v1099_v22 = vadd.f32 %v1040_v24, %v839_v9  ;;  %v1274_v43 = vpop.f32.mrf.mxu3 }
 0x160   : > { %v840_v58 = vpop.f32.mrf.mxu1 }
 0x161   : > { %v1333_v41 = vadd.f32 %v1274_v43, %v1099_v22  ;;  %v841_v50 = vadd.f32 %v840_v58, %v3852_v48  ;;  %v1587_v22 = vld [vmem:[#allocation2 + $0x49] sm:$0xff]  ;;  %v1588_v58 = vld [vmem:[#allocation2 + $0x51] sm:$0xff] }
 0x162   : > { %v1510_v1 = vpop.f32.mrf.mxu0 }
 0x163   : > { %v3999_v52 = vadd.f32 %v1508_v10, %v1333_v41  ;;  %v1823_v41 = vld [vmem:[#allocation2 + $0x6f] sm:$0xff] }
 0x166   : > { %v1042_v59 = vpop.f32.mrf.mxu2 }
 0x167   : > { %v1100_v16 = vadd.f32 %v1042_v59, %v841_v50  ;;  %v1276_v47 = vpop.f32.mrf.mxu3  ;;  %v2057_v50 = vld [vmem:[#allocation2 + $0x70] sm:$0xff] }
 0x168   : > { %v843_v53 = vpop.f32.mrf.mxu1 }
 0x169   : > { %v1334_v30 = vadd.f32 %v1276_v47, %v1100_v16  ;;  %v844_v48 = vadd.f32 %v843_v53, %v3771_v3  ;;  %v1618_v3 = vpack.c.bf16 %v1588_v58, %v1587_v22  ;;  %v1590_v58 = vld [vmem:[#allocation2 + $0x71] sm:$0xff] }
 0x16a   : > { %v1513_v4 = vpop.f32.mrf.mxu0 }
 0x16b   : > { %1706 = vmatmul.bf16.vlgmr.msra.gmra.mxu1 %v3730_v17  ;;  %1941 = vmatmul.bf16.vlgmr.msra.gmra.mxu2 %v3732_v18  ;;  %v4004_v33 = vadd.f32 %v1510_v1, %v1334_v30  ;;  %v1822_v17 = vld [vmem:[#allocation2 + $0x67] sm:$0xff] }
 0x16c   : > { %2175 = vmatmul.bf16.vlgmr.msra.gmra.mxu3 %v2086_v45  ;;  %v2056_v1 = vld [vmem:[#allocation2 + $0x68] sm:$0xff]  ;;  %v1853_v59 = vpack.c.bf16 %v1823_v41, %v1822_v17 }
 0x16d   : > { %2409 = vmatmul.bf16.vlgmr.msra.gmra.mxu0 %v3737_v23  ;;  %v2087_v47 = vpack.c.bf16 %v2057_v50, %v2056_v1  ;;  %v1824_v17 = vld [vmem:[#allocation2 + $0x87] sm:$0xff]  ;;  %v1825_v41 = vld [vmem:[#allocation2 + $0x8f] sm:$0xff] }
 0x16e   : > { %v1045_v40 = vpop.f32.mrf.mxu2  ;;  %v2059_v1 = vld [vmem:[#allocation2 + $0x90] sm:$0xff] }
 0x16f   : > { %v1101_v31 = vadd.f32 %v1045_v40, %v844_v48  ;;  %v1279_v63 = vpop.f32.mrf.mxu3 }
 0x170   : > { %v845_v10 = vpop.f32.mrf.mxu1 }
 0x171   : > { %v1335_v9 = vadd.f32 %v1279_v63, %v1101_v31  ;;  %v846_v18 = vadd.f32 %v845_v10, %v3785_v56 }
 0x172   : > { %v1515_v24 = vpop.f32.mrf.mxu0 }
 0x173   : > { %v4008_v43 = vadd.f32 %v1513_v4, %v1335_v9  ;;  %v1589_v9 = vld [vmem:[#allocation2 + $0x69] sm:$0xff] }
 0x176   : > { %v1047_v15 = vpop.f32.mrf.mxu2 }
 0x177   : > { %v1102_v23 = vadd.f32 %v1047_v15, %v846_v18  ;;  %v1281_v51 = vpop.f32.mrf.mxu3  ;;  %v2058_v18 = vld [vmem:[#allocation2 + $0x88] sm:$0xff] }
 0x178   : > { %v848_v16 = vpop.f32.mrf.mxu1 }
 0x179   : > { %v1336_v53 = vadd.f32 %v1281_v51, %v1102_v23  ;;  %v849_v56 = vadd.f32 %v848_v16, %v3797_v0  ;;  %v1619_v0 = vpack.c.bf16 %v1590_v58, %v1589_v9  ;;  %v1854_v23 = vpack.c.bf16 %v1825_v41, %v1824_v17  ;;  %v1592_v9 = vld [vmem:[#allocation2 + $0x91] sm:$0xff]  ;;  %v1826_v58 = vld [vmem:[#allocation2 + $0xa7] sm:$0xff] }
 0x17a   : > { %v1518_v45 = vpop.f32.mrf.mxu0  ;;  %v1827_v17 = vld [vmem:[#allocation2 + $0xaf] sm:$0xff] }
 0x17b   : > { %1711 = vmatmul.bf16.gmra.mxu1 %v1618_v3  ;;  %1946 = vmatmul.bf16.gmra.mxu2 %v1853_v59  ;;  %v4011_v30 = vadd.f32 %v1515_v24, %v1336_v53  ;;  %v2088_v3 = vpack.c.bf16 %v2059_v1, %v2058_v18  ;;  %v2060_v41 = vld [vmem:[#allocation2 + $0xa8] sm:$0xff] }
 0x17c   : > { %2180 = vmatmul.bf16.gmra.mxu3 %v2087_v47 }
 0x17d   : > { %2414 = vmatmul.bf16.gmra.mxu0 %v3753_v39 }
 0x17e   : > { %v1050_v4 = vpop.f32.mrf.mxu2 }
 0x17f   : > { %v1103_v48 = vadd.f32 %v1050_v4, %v849_v56  ;;  %v1284_v40 = vpop.f32.mrf.mxu3 }
 0x180   : > { %v850_v31 = vpop.f32.mrf.mxu1 }
 0x181   : > { %v1337_v63 = vadd.f32 %v1284_v40, %v1103_v48  ;;  %v851_v24 = vadd.f32 %v850_v31, %v3805_v12  ;;  %v1591_v31 = vld [vmem:[#allocation2 + $0x89] sm:$0xff] }
 0x182   : > { %v1520_v10 = vpop.f32.mrf.mxu0 }
 0x183   : > { %v4015_v22 = vadd.f32 %v1518_v45, %v1337_v63 }
 0x186   : > { %v1052_v50 = vpop.f32.mrf.mxu2 }
 0x187   : > { %v1104_v39 = vadd.f32 %v1052_v50, %v851_v24  ;;  %v1286_v15 = vpop.f32.mrf.mxu3  ;;  %v2061_v24 = vld [vmem:[#allocation2 + $0xb0] sm:$0xff]  ;;  %v1855_v50 = vpack.c.bf16 %v1827_v17, %v1826_v58  ;;  %v2062_v58 = vld [vmem:[#allocation2 + $0xc8] sm:$0xff] }
 0x188   : > { %v853_v51 = vpop.f32.mrf.mxu1  ;;  %v2063_v17 = vld [vmem:[#allocation2 + $0xd0] sm:$0xff] }
 0x189   : > { %v1338_v59 = vadd.f32 %v1286_v15, %v1104_v39  ;;  %v854_v12 = vadd.f32 %v853_v51, %v3823_v19  ;;  %v1620_v19 = vpack.c.bf16 %v1592_v9, %v1591_v31  ;;  %v2089_v15 = vpack.c.bf16 %v2061_v24, %v2060_v41  ;;  %v1828_v31 = vld [vmem:[#allocation2 + $0xc7] sm:$0xff]  ;;  %v1829_v9 = vld [vmem:[#allocation2 + $0xcf] sm:$0xff] }
 0x18a   : > { %v1523_v16 = vpop.f32.mrf.mxu0  ;;  %v1856_v24 = vpack.c.bf16 %v1829_v9, %v1828_v31  ;;  %v2065_v31 = vld [vmem:[#allocation2 + $0xf0] sm:$0xff] }
 0x18b   : > { %1716 = vmatmul.bf16.gmra.mxu1 %v1619_v0  ;;  %1951 = vmatmul.bf16.gmra.mxu2 %v1854_v23  ;;  %v4018_v47 = vadd.f32 %v1520_v10, %v1338_v59 }
 0x18c   : > { %2185 = vmatmul.bf16.gmra.mxu3 %v2088_v3 }
 0x18d   : > { %2419 = vmatmul.bf16.gmra.mxu0 %v3757_v34 }
 0x18e   : > { %v1055_v53 = vpop.f32.mrf.mxu2 }
 0x18f   : > { %v1105_v45 = vadd.f32 %v1055_v53, %v854_v12  ;;  %v1289_v56 = vpop.f32.mrf.mxu3 }
 0x190   : > { %v855_v4 = vpop.f32.mrf.mxu1 }
 0x191   : > { %v1339_v48 = vadd.f32 %v1289_v56, %v1105_v45  ;;  %v856_v10 = vadd.f32 %v855_v4, %v3837_v36  ;;  %v1593_v56 = vld [vmem:[#allocation2 + $0xa9] sm:$0xff] }
 0x192   : > { %v1525_v40 = vpop.f32.mrf.mxu0 }
 0x193   : > { %v4022_v63 = vadd.f32 %v1523_v16, %v1339_v48  ;;  %v1594_v48 = vld [vmem:[#allocation2 + $0xb1] sm:$0xff] }
 0x196   : > { %v1057_v18 = vpop.f32.mrf.mxu2 }
 0x197   : > { %v1106_v34 = vadd.f32 %v1057_v18, %v856_v10  ;;  %v1291_v1 = vpop.f32.mrf.mxu3 }
 0x198   : > { %v858_v39 = vpop.f32.mrf.mxu1 }
 0x199   : > { %v1340_v0 = vadd.f32 %v1291_v1, %v1106_v34  ;;  %v859_v36 = vadd.f32 %v858_v39, %v3848_v46  ;;  %v1621_v46 = vpack.c.bf16 %v1594_v48, %v1593_v56  ;;  %v2090_v34 = vpack.c.bf16 %v2063_v17, %v2062_v58  ;;  %v1831_v56 = vld [vmem:[#allocation2 + $0xef] sm:$0xff] }
 0x19a   : > { %v1528_v23 = vpop.f32.mrf.mxu0  ;;  %v2064_v48 = vld [vmem:[#allocation2 + $0xe8] sm:$0xff] }
 0x19b   : > { %1721 = vmatmul.bf16.gmra.mxu1 %v1620_v19  ;;  %1956 = vmatmul.bf16.gmra.mxu2 %v1855_v50  ;;  %v4025_v51 = vadd.f32 %v1525_v40, %v1340_v0 }
 0x19c   : > { %2190 = vmatmul.bf16.gmra.mxu3 %v2089_v15 }
 0x19d   : > { %2424 = vmatmul.bf16.gmra.mxu0 %v3789_v60 }
 0x19e   : > { %v1060_v3 = vpop.f32.mrf.mxu2 }
 0x19f   : > { %v1107_v59 = vadd.f32 %v1060_v3, %v859_v36  ;;  %v1294_v16 = vpop.f32.mrf.mxu3 }
 0x1a0   : > { %v860_v12 = vpop.f32.mrf.mxu1 }
 0x1a1   : > { %v1341_v53 = vadd.f32 %v1294_v16, %v1107_v59  ;;  %v861_v40 = vadd.f32 %v860_v12, %v3856_v55  ;;  %v1595_v59 = vld [vmem:[#allocation2 + $0xc9] sm:$0xff]  ;;  %v1596_v12 = vld [vmem:[#allocation2 + $0xd1] sm:$0xff] }
 0x1a2   : > { %v1530_v45 = vpop.f32.mrf.mxu0 }
 0x1a3   : > { %v4029_v4 = vadd.f32 %v1528_v23, %v1341_v53  ;;  %v1830_v53 = vld [vmem:[#allocation2 + $0xe7] sm:$0xff] }
 0x1a4   : > { %v1857_v58 = vpack.c.bf16 %v1831_v56, %v1830_v53 }
 0x1a6   : > { %v1062_v10 = vpop.f32.mrf.mxu2 }
 0x1a7   : > { %v1108_v60 = vadd.f32 %v1062_v10, %v861_v40  ;;  %v1296_v41 = vpop.f32.mrf.mxu3  ;;  %v2091_v10 = vpack.c.bf16 %v2065_v31, %v2064_v48 }
 0x1a8   : > { %v863_v18 = vpop.f32.mrf.mxu1 }
 0x1a9   : > { %v1342_v1 = vadd.f32 %v1296_v41, %v1108_v60  ;;  %v864_v55 = vadd.f32 %v863_v18, %v3773_v49  ;;  %v1622_v49 = vpack.c.bf16 %v1596_v12, %v1595_v59  ;;  %v2066_v59 = vld [vmem:[#allocation2 + $0x108] sm:$0xff]  ;;  %v2067_v12 = vld [vmem:[#allocation2 + $0x110] sm:$0xff] }
 0x1aa   : > { %v1533_v19 = vpop.f32.mrf.mxu0  ;;  %v2092_v31 = vpack.c.bf16 %v2067_v12, %v2066_v59 }
 0x1ab   : > { %1726 = vmatmul.bf16.gmra.mxu1 %v1621_v46  ;;  %1961 = vmatmul.bf16.gmra.mxu2 %v1856_v24  ;;  %v4032_v50 = vadd.f32 %v1530_v45, %v1342_v1 }
 0x1ac   : > { %2195 = vmatmul.bf16.gmra.mxu3 %v2090_v34 }
 0x1ad   : > { %2429 = vmatmul.bf16.gmra.mxu0 %v3809_v14 }
 0x1ae   : > { %v1065_v39 = vpop.f32.mrf.mxu2 }
 0x1af   : > { %v1109_v15 = vadd.f32 %v1065_v39, %v864_v55  ;;  %v1299_v0 = vpop.f32.mrf.mxu3  ;;  %v1597_v39 = vld [vmem:[#allocation2 + $0xe9] sm:$0xff] }
 0x1b0   : > { %v865_v23 = vpop.f32.mrf.mxu1 }
 0x1b1   : > { %v1343_v36 = vadd.f32 %v1299_v0, %v1109_v15  ;;  %v866_v45 = vadd.f32 %v865_v23, %v3787_v57  ;;  %v1598_v0 = vld [vmem:[#allocation2 + $0xf1] sm:$0xff]  ;;  %v1832_v23 = vld [vmem:[#allocation2 + $0x107] sm:$0xff] }
 0x1b2   : > { %v1535_v3 = vpop.f32.mrf.mxu0 }
 0x1b3   : > { %v4036_v16 = vadd.f32 %v1533_v19, %v1343_v36  ;;  %v1833_v36 = vld [vmem:[#allocation2 + $0x10f] sm:$0xff] }
 0x1b6   : > { %v1067_v9 = vpop.f32.mrf.mxu2 }
 0x1b7   : > { %v1110_v14 = vadd.f32 %v1067_v9, %v866_v45  ;;  %v1301_v40 = vpop.f32.mrf.mxu3  ;;  %v1858_v45 = vpack.c.bf16 %v1833_v36, %v1832_v23 }
 0x1b8   : > { %v868_v17 = vpop.f32.mrf.mxu1 }
 0x1b9   : > { %v1344_v60 = vadd.f32 %v1301_v40, %v1110_v14  ;;  %v869_v57 = vadd.f32 %v868_v17, %v3799_v2  ;;  %v1623_v2 = vpack.c.bf16 %v1598_v0, %v1597_v39  ;;  %v2069_v39 = vld [vmem:[#allocation2 + $0x130] sm:$0xff] }
 0x1ba   : > { %v1538_v41 = vpop.f32.mrf.mxu0 }
 0x1bb   : > { %1731 = vmatmul.bf16.gmra.mxu1 %v1622_v49  ;;  %1966 = vmatmul.bf16.gmra.mxu2 %v1857_v58  ;;  %v4039_v46 = vadd.f32 %v1535_v3, %v1344_v60 }
 0x1bc   : > { %2200 = vmatmul.bf16.gmra.mxu3 %v2091_v10 }
 0x1bd   : > { %2434 = vmatmul.bf16.gmra.mxu0 %v3841_v28 }
 0x1be   : > { %v1070_v24 = vpop.f32.mrf.mxu2 }
 0x1bf   : > { %v1111_v18 = vadd.f32 %v1070_v24, %v869_v57  ;;  %v1304_v34 = vpop.f32.mrf.mxu3  ;;  %v1599_v57 = vld [vmem:[#allocation2 + $0x109] sm:$0xff] }
 0x1c0   : > { %v870_v1 = vpop.f32.mrf.mxu1 }
 0x1c1   : > { %v1345_v19 = vadd.f32 %v1304_v34, %v1111_v18  ;;  %v871_v3 = vadd.f32 %v870_v1, %v3807_v13  ;;  %v1600_v18 = vld [vmem:[#allocation2 + $0x111] sm:$0xff]  ;;  %v1834_v34 = vld [vmem:[#allocation2 + $0x127] sm:$0xff] }
 0x1c2   : > { %v1540_v55 = vpop.f32.mrf.mxu0  ;;  %v1835_v1 = vld [vmem:[#allocation2 + $0x12f] sm:$0xff] }
 0x1c3   : > { %v4043_v15 = vadd.f32 %v1538_v41, %v1345_v19  ;;  %v1859_v36 = vpack.c.bf16 %v1835_v1, %v1834_v34 }
 0x1c6   : > { %v1072_v53 = vpop.f32.mrf.mxu2 }
 0x1c7   : > { %v1112_v28 = vadd.f32 %v1072_v53, %v871_v3  ;;  %v1306_v56 = vpop.f32.mrf.mxu3 }
 0x1c8   : > { %v873_v48 = vpop.f32.mrf.mxu1 }
 0x1c9   : > { %v1346_v9 = vadd.f32 %v1306_v56, %v1112_v28  ;;  %v874_v13 = vadd.f32 %v873_v48, %v3825_v20  ;;  %v1624_v20 = vpack.c.bf16 %v1600_v18, %v1599_v57 }
 0x1ca   : > { %v1543_v14 = vpop.f32.mrf.mxu0 }
 0x1cb   : > { %1736 = vmatmul.bf16.gmra.mxu1 %v1623_v2  ;;  %1971 = vmatmul.bf16.gmra.mxu2 %v1858_v45  ;;  %v4046_v40 = vadd.f32 %v1540_v55, %v1346_v9  ;;  %v2068_v55 = vld [vmem:[#allocation2 + $0x128] sm:$0xff] }
 0x1cc   : > { %2205 = vmatmul.bf16.gmra.mxu3 %v2092_v31  ;;  %v2093_v59 = vpack.c.bf16 %v2069_v39, %v2068_v55 }
 0x1cd   : > { %2439 = vmatmul.bf16.gmra.mxu0 %v3860_v7 }
 0x1ce   : > { %v1075_v49 = vpop.f32.mrf.mxu2 }
 0x1cf   : > { %v1113_v58 = vadd.f32 %v1075_v49, %v874_v13  ;;  %v1309_v17 = vpop.f32.mrf.mxu3  ;;  %v2070_v49 = vld [vmem:[#allocation2 + $0x148] sm:$0xff] }
 0x1d0   : > { %v875_v10 = vpop.f32.mrf.mxu1 }
 0x1d1   : > { %v1347_v60 = vadd.f32 %v1309_v17, %v1113_v58  ;;  %v876_v19 = vadd.f32 %v875_v10, %v3839_v37  ;;  %v2071_v58 = vld [vmem:[#allocation2 + $0x150] sm:$0xff] }
 0x1d2   : > { %v1545_v41 = vpop.f32.mrf.mxu0  ;;  %v2094_v57 = vpack.c.bf16 %v2071_v58, %v2070_v49 }
 0x1d3   : > { %v4050_v24 = vadd.f32 %v1543_v14, %v1347_v60 }
 0x1d6   : > { %v1077_v0 = vpop.f32.mrf.mxu2 }
 0x1d7   : > { %v1114_v7 = vadd.f32 %v1077_v0, %v876_v19  ;;  %v1311_v23 = vpop.f32.mrf.mxu3 }
 0x1d8   : > { %v878_v3 = vpop.f32.mrf.mxu1 }
 0x1d9   : > { %v1348_v12 = vadd.f32 %v1311_v23, %v1114_v7  ;;  %v879_v37 = vadd.f32 %v878_v3, %v3850_v38  ;;  %v1604_v23 = vld [vmem:[#allocation2 + $0x151] sm:$0xff] }
 0x1da   : > { %v1548_v53 = vpop.f32.mrf.mxu0  ;;  %v2073_v3 = vld [vmem:[#allocation2 + $0x170] sm:$0xff] }
 0x1db   : > { %1741 = vmatmul.bf16.gmra.mxu1 %v1624_v20  ;;  %1976 = vmatmul.bf16.gmra.mxu2 %v1859_v36  ;;  %v4053_v28 = vadd.f32 %v1545_v41, %v1348_v12  ;;  %v1838_v20 = vld [vmem:[#allocation2 + $0x167] sm:$0xff] }
 0x1dc   : > { %2210 = vmatmul.bf16.gmra.mxu3 %v2093_v59  ;;  %v2072_v36 = vld [vmem:[#allocation2 + $0x168] sm:$0xff] }
 0x1dd   : > { %2444 = vmatmul.bf16.gmra.mxu0 %v3880_v8 }
 0x1de   : > { %v1080_v56 = vpop.f32.mrf.mxu2 }
 0x1df   : > { %v1115_v2 = vadd.f32 %v1080_v56, %v879_v37  ;;  %v1314_v45 = vpop.f32.mrf.mxu3 }
 0x1e0   : > { %v880_v48 = vpop.f32.mrf.mxu1 }
 0x1e1   : > { %v1349_v31 = vadd.f32 %v1314_v45, %v1115_v2  ;;  %v881_v13 = vadd.f32 %v880_v48, %v3858_v62  ;;  %v2095_v45 = vpack.c.bf16 %v2073_v3, %v2072_v36  ;;  %v4176_v36 = vld [vmem:[#allocation8_spill] sm:$0xff] }
 0x1e2   : > { %v1550_v9 = vpop.f32.mrf.mxu0 }
 0x1e3   : > { %v4057_v14 = vadd.f32 %v1548_v53, %v1349_v31 }
 0x1e6   : > { %v1082_v17 = vpop.f32.mrf.mxu2 }
 0x1e7   : > { %v1116_v10 = vadd.f32 %v1082_v17, %v881_v13  ;;  %v1316_v60 = vpop.f32.mrf.mxu3 }
 0x1e8   : > { %v1707_v41 = vpop.f32.mrf.mxu1 }
 0x1e9   : > { %v1350_v18 = vadd.f32 %v1316_v60, %v1116_v10  ;;  %v1787_v62 = vadd.f32 %v1707_v41, %v3878_v35 }
 0x1ea   : > { %v2410_v38 = vpop.f32.mrf.mxu0 }
 0x1eb   : > { %1746 = vmatmul.bf16.gmra.mxu1 %v3880_v8  ;;  %1981 = vmatmul.bf16.gmra.mxu2 %v3882_v11  ;;  %v4062_v34 = vadd.f32 %v1550_v9, %v1350_v18  ;;  %v1603_v11 = vld [vmem:[#allocation2 + $0x149] sm:$0xff] }
 0x1ec   : > { %2215 = vmatmul.bf16.gmra.mxu3 %v2094_v57  ;;  %v1626_v37 = vpack.c.bf16 %v1604_v23, %v1603_v11 }
 0x1ed   : > { %2449 = vmatmul.bf16.gmra.mxu0 %v3893_v26  ;;  %v1839_v26 = vld [vmem:[#allocation2 + $0x16f] sm:$0xff] }
 0x1ee   : > { %v1942_v1 = vpop.f32.mrf.mxu2  ;;  %v1861_v56 = vpack.c.bf16 %v1839_v26, %v1838_v20  ;;  %v4174_v26 = vld [vmem:[#allocation4_spill] sm:$0xff] }
 0x1ef   : > { %v2022_v19 = vadd.f32 %v1942_v1, %v1787_v62  ;;  %v2176_v55 = vpop.f32.mrf.mxu3 }
 0x1f0   : > { %v1709_v39 = vpop.f32.mrf.mxu1 }
 0x1f1   : > { %v2256_v0 = vadd.f32 %v2176_v55, %v2022_v19  ;;  %v1788_v35 = vadd.f32 %v1709_v39, %v3886_v42 }
 0x1f2   : > { %v2412_v7 = vpop.f32.mrf.mxu0 }
 0x1f3   : > { %v2490_v8 = vadd.f32 %v2410_v38, %v2256_v0 }
 0x1f5   : > { %2522 = vst [vmem:[%s4071_s13] sm:$0xff] %v2490_v8  ;;  %v2591_v42 = vmul.f32 %v2490_v8, %v2490_v8 }
 0x1f6   : > { %v1944_v59 = vpop.f32.mrf.mxu2 }
 0x1f7   : > { %v2023_v12 = vadd.f32 %v1944_v59, %v1788_v35  ;;  %v2178_v53 = vpop.f32.mrf.mxu3  ;;  %v4175_v35 = vld [vmem:[#allocation5_spill] sm:$0xff]  ;;  %v4177_v59 = vld [vmem:[#allocation3_spill] sm:$0xff] }
 0x1f8   : > { %v1712_v2 = vpop.f32.mrf.mxu1 }
 0x1f9   : > { %v2257_v48 = vadd.f32 %v2178_v53, %v2023_v12  ;;  %v1789_v58 = vadd.f32 %v1712_v2, %v3891_v44 }
 0x1fa   : > { %v2415_v31 = vpop.f32.mrf.mxu0 }
 0x1fb   : > { %v2491_v9 = vadd.f32 %v2412_v7, %v2257_v48  ;;  %1751 = vmatmul.bf16.gmra.mxu1 %v1626_v37  ;;  %1986 = vmatmul.bf16.gmra.mxu2 %v1861_v56 }
 0x1fc   : > { %2220 = vmatmul.bf16.gmra.mxu3 %v2095_v45 }
 0x1fd   : > { %2454 = vmatmul.bf16.gmra.mxu0 %v3916_v27  ;;  %2523 = vst [vmem:[%s4071_s13 + $0x8] sm:$0xff] %v2491_v9  ;;  %v2554_v13 = vadd.f32 %v2491_v9, %v2490_v8  ;;  %v2592_v49 = vmul.f32 %v2491_v9, %v2491_v9  ;;  %v1607_v9 = vld [vmem:[#allocation2 + $0x189] sm:$0xff] }
 0x1fe   : > { %v1947_v17 = vpop.f32.mrf.mxu2 }
 0x1ff   : > { %v2623_v10 = vadd.f32 %v2592_v49, %v2591_v42  ;;  %v2024_v60 = vadd.f32 %v1947_v17, %v1789_v58  ;;  %v2181_v41 = vpop.f32.mrf.mxu3  ;;  %v1608_v42 = vld [vmem:[#allocation2 + $0x191] sm:$0xff] }
 0x200   : > { %v1714_v57 = vpop.f32.mrf.mxu1  ;;  %v1843_v49 = vld [vmem:[#allocation2 + $0x1af] sm:$0xff] }
 0x201   : > { %v2258_v18 = vadd.f32 %v2181_v41, %v2024_v60  ;;  %v1790_v55 = vadd.f32 %v1714_v57, %v3898_v6  ;;  %v2076_v41 = vld [vmem:[#allocation2 + $0x1a8] sm:$0xff]  ;;  %v2077_v57 = vld [vmem:[#allocation2 + $0x1b0] sm:$0xff] }
 0x202   : > { %v2417_v38 = vpop.f32.mrf.mxu0 }
 0x203   : > { %v2492_v62 = vadd.f32 %v2415_v31, %v2258_v18 }
 0x205   : > { %2524 = vst [vmem:[%s4071_s13 + $0x10] sm:$0xff] %v2492_v62  ;;  %v2555_v1 = vadd.f32 %v2554_v13, %v2492_v62  ;;  %v2593_v19 = vmul.f32 %v2492_v62, %v2492_v62  ;;  %v1842_v13 = vld [vmem:[#allocation2 + $0x1a7] sm:$0xff] }
 0x206   : > { %v1949_v39 = vpop.f32.mrf.mxu2 }
 0x207   : > { %v2624_v0 = vadd.f32 %v2623_v10, %v2593_v19  ;;  %v2025_v7 = vadd.f32 %v1949_v39, %v1790_v55  ;;  %v2183_v8 = vpop.f32.mrf.mxu3  ;;  %v4178_v10 = vld [vmem:[#allocation6_spill] sm:$0xff]  ;;  %v1628_v19 = vpack.c.bf16 %v1608_v42, %v1607_v9  ;;  %v1863_v55 = vpack.c.bf16 %v1843_v49, %v1842_v13  ;;  %v2078_v42 = vld [vmem:[#allocation2 + $0x1c8] sm:$0xff]  ;;  %v2079_v13 = vld [vmem:[#allocation2 + $0x1d0] sm:$0xff] }
 0x208   : > { %v1717_v11 = vpop.f32.mrf.mxu1 }
 0x209   : > { %v2259_v44 = vadd.f32 %v2183_v8, %v2025_v7  ;;  %v1791_v12 = vadd.f32 %v1717_v11, %v4177_v59 }
 0x20a   : > { %v2420_v23 = vpop.f32.mrf.mxu0 }
 0x20b   : > { %v2493_v20 = vadd.f32 %v2417_v38, %v2259_v44  ;;  %1756 = vmatmul.bf16.gmra.mxu1 %v3916_v27  ;;  %1991 = vmatmul.bf16.gmra.mxu2 %v4174_v26 }
 0x20c   : > { %2225 = vmatmul.bf16.gmra.mxu3 %v4175_v35 }
 0x20d   : > { %2459 = vmatmul.bf16.gmra.mxu0 %v4176_v36  ;;  %2525 = vst [vmem:[%s4071_s13 + $0x18] sm:$0xff] %v2493_v20  ;;  %v2556_v3 = vadd.f32 %v2555_v1, %v2493_v20  ;;  %v2594_v6 = vmul.f32 %v2493_v20, %v2493_v20  ;;  %v4179_v20 = vld [vmem:[#allocation7_spill] sm:$0xff] }
 0x20e   : > { %v1952_v53 = vpop.f32.mrf.mxu2 }
 0x20f   : > { %v2625_v37 = vadd.f32 %v2624_v0, %v2594_v6  ;;  %v2026_v56 = vadd.f32 %v1952_v53, %v1791_v12  ;;  %v2186_v2 = vpop.f32.mrf.mxu3  ;;  %v2097_v0 = vpack.c.bf16 %v2077_v57, %v2076_v41 }
 0x210   : > { %v1719_v45 = vpop.f32.mrf.mxu1 }
 0x211   : > { %v2260_v48 = vadd.f32 %v2186_v2, %v2026_v56  ;;  %v1792_v60 = vadd.f32 %v1719_v45, %v4178_v10  ;;  %v1609_v56 = vld [vmem:[#allocation2 + $0x1a9] sm:$0xff]  ;;  %v1610_v2 = vld [vmem:[#allocation2 + $0x1b1] sm:$0xff] }
 0x212   : > { %v2422_v31 = vpop.f32.mrf.mxu0  ;;  %v1844_v45 = vld [vmem:[#allocation2 + $0x1c7] sm:$0xff] }
 0x213   : > { %v2494_v27 = vadd.f32 %v2420_v23, %v2260_v48  ;;  %v1845_v48 = vld [vmem:[#allocation2 + $0x1cf] sm:$0xff] }
 0x214   : > { %v1864_v41 = vpack.c.bf16 %v1845_v48, %v1844_v45 }
 0x215   : > { %2526 = vst [vmem:[%s4071_s13 + $0x20] sm:$0xff] %v2494_v27  ;;  %v2557_v58 = vadd.f32 %v2556_v3, %v2494_v27  ;;  %v2595_v17 = vmul.f32 %v2494_v27, %v2494_v27  ;;  %v4180_v27 = vld [vmem:[#allocation9_spill] sm:$0xff] }
 0x216   : > { %v1954_v18 = vpop.f32.mrf.mxu2 }
 0x217   : > { %v2626_v38 = vadd.f32 %v2625_v37, %v2595_v17  ;;  %v2027_v62 = vadd.f32 %v1954_v18, %v1792_v60  ;;  %v2188_v1 = vpop.f32.mrf.mxu3  ;;  %v1629_v60 = vpack.c.bf16 %v1610_v2, %v1609_v56  ;;  %v2098_v18 = vpack.c.bf16 %v2079_v13, %v2078_v42  ;;  %v2081_v56 = vld [vmem:[#allocation2 + $0x1f0] sm:$0xff] }
 0x218   : > { %v1722_v39 = vpop.f32.mrf.mxu1 }
 0x219   : > { %v2261_v7 = vadd.f32 %v2188_v1, %v2027_v62  ;;  %v1793_v26 = vadd.f32 %v1722_v39, %v4179_v20  ;;  %v4181_v39 = vld [vmem:[#allocation10_spill] sm:$0xff] }
 0x21a   : > { %v2425_v8 = vpop.f32.mrf.mxu0 }
 0x21b   : > { %v2495_v11 = vadd.f32 %v2422_v31, %v2261_v7  ;;  %1761 = vmatmul.bf16.gmra.mxu1 %v1628_v19  ;;  %1996 = vmatmul.bf16.gmra.mxu2 %v1863_v55 }
 0x21c   : > { %2230 = vmatmul.bf16.gmra.mxu3 %v2097_v0 }
 0x21d   : > { %2464 = vmatmul.bf16.gmra.mxu0 %v3971_v32  ;;  %2527 = vst [vmem:[%s4071_s13 + $0x28] sm:$0xff] %v2495_v11  ;;  %v2558_v44 = vadd.f32 %v2557_v58, %v2495_v11  ;;  %v2596_v23 = vmul.f32 %v2495_v11, %v2495_v11 }
 0x21e   : > { %v1957_v35 = vpop.f32.mrf.mxu2 }
 0x21f   : > { %v2627_v36 = vadd.f32 %v2626_v38, %v2596_v23  ;;  %v2028_v3 = vadd.f32 %v1957_v35, %v1793_v26  ;;  %v2191_v6 = vpop.f32.mrf.mxu3 }
 0x220   : > { %v1724_v59 = vpop.f32.mrf.mxu1 }
 0x221   : > { %v2262_v12 = vadd.f32 %v2191_v6, %v2028_v3  ;;  %v1794_v9 = vadd.f32 %v1724_v59, %v4180_v27  ;;  %v1612_v3 = vld [vmem:[#allocation2 + $0x1d1] sm:$0xff]  ;;  %v1846_v6 = vld [vmem:[#allocation2 + $0x1e7] sm:$0xff] }
 0x222   : > { %v2427_v53 = vpop.f32.mrf.mxu0  ;;  %v1847_v59 = vld [vmem:[#allocation2 + $0x1ef] sm:$0xff] }
 0x223   : > { %v2496_v37 = vadd.f32 %v2425_v8, %v2262_v12  ;;  %v1865_v27 = vpack.c.bf16 %v1847_v59, %v1846_v6 }
 0x225   : > { %2528 = vst [vmem:[%s4071_s13 + $0x30] sm:$0xff] %v2496_v37  ;;  %v2559_v32 = vadd.f32 %v2558_v44, %v2496_v37  ;;  %v2597_v31 = vmul.f32 %v2496_v37, %v2496_v37  ;;  %v2080_v37 = vld [vmem:[#allocation2 + $0x1e8] sm:$0xff] }
 0x226   : > { %v1959_v49 = vpop.f32.mrf.mxu2  ;;  %v2099_v42 = vpack.c.bf16 %v2081_v56, %v2080_v37 }
 0x227   : > { %v2628_v58 = vadd.f32 %v2627_v36, %v2597_v31  ;;  %v2029_v17 = vadd.f32 %v1959_v49, %v1794_v9  ;;  %v2193_v10 = vpop.f32.mrf.mxu3  ;;  %v1611_v36 = vld [vmem:[#allocation2 + $0x1c9] sm:$0xff] }
 0x228   : > { %v1727_v57 = vpop.f32.mrf.mxu1  ;;  %v1630_v31 = vpack.c.bf16 %v1612_v3, %v1611_v36 }
 0x229   : > { %v2263_v38 = vadd.f32 %v2193_v10, %v2029_v17  ;;  %v1795_v0 = vadd.f32 %v1727_v57, %v4181_v39  ;;  %v4182_v10 = vld [vmem:[#allocation11_spill] sm:$0xff]  ;;  %v1613_v39 = vld [vmem:[#allocation2 + $0x1e9] sm:$0xff] }
 0x22a   : > { %v2430_v62 = vpop.f32.mrf.mxu0 }
 0x22b   : > { %v2497_v1 = vadd.f32 %v2427_v53, %v2263_v38  ;;  %1766 = vmatmul.bf16.gmra.mxu1 %v1629_v60  ;;  %2001 = vmatmul.bf16.gmra.mxu2 %v1864_v41 }
 0x22c   : > { %2235 = vmatmul.bf16.gmra.mxu3 %v2098_v18 }
 0x22d   : > { %2469 = vmatmul.bf16.gmra.mxu0 %v3980_v61  ;;  %2529 = vst [vmem:[%s4071_s13 + $0x38] sm:$0xff] %v2497_v1  ;;  %v2560_v19 = vadd.f32 %v2559_v32, %v2497_v1  ;;  %v2598_v55 = vmul.f32 %v2497_v1, %v2497_v1 }
 0x22e   : > { %v1962_v7 = vpop.f32.mrf.mxu2 }
 0x22f   : > { %v2629_v8 = vadd.f32 %v2628_v58, %v2598_v55  ;;  %v2030_v11 = vadd.f32 %v1962_v7, %v1795_v0  ;;  %v2196_v44 = vpop.f32.mrf.mxu3  ;;  %v1614_v0 = vld [vmem:[#allocation2 + $0x1f1] sm:$0xff]  ;;  %v1848_v7 = vld [vmem:[#allocation2 + $0x207] sm:$0xff] }
 0x230   : > { %v1729_v23 = vpop.f32.mrf.mxu1 }
 0x231   : > { %v2264_v20 = vadd.f32 %v2196_v44, %v2030_v11  ;;  %v1796_v53 = vadd.f32 %v1729_v23, %v3974_v25  ;;  %v2082_v11 = vld [vmem:[#allocation2 + $0x208] sm:$0xff] }
 0x232   : > { %v2432_v26 = vpop.f32.mrf.mxu0 }
 0x233   : > { %v2498_v35 = vadd.f32 %v2430_v62, %v2264_v20  ;;  %v2083_v20 = vld [vmem:[#allocation2 + $0x210] sm:$0xff] }
 0x234   : > { %v2100_v37 = vpack.c.bf16 %v2083_v20, %v2082_v11 }
 0x235   : > { %2530 = vst [vmem:[%s4071_s13 + $0x40] sm:$0xff] %v2498_v35  ;;  %v2561_v61 = vadd.f32 %v2560_v19, %v2498_v35  ;;  %v2599_v12 = vmul.f32 %v2498_v35, %v2498_v35  ;;  %v2317_v35 = vld [vmem:[#allocation2 + $0x211] sm:$0xff] }
 0x236   : > { %v1964_v2 = vpop.f32.mrf.mxu2 }
 0x237   : > { %v2630_v45 = vadd.f32 %v2629_v8, %v2599_v12  ;;  %v2031_v48 = vadd.f32 %v1964_v2, %v1796_v53  ;;  %v2198_v32 = vpop.f32.mrf.mxu3  ;;  %v1849_v8 = vld [vmem:[#allocation2 + $0x20f] sm:$0xff] }
 0x238   : > { %v1732_v9 = vpop.f32.mrf.mxu1  ;;  %v1866_v12 = vpack.c.bf16 %v1849_v8, %v1848_v7  ;;  %v3287_v7 = vld [vmem:[#allocation2] sm:$0xff] }
 0x239   : > { %v2265_v13 = vadd.f32 %v2198_v32, %v2031_v48  ;;  %v1797_v60 = vadd.f32 %v1732_v9, %v4182_v10  ;;  %v1850_v10 = vld [vmem:[#allocation2 + $0x227] sm:$0xff]  ;;  %v2101_v8 = vpack.c.bf16 %v3287_v7, %v3287_v7 }
 0x23a   : > { %v2435_v49 = vpop.f32.mrf.mxu0 }
 0x23b   : > { %v2499_v58 = vadd.f32 %v2432_v26, %v2265_v13  ;;  %1771 = vmatmul.bf16.gmra.mxu1 %v1630_v31  ;;  %2006 = vmatmul.bf16.gmra.mxu2 %v1865_v27  ;;  %v2316_v26 = vld [vmem:[#allocation2 + $0x209] sm:$0xff] }
 0x23c   : > { %2240 = vmatmul.bf16.gmra.mxu3 %v2099_v42  ;;  %v2334_v56 = vpack.c.bf16 %v2317_v35, %v2316_v26 }
 0x23d   : > { %2474 = vmatmul.bf16.gmra.mxu0 %v3989_v54  ;;  %2531 = vst [vmem:[%s4071_s13 + $0x48] sm:$0xff] %v2499_v58  ;;  %v2562_v25 = vadd.f32 %v2561_v61, %v2499_v58  ;;  %v2600_v17 = vmul.f32 %v2499_v58, %v2499_v58  ;;  %v1631_v61 = vpack.c.bf16 %v1614_v0, %v1613_v39 }
 0x23e   : > { %v1967_v41 = vpop.f32.mrf.mxu2 }
 0x23f   : > { %v2631_v57 = vadd.f32 %v2630_v45, %v2600_v17  ;;  %v2032_v18 = vadd.f32 %v1967_v41, %v1797_v60  ;;  %v2201_v38 = vpop.f32.mrf.mxu3  ;;  %v1851_v60 = vld [vmem:[#allocation2 + $0x22f] sm:$0xff] }
 0x240   : > { %v1734_v62 = vpop.f32.mrf.mxu1  ;;  %v1867_v39 = vpack.c.bf16 %v1851_v60, %v1850_v10 }
 0x241   : > { %v2266_v1 = vadd.f32 %v2201_v38, %v2032_v18  ;;  %v1798_v23 = vadd.f32 %v1734_v62, %v3983_v5  ;;  %v2318_v38 = vld [vmem:[#allocation2 + $0x229] sm:$0xff]  ;;  %v2319_v62 = vld [vmem:[#allocation2 + $0x231] sm:$0xff] }
 0x242   : > { %v2437_v19 = vpop.f32.mrf.mxu0  ;;  %v2335_v11 = vpack.c.bf16 %v2319_v62, %v2318_v38 }
 0x243   : > { %v2500_v55 = vadd.f32 %v2435_v49, %v2266_v1 }
 0x245   : > { %2532 = vst [vmem:[%s4071_s13 + $0x50] sm:$0xff] %v2500_v55  ;;  %v2563_v54 = vadd.f32 %v2562_v25, %v2500_v55  ;;  %v2601_v44 = vmul.f32 %v2500_v55, %v2500_v55 }
 0x246   : > { %v1969_v36 = vpop.f32.mrf.mxu2 }
 0x247   : > { %v2632_v3 = vadd.f32 %v2631_v57, %v2601_v44  ;;  %v2033_v6 = vadd.f32 %v1969_v36, %v1798_v23  ;;  %v2203_v59 = vpop.f32.mrf.mxu3 }
 0x248   : > { %v1737_v53 = vpop.f32.mrf.mxu1 }
 0x249   : > { %v2267_v2 = vadd.f32 %v2203_v59, %v2033_v6  ;;  %v1799_v31 = vadd.f32 %v1737_v53, %v3986_v29 }
 0x24a   : > { %v2440_v45 = vpop.f32.mrf.mxu0 }
 0x24b   : > { %v2501_v48 = vadd.f32 %v2437_v19, %v2267_v2  ;;  %1776 = vmatmul.bf16.gmra.mxu1 %v1631_v61  ;;  %2011 = vmatmul.bf16.gmra.mxu2 %v1866_v12 }
 0x24c   : > { %2245 = vmatmul.bf16.gmra.mxu3 %v2100_v37 }
 0x24d   : > { %2479 = vmatmul.bf16.gmra.mxu0 %v2334_v56  ;;  %2533 = vst [vmem:[%s4071_s13 + $0x58] sm:$0xff] %v2501_v48  ;;  %v2564_v5 = vadd.f32 %v2563_v54, %v2501_v48  ;;  %v2602_v32 = vmul.f32 %v2501_v48, %v2501_v48 }
 0x24e   : > { %v1972_v27 = vpop.f32.mrf.mxu2 }
 0x24f   : > { %v2633_v9 = vadd.f32 %v2632_v3, %v2602_v32  ;;  %v2034_v42 = vadd.f32 %v1972_v27, %v1799_v31  ;;  %v2206_v13 = vpop.f32.mrf.mxu3 }
 0x250   : > { %v1739_v49 = vpop.f32.mrf.mxu1 }
 0x251   : > { %v2268_v58 = vadd.f32 %v2206_v13, %v2034_v42  ;;  %v1800_v18 = vadd.f32 %v1739_v49, %v3996_v21 }
 0x252   : > { %v2442_v25 = vpop.f32.mrf.mxu0 }
 0x253   : > { %v2502_v17 = vadd.f32 %v2440_v45, %v2268_v58 }
 0x255   : > { %2534 = vst [vmem:[%s4071_s13 + $0x60] sm:$0xff] %v2502_v17  ;;  %v2565_v41 = vadd.f32 %v2564_v5, %v2502_v17  ;;  %v2603_v57 = vmul.f32 %v2502_v17, %v2502_v17 }
 0x256   : > { %v1974_v1 = vpop.f32.mrf.mxu2 }
 0x257   : > { %v2634_v29 = vadd.f32 %v2633_v9, %v2603_v57  ;;  %v2035_v19 = vadd.f32 %v1974_v1, %v1800_v18  ;;  %v2208_v55 = vpop.f32.mrf.mxu3 }
 0x258   : > { %v1742_v0 = vpop.f32.mrf.mxu1 }
 0x259   : > { %v2269_v54 = vadd.f32 %v2208_v55, %v2035_v19  ;;  %v1801_v26 = vadd.f32 %v1742_v0, %v3999_v52 }
 0x25a   : > { %v2445_v44 = vpop.f32.mrf.mxu0 }
 0x25b   : > { %v2503_v23 = vadd.f32 %v2442_v25, %v2269_v54  ;;  %1781 = vmatmul.bf16.gmra.mxu1 %v2334_v56  ;;  %2016 = vmatmul.bf16.gmra.mxu2 %v1867_v39 }
 0x25c   : > { %2250 = vmatmul.bf16.gmra.mxu3 %v2101_v8 }
 0x25d   : > { %2484 = vmatmul.bf16.gmra.mxu0 %v2335_v11  ;;  %2535 = vst [vmem:[%s4071_s13 + $0x68] sm:$0xff] %v2503_v23  ;;  %v2566_v21 = vadd.f32 %v2565_v41, %v2503_v23  ;;  %v2604_v20 = vmul.f32 %v2503_v23, %v2503_v23 }
 0x25e   : > { %v1977_v35 = vpop.f32.mrf.mxu2 }
 0x25f   : > { %v2635_v36 = vadd.f32 %v2634_v29, %v2604_v20  ;;  %v2036_v3 = vadd.f32 %v1977_v35, %v1801_v26  ;;  %v2211_v6 = vpop.f32.mrf.mxu3 }
 0x260   : > { %v1744_v59 = vpop.f32.mrf.mxu1 }
 0x261   : > { %v2270_v61 = vadd.f32 %v2211_v6, %v2036_v3  ;;  %v1802_v2 = vadd.f32 %v1744_v59, %v4004_v33 }
 0x262   : > { %v2447_v12 = vpop.f32.mrf.mxu0 }
 0x263   : > { %v2504_v53 = vadd.f32 %v2445_v44, %v2270_v61 }
 0x265   : > { %2536 = vst [vmem:[%s4071_s13 + $0x70] sm:$0xff] %v2504_v53  ;;  %v2567_v37 = vadd.f32 %v2566_v21, %v2504_v53  ;;  %v2605_v56 = vmul.f32 %v2504_v53, %v2504_v53 }
 0x266   : > { %v1979_v45 = vpop.f32.mrf.mxu2 }
 0x267   : > { %v2636_v48 = vadd.f32 %v2635_v36, %v2605_v56  ;;  %v2037_v5 = vadd.f32 %v1979_v45, %v1802_v2  ;;  %v2213_v32 = vpop.f32.mrf.mxu3 }
 0x268   : > { %v1747_v31 = vpop.f32.mrf.mxu1 }
 0x269   : > { %v2271_v52 = vadd.f32 %v2213_v32, %v2037_v5  ;;  %v1803_v49 = vadd.f32 %v1747_v31, %v4008_v43 }
 0x26a   : > { %v2450_v27 = vpop.f32.mrf.mxu0 }
 0x26b   : > { %v2505_v9 = vadd.f32 %v2447_v12, %v2271_v52 }
 0x26d   : > { %2537 = vst [vmem:[%s4071_s13 + $0x78] sm:$0xff] %v2505_v9  ;;  %v2568_v42 = vadd.f32 %v2567_v37, %v2505_v9  ;;  %v2606_v13 = vmul.f32 %v2505_v9, %v2505_v9 }
 0x26e   : > { %v1982_v58 = vpop.f32.mrf.mxu2 }
 0x26f   : > { %v2637_v25 = vadd.f32 %v2636_v48, %v2606_v13  ;;  %v2038_v17 = vadd.f32 %v1982_v58, %v1803_v49  ;;  %v2216_v10 = vpop.f32.mrf.mxu3 }
 0x270   : > { %v1749_v60 = vpop.f32.mrf.mxu1 }
 0x271   : > { %v2272_v33 = vadd.f32 %v2216_v10, %v2038_v17  ;;  %v1804_v62 = vadd.f32 %v1749_v60, %v4011_v30 }
 0x272   : > { %v2452_v41 = vpop.f32.mrf.mxu0 }
 0x273   : > { %v2506_v57 = vadd.f32 %v2450_v27, %v2272_v33 }
 0x275   : > { %2538 = vst [vmem:[%s4071_s13 + $0x80] sm:$0xff] %v2506_v57  ;;  %v2569_v18 = vadd.f32 %v2568_v42, %v2506_v57  ;;  %v2607_v38 = vmul.f32 %v2506_v57, %v2506_v57 }
 0x276   : > { %v1984_v1 = vpop.f32.mrf.mxu2 }
 0x277   : > { %v2638_v29 = vadd.f32 %v2637_v25, %v2607_v38  ;;  %v2039_v19 = vadd.f32 %v1984_v1, %v1804_v62  ;;  %v2218_v55 = vpop.f32.mrf.mxu3 }
 0x278   : > { %v1752_v39 = vpop.f32.mrf.mxu1 }
 0x279   : > { %v2273_v43 = vadd.f32 %v2218_v55, %v2039_v19  ;;  %v1805_v54 = vadd.f32 %v1752_v39, %v4015_v22 }
 0x27a   : > { %v2455_v0 = vpop.f32.mrf.mxu0 }
 0x27b   : > { %v2507_v7 = vadd.f32 %v2452_v41, %v2273_v43 }
 0x27d   : > { %2539 = vst [vmem:[%s4071_s13 + $0x88] sm:$0xff] %v2507_v7  ;;  %v2570_v8 = vadd.f32 %v2569_v18, %v2507_v7  ;;  %v2608_v11 = vmul.f32 %v2507_v7, %v2507_v7 }
 0x27e   : > { %v1987_v44 = vpop.f32.mrf.mxu2 }
 0x27f   : > { %v2639_v23 = vadd.f32 %v2638_v29, %v2608_v11  ;;  %v2040_v21 = vadd.f32 %v1987_v44, %v1805_v54  ;;  %v2221_v20 = vpop.f32.mrf.mxu3 }
 0x280   : > { %v1754_v26 = vpop.f32.mrf.mxu1 }
 0x281   : > { %v2274_v30 = vadd.f32 %v2221_v20, %v2040_v21  ;;  %v1806_v59 = vadd.f32 %v1754_v26, %v4018_v47 }
 0x282   : > { %v2457_v35 = vpop.f32.mrf.mxu0 }
 0x283   : > { %v2508_v36 = vadd.f32 %v2455_v0, %v2274_v30 }
 0x285   : > { %2540 = vst [vmem:[%s4071_s13 + $0x90] sm:$0xff] %v2508_v36  ;;  %v2571_v3 = vadd.f32 %v2570_v8, %v2508_v36  ;;  %v2609_v6 = vmul.f32 %v2508_v36, %v2508_v36 }
 0x286   : > { %v1989_v61 = vpop.f32.mrf.mxu2 }
 0x287   : > { %v2640_v12 = vadd.f32 %v2639_v23, %v2609_v6  ;;  %v2041_v53 = vadd.f32 %v1989_v61, %v1806_v59  ;;  %v2223_v37 = vpop.f32.mrf.mxu3 }
 0x288   : > { %v1757_v56 = vpop.f32.mrf.mxu1 }
 0x289   : > { %v2275_v22 = vadd.f32 %v2223_v37, %v2041_v53  ;;  %v1807_v32 = vadd.f32 %v1757_v56, %v4022_v63 }
 0x28a   : > { %v2460_v2 = vpop.f32.mrf.mxu0 }
 0x28b   : > { %v2509_v45 = vadd.f32 %v2457_v35, %v2275_v22 }
 0x28d   : > { %2541 = vst [vmem:[%s4071_s13 + $0x98] sm:$0xff] %v2509_v45  ;;  %v2572_v48 = vadd.f32 %v2571_v3, %v2509_v45  ;;  %v2610_v5 = vmul.f32 %v2509_v45, %v2509_v45 }
 0x28e   : > { %v1992_v31 = vpop.f32.mrf.mxu2 }
 0x28f   : > { %v2641_v52 = vadd.f32 %v2640_v12, %v2610_v5  ;;  %v2042_v27 = vadd.f32 %v1992_v31, %v1807_v32  ;;  %v2226_v9 = vpop.f32.mrf.mxu3 }
 0x290   : > { %v1759_v42 = vpop.f32.mrf.mxu1 }
 0x291   : > { %v2276_v47 = vadd.f32 %v2226_v9, %v2042_v27  ;;  %v1808_v17 = vadd.f32 %v1759_v42, %v4025_v51 }
 0x292   : > { %v2462_v13 = vpop.f32.mrf.mxu0 }
 0x293   : > { %v2510_v49 = vadd.f32 %v2460_v2, %v2276_v47 }
 0x295   : > { %2542 = vst [vmem:[%s4071_s13 + $0xa0] sm:$0xff] %v2510_v49  ;;  %v2573_v58 = vadd.f32 %v2572_v48, %v2510_v49  ;;  %v2611_v25 = vmul.f32 %v2510_v49, %v2510_v49 }
 0x296   : > { %v1994_v10 = vpop.f32.mrf.mxu2 }
 0x297   : > { %v2642_v60 = vadd.f32 %v2641_v52, %v2611_v25  ;;  %v2043_v33 = vadd.f32 %v1994_v10, %v1808_v17  ;;  %v2228_v41 = vpop.f32.mrf.mxu3 }
 0x298   : > { %v1762_v57 = vpop.f32.mrf.mxu1 }
 0x299   : > { %v2277_v63 = vadd.f32 %v2228_v41, %v2043_v33  ;;  %v1809_v29 = vadd.f32 %v1762_v57, %v4029_v4 }
 0x29a   : > { %v2465_v18 = vpop.f32.mrf.mxu0 }
 0x29b   : > { %v2511_v38 = vadd.f32 %v2462_v13, %v2277_v63 }
 0x29d   : > { %2543 = vst [vmem:[%s4071_s13 + $0xa8] sm:$0xff] %v2511_v38  ;;  %v2574_v62 = vadd.f32 %v2573_v58, %v2511_v38  ;;  %v2612_v1 = vmul.f32 %v2511_v38, %v2511_v38 }
 0x29e   : > { %v1997_v19 = vpop.f32.mrf.mxu2 }
 0x29f   : > { %v2643_v55 = vadd.f32 %v2642_v60, %v2612_v1  ;;  %v2044_v39 = vadd.f32 %v1997_v19, %v1809_v29  ;;  %v2231_v43 = vpop.f32.mrf.mxu3 }
 0x2a0   : > { %v1764_v0 = vpop.f32.mrf.mxu1 }
 0x2a1   : > { %v2278_v51 = vadd.f32 %v2231_v43, %v2044_v39  ;;  %v1810_v44 = vadd.f32 %v1764_v0, %v4032_v50 }
 0x2a2   : > { %v2467_v7 = vpop.f32.mrf.mxu0 }
 0x2a3   : > { %v2512_v8 = vadd.f32 %v2465_v18, %v2278_v51 }
 0x2a5   : > { %2544 = vst [vmem:[%s4071_s13 + $0xb0] sm:$0xff] %v2512_v8  ;;  %v2575_v11 = vadd.f32 %v2574_v62, %v2512_v8  ;;  %v2613_v54 = vmul.f32 %v2512_v8, %v2512_v8 }
 0x2a6   : > { %v1999_v23 = vpop.f32.mrf.mxu2 }
 0x2a7   : > { %v2644_v21 = vadd.f32 %v2643_v55, %v2613_v54  ;;  %v2045_v20 = vadd.f32 %v1999_v23, %v1810_v44  ;;  %v2233_v26 = vpop.f32.mrf.mxu3 }
 0x2a8   : > { %v1767_v30 = vpop.f32.mrf.mxu1 }
 0x2a9   : > { %v2279_v4 = vadd.f32 %v2233_v26, %v2045_v20  ;;  %v1811_v59 = vadd.f32 %v1767_v30, %v4036_v16 }
 0x2aa   : > { %v2470_v35 = vpop.f32.mrf.mxu0 }
 0x2ab   : > { %v2513_v36 = vadd.f32 %v2467_v7, %v2279_v4 }
 0x2ad   : > { %2545 = vst [vmem:[%s4071_s13 + $0xb8] sm:$0xff] %v2513_v36  ;;  %v2576_v3 = vadd.f32 %v2575_v11, %v2513_v36  ;;  %v2614_v6 = vmul.f32 %v2513_v36, %v2513_v36 }
 0x2ae   : > { %v2002_v61 = vpop.f32.mrf.mxu2 }
 0x2af   : > { %v2645_v12 = vadd.f32 %v2644_v21, %v2614_v6  ;;  %v2046_v53 = vadd.f32 %v2002_v61, %v1811_v59  ;;  %v2236_v37 = vpop.f32.mrf.mxu3 }
 0x2b0   : > { %v1769_v56 = vpop.f32.mrf.mxu1 }
 0x2b1   : > { %v2280_v50 = vadd.f32 %v2236_v37, %v2046_v53  ;;  %v1812_v5 = vadd.f32 %v1769_v56, %v4039_v46 }
 0x2b2   : > { %v2472_v22 = vpop.f32.mrf.mxu0 }
 0x2b3   : > { %v2514_v2 = vadd.f32 %v2470_v35, %v2280_v50 }
 0x2b5   : > { %2546 = vst [vmem:[%s4071_s13 + $0xc0] sm:$0xff] %v2514_v2  ;;  %v2577_v45 = vadd.f32 %v2576_v3, %v2514_v2  ;;  %v2615_v48 = vmul.f32 %v2514_v2, %v2514_v2 }
 0x2b6   : > { %v2004_v32 = vpop.f32.mrf.mxu2 }
 0x2b7   : > { %v2646_v31 = vadd.f32 %v2645_v12, %v2615_v48  ;;  %v2047_v52 = vadd.f32 %v2004_v32, %v1812_v5  ;;  %v2238_v27 = vpop.f32.mrf.mxu3 }
 0x2b8   : > { %v1772_v9 = vpop.f32.mrf.mxu1 }
 0x2b9   : > { %v2281_v16 = vadd.f32 %v2238_v27, %v2047_v52  ;;  %v1813_v58 = vadd.f32 %v1772_v9, %v4043_v15 }
 0x2ba   : > { %v2475_v42 = vpop.f32.mrf.mxu0 }
 0x2bb   : > { %v2515_v47 = vadd.f32 %v2472_v22, %v2281_v16 }
 0x2bd   : > { %2547 = vst [vmem:[%s4071_s13 + $0xc8] sm:$0xff] %v2515_v47  ;;  %v2578_v13 = vadd.f32 %v2577_v45, %v2515_v47  ;;  %v2616_v49 = vmul.f32 %v2515_v47, %v2515_v47 }
 0x2be   : > { %v2007_v25 = vpop.f32.mrf.mxu2 }
 0x2bf   : > { %v2647_v17 = vadd.f32 %v2646_v31, %v2616_v49  ;;  %v2048_v10 = vadd.f32 %v2007_v25, %v1813_v58  ;;  %v2241_v60 = vpop.f32.mrf.mxu3 }
 0x2c0   : > { %v1774_v33 = vpop.f32.mrf.mxu1 }
 0x2c1   : > { %v2282_v46 = vadd.f32 %v2241_v60, %v2048_v10  ;;  %v1814_v38 = vadd.f32 %v1774_v33, %v4046_v40 }
 0x2c2   : > { %v2477_v41 = vpop.f32.mrf.mxu0 }
 0x2c3   : > { %v2516_v57 = vadd.f32 %v2475_v42, %v2282_v46 }
 0x2c5   : > { %2548 = vst [vmem:[%s4071_s13 + $0xd0] sm:$0xff] %v2516_v57  ;;  %v2579_v63 = vadd.f32 %v2578_v13, %v2516_v57  ;;  %v2617_v18 = vmul.f32 %v2516_v57, %v2516_v57 }
 0x2c6   : > { %v2009_v62 = vpop.f32.mrf.mxu2 }
 0x2c7   : > { %v2648_v1 = vadd.f32 %v2647_v17, %v2617_v18  ;;  %v2049_v29 = vadd.f32 %v2009_v62, %v1814_v38  ;;  %v2243_v19 = vpop.f32.mrf.mxu3 }
 0x2c8   : > { %v1777_v15 = vpop.f32.mrf.mxu1 }
 0x2c9   : > { %v2283_v55 = vadd.f32 %v2243_v19, %v2049_v29  ;;  %v1815_v7 = vadd.f32 %v1777_v15, %v4050_v24 }
 0x2ca   : > { %v2480_v43 = vpop.f32.mrf.mxu0 }
 0x2cb   : > { %v2517_v39 = vadd.f32 %v2477_v41, %v2283_v55 }
 0x2cd   : > { %2549 = vst [vmem:[%s4071_s13 + $0xd8] sm:$0xff] %v2517_v39  ;;  %v2580_v0 = vadd.f32 %v2579_v63, %v2517_v39  ;;  %v2618_v51 = vmul.f32 %v2517_v39, %v2517_v39 }
 0x2ce   : > { %v2012_v8 = vpop.f32.mrf.mxu2 }
 0x2cf   : > { %v2649_v11 = vadd.f32 %v2648_v1, %v2618_v51  ;;  %v2050_v54 = vadd.f32 %v2012_v8, %v1815_v7  ;;  %v2246_v44 = vpop.f32.mrf.mxu3 }
 0x2d0   : > { %v1779_v40 = vpop.f32.mrf.mxu1 }
 0x2d1   : > { %v2284_v23 = vadd.f32 %v2246_v44, %v2050_v54  ;;  %v1816_v30 = vadd.f32 %v1779_v40, %v4053_v28 }
 0x2d2   : > { %v2482_v4 = vpop.f32.mrf.mxu0 }
 0x2d3   : > { %v2518_v21 = vadd.f32 %v2480_v43, %v2284_v23 }
 0x2d5   : > { %2550 = vst [vmem:[%s4071_s13 + $0xe0] sm:$0xff] %v2518_v21  ;;  %v2581_v20 = vadd.f32 %v2580_v0, %v2518_v21  ;;  %v2619_v26 = vmul.f32 %v2518_v21, %v2518_v21 }
 0x2d6   : > { %v2014_v35 = vpop.f32.mrf.mxu2 }
 0x2d7   : > { %v2650_v36 = vadd.f32 %v2649_v11, %v2619_v26  ;;  %v2051_v3 = vadd.f32 %v2014_v35, %v1816_v30  ;;  %v2248_v6 = vpop.f32.mrf.mxu3 }
 0x2d8   : > { %v1782_v24 = vpop.f32.mrf.mxu1 }
 0x2d9   : > { %v2285_v59 = vadd.f32 %v2248_v6, %v2051_v3  ;;  %v1817_v37 = vadd.f32 %v1782_v24, %v4057_v14 }
 0x2da   : > { %v2485_v28 = vpop.f32.mrf.mxu0 }
 0x2db   : > { %v2519_v61 = vadd.f32 %v2482_v4, %v2285_v59 }
 0x2dd   : > { %2551 = vst [vmem:[%s4071_s13 + $0xe8] sm:$0xff] %v2519_v61  ;;  %v2582_v12 = vadd.f32 %v2581_v20, %v2519_v61  ;;  %v2620_v53 = vmul.f32 %v2519_v61, %v2519_v61 }
 0x2de   : > { %v2017_v56 = vpop.f32.mrf.mxu2 }
 0x2df   : > { %v2651_v50 = vadd.f32 %v2650_v36, %v2620_v53  ;;  %v2052_v22 = vadd.f32 %v2017_v56, %v1817_v37  ;;  %v2251_v2 = vpop.f32.mrf.mxu3 }
 0x2e0   : > { %v1784_v48 = vpop.f32.mrf.mxu1 }
 0x2e1   : > { %v2286_v45 = vadd.f32 %v2251_v2, %v2052_v22  ;;  %v1818_v52 = vadd.f32 %v1784_v48, %v4062_v34 }
 0x2e2   : > { %v2487_v47 = vpop.f32.mrf.mxu0 }
 0x2e3   : > { %v2520_v5 = vadd.f32 %v2485_v28, %v2286_v45 }
 0x2e5   : > { %2552 = vst [vmem:[%s4071_s13 + $0xf0] sm:$0xff] %v2520_v5  ;;  %v2583_v32 = vadd.f32 %v2582_v12, %v2520_v5  ;;  %v2621_v31 = vmul.f32 %v2520_v5, %v2520_v5 }
 0x2e6   : > { %v2019_v27 = vpop.f32.mrf.mxu2 }
 0x2e7   : > { %v2652_v9 = vadd.f32 %v2651_v50, %v2621_v31  ;;  %v2053_v16 = vadd.f32 %v2019_v27, %v1818_v52  ;;  %v2253_v14 = vpop.f32.mrf.mxu3 }
 0x2e9   : > { %v2287_v42 = vadd.f32 %v2253_v14, %v2053_v16 }
 0x2eb   : > { %v2521_v13 = vadd.f32 %v2487_v47, %v2287_v42 }
 0x2ed   : > { %2553 = vst [vmem:[%s4071_s13 + $0xf8] sm:$0xff] %v2521_v13  ;;  %v2584_v49 = vadd.f32 %v2583_v32, %v2521_v13  ;;  %v2622_v58 = vmul.f32 %v2521_v13, %v2521_v13 }
 0x2ef   : > { %v2585_v25 = vrot.slane %v2584_v49, 4  ;;  %v2653_v17 = vadd.f32 %v2652_v9, %v2622_v58 }
 0x2f1   : > { %v2586_v10 = vadd.f32 %v2585_v25, %v2584_v49  ;;  %v2654_v60 = vrot.slane %v2653_v17, 4 }
 0x2f3   : > { %v2587_v33 = vrot.slane %v2586_v10, 2  ;;  %v2655_v46 = vadd.f32 %v2654_v60, %v2653_v17 }
 0x2f5   : > { %v2588_v34 = vadd.f32 %v2587_v33, %v2586_v10  ;;  %v2656_v41 = vrot.slane %v2655_v46, 2 }
 0x2f7   : > { %v2589_v57 = vrot.slane %v2588_v34, 1  ;;  %v2657_v63 = vadd.f32 %v2656_v41, %v2655_v46 }
 0x2f9   : > { %v2658_v18 = vrot.slane %v2657_v63, 1  ;;  %v2590_v38 = vadd.f32 %v2589_v57, %v2588_v34 }
 0x2fb   : > { %v2659_v62 = vadd.f32 %v2658_v18, %v2657_v63 }
 0x2fd   : > { %v2661_v1 = vsel %vm2660_vm0, %v2590_v38, %v2659_v62 }
 0x2fe   : > { %2662 = vst [vmem:[%s238_s15] sm:$0x3] %v2661_v1 }
 0x2ff PF: > { %s16_s18 = sadd.s32 1, %s3294_s18  }
 0x300   : > { %p13_p5 = scmp.ge.s32.totalorder %s16_s18, 4  }
 0x302   :  { %15 = sbr.rel (!%p13_p5) target bundleno = 1 (0x1), region = 88 }

</bundles_post_ra>
